<compile_context>
chip_gen: v5e
topology: v5e:2x2
jax: 0.10.0
libtpu: 0.0.40
codegen_flags: <defaults>
</compile_context>

<pallas_src>
import jax
import jax.numpy as jnp
from jax.experimental import pallas as pl
from jax.experimental.pallas import tpu as pltpu

N_NODES = 16          # number of graph nodes
HIDDEN = 32           # cfg.in_dim == latent_dims[i] (GPSLayer keeps the dim)
NUM_HEADS = 4         # cfg.num_heads[i]
HEAD_DIM = HIDDEN // NUM_HEADS
NUM_LAYERS = 2        # len(cfg.latent_dims)
FF_DIM = 2 * HIDDEN   # GraphGPS FFN expansion
VOTE_DIM = 4          # nn.Linear(in_dim, 4) voting heads
EPS = 1e-5

PARAM_ORDER = (
    "w_local", "b_local",
    "wq", "bq", "wk", "bk", "wv", "bv", "wo", "bo",
    "ln1l_g", "ln1l_b", "ln1a_g", "ln1a_b",
    "w_ff1", "b_ff1", "w_ff2", "b_ff2",
    "ln2_g", "ln2_b",
    "w_vote", "b_vote",
)


def _layer_norm(h, gamma, beta):
    mu = jnp.mean(h, axis=-1, keepdims=True)
    var = jnp.mean((h - mu) ** 2, axis=-1, keepdims=True)
    return (h - mu) * jax.lax.rsqrt(var + EPS) * gamma + beta


def _gps_voting_kernel(x_ref, adj_ref, mask_ref,
                       w_local_ref, b_local_ref,
                       wq_ref, bq_ref, wk_ref, bk_ref, wv_ref, bv_ref,
                       wo_ref, bo_ref,
                       ln1l_g_ref, ln1l_b_ref, ln1a_g_ref, ln1a_b_ref,
                       w_ff1_ref, b_ff1_ref, w_ff2_ref, b_ff2_ref,
                       ln2_g_ref, ln2_b_ref,
                       w_vote_ref, b_vote_ref,
                       out_ref):
    h = x_ref[...]
    adj = adj_ref[...]
    mask = mask_ref[...]
    vote = jnp.zeros((N_NODES, VOTE_DIM), jnp.float32)
    scale = 1.0 / (HEAD_DIM ** 0.5)

    for l in range(NUM_LAYERS):                 # static unroll, no grid machinery
        h_in = h

        # ---- GPSLayer: local message passing (GCN-style) ----
        # TODO(synk): GPSLayer source / cfg.local_gnn_type not provided; using a
        # GCN-style local model with the GraphGPS residual + LayerNorm structure.
        h_loc = jnp.dot(adj,
                        jnp.dot(h_in, w_local_ref[l],
                                preferred_element_type=jnp.float32),
                        preferred_element_type=jnp.float32) + b_local_ref[l]
        h_loc = jnp.maximum(h_loc, 0.0)
        h_loc = h_in + h_loc                    # dropout -> identity (eval mode)
        h_loc = _layer_norm(h_loc, ln1l_g_ref[l], ln1l_b_ref[l])

        # ---- GPSLayer: global multi-head self-attention ----
        # scale folded into q before the QK^T matmuls
        q = (jnp.dot(h_in, wq_ref[l], preferred_element_type=jnp.float32)
             + bq_ref[l]) * scale
        k = jnp.dot(h_in, wk_ref[l], preferred_element_type=jnp.float32) + bk_ref[l]
        v = jnp.dot(h_in, wv_ref[l], preferred_element_type=jnp.float32) + bv_ref[l]

        heads = []
        for hd in range(NUM_HEADS):             # static head loop
            sl = slice(hd * HEAD_DIM, (hd + 1) * HEAD_DIM)
            s = jax.lax.dot_general(q[:, sl], k[:, sl],
                                    (((1,), (1,)), ((), ())),
                                    preferred_element_type=jnp.float32)
            s = s + mask
            s = s - jnp.max(s, axis=-1, keepdims=True)
            e = jnp.exp(s)
            p = e / jnp.sum(e, axis=-1, keepdims=True)
            heads.append(jnp.dot(p, v[:, sl],
                                 preferred_element_type=jnp.float32))

        # concat heads then a single Wo matmul (one MXU pass instead of 4)
        o = jnp.concatenate(heads, axis=-1)
        h_attn = jnp.dot(o, wo_ref[l], preferred_element_type=jnp.float32) + bo_ref[l]
        h_attn = h_in + h_attn                  # dropout -> identity
        h_attn = _layer_norm(h_attn, ln1a_g_ref[l], ln1a_b_ref[l])

        h = h_loc + h_attn

        # ---- GPSLayer: feed-forward block ----
        ff = jnp.dot(h, w_ff1_ref[l], preferred_element_type=jnp.float32) + b_ff1_ref[l]
        ff = jnp.maximum(ff, 0.0)
        ff = jnp.dot(ff, w_ff2_ref[l], preferred_element_type=jnp.float32) + b_ff2_ref[l]
        h = h + ff
        h = _layer_norm(h, ln2_g_ref[l], ln2_b_ref[l])

        # ---- voting head: padding_zeros += Linear_l(x) on post-GPS features ----
        vote = vote + jnp.dot(h, w_vote_ref[l],
                              preferred_element_type=jnp.float32) + b_vote_ref[l]

    # torch.cat((padding_zeros, x), dim=1), written once (write-once output)
    out_ref[...] = jnp.concatenate([vote, h], axis=-1)


@jax.jit
def gps_model_with_voting(x, adj, mask, params):
    ordered = [params[k] for k in PARAM_ORDER]
    n_in = 3 + len(ordered)
    vmem_spec = pl.BlockSpec(memory_space=pltpu.MemorySpace.VMEM)
    return pl.pallas_call(
        _gps_voting_kernel,
        out_shape=jax.ShapeDtypeStruct((N_NODES, VOTE_DIM + HIDDEN), jnp.float32),
        in_specs=[vmem_spec] * n_in,
        out_specs=vmem_spec,
    )(x, adj, mask, *ordered)


# --------------------------- glue / setup -----------------------------------

def init_params(key):
    L, D, F, V = NUM_LAYERS, HIDDEN, FF_DIM, VOTE_DIM
    w_shapes = {
        "w_local": (L, D, D), "wq": (L, D, D), "wk": (L, D, D),
        "wv": (L, D, D), "wo": (L, D, D),
        "w_ff1": (L, D, F), "w_ff2": (L, F, D), "w_vote": (L, D, V),
    }
    b_shapes = {
        "b_local": (L, 1, D), "bq": (L, 1, D), "bk": (L, 1, D),
        "bv": (L, 1, D), "bo": (L, 1, D),
        "b_ff1": (L, 1, F), "b_ff2": (L, 1, D), "b_vote": (L, 1, V),
    }
    params = {}
    names = sorted(w_shapes) + sorted(b_shapes)
    keys = jax.random.split(key, len(names))
    for name, k in zip(names, keys):
        if name in w_shapes:
            shape = w_shapes[name]
            params[name] = (jax.random.normal(k, shape, jnp.float32)
                            / jnp.sqrt(shape[1]))
        else:
            shape = b_shapes[name]
            params[name] = 0.1 * jax.random.normal(k, shape, jnp.float32)
    for name in ("ln1l_g", "ln1a_g", "ln2_g"):
        params[name] = jnp.ones((L, 1, D), jnp.float32)
    for name in ("ln1l_b", "ln1a_b", "ln2_b"):
        params[name] = jnp.zeros((L, 1, D), jnp.float32)
    return params


def build_graph(key, n_nodes):
    src = jnp.arange(n_nodes)
    dst = (src + 1) % n_nodes
    k1, k2 = jax.random.split(key)
    r_src = jax.random.randint(k1, (n_nodes,), 0, n_nodes)
    r_dst = jax.random.randint(k2, (n_nodes,), 0, n_nodes)
    edge_index = jnp.stack([jnp.concatenate([src, r_src]),
                            jnp.concatenate([dst, r_dst])])
    node_indices = (jnp.arange(n_nodes) >= n_nodes // 2).astype(jnp.int32)
    return edge_index, node_indices


def densify(edge_index, node_indices, n_nodes):
    a = jnp.zeros((n_nodes, n_nodes), jnp.float32)
    a = a.at[edge_index[0], edge_index[1]].set(1.0)
    a = jnp.maximum(a, a.T)                       # symmetrize
    a = a + jnp.eye(n_nodes, dtype=jnp.float32)   # self loops
    dinv = jax.lax.rsqrt(jnp.sum(a, axis=1))
    adj = a * dinv[:, None] * dinv[None, :]       # D^-1/2 A D^-1/2
    same = node_indices[:, None] == node_indices[None, :]
    mask = jnp.where(same, 0.0, -1e9).astype(jnp.float32)
    return adj, mask


def reference_forward(x, adj, mask, params):
    """Pure-JAX reference with identical math (no Pallas)."""
    h = x
    vote = jnp.zeros((x.shape[0], VOTE_DIM), jnp.float32)
    for l in range(NUM_LAYERS):
        p = {k: params[k][l] for k in PARAM_ORDER}
        h_in = h
        h_loc = jnp.maximum(adj @ (h_in @ p["w_local"]) + p["b_local"], 0.0)
        h_loc = _layer_norm(h_in + h_loc, p["ln1l_g"], p["ln1l_b"])
        q = h_in @ p["wq"] + p["bq"]
        k_ = h_in @ p["wk"] + p["bk"]
        v = h_in @ p["wv"] + p["bv"]
        scale = 1.0 / (HEAD_DIM ** 0.5)
        heads = []
        for hd in range(NUM_HEADS):
            sl = slice(hd * HEAD_DIM, (hd + 1) * HEAD_DIM)
            s = q[:, sl] @ k_[:, sl].T * scale + mask
            heads.append(jax.nn.softmax(s, axis=-1) @ v[:, sl])
        h_attn = jnp.concatenate(heads, -1) @ p["wo"] + p["bo"]
        h_attn = _layer_norm(h_in + h_attn, p["ln1a_g"], p["ln1a_b"])
        h = h_loc + h_attn
        ff = jnp.maximum(h @ p["w_ff1"] + p["b_ff1"], 0.0) @ p["w_ff2"] + p["b_ff2"]
        h = _layer_norm(h + ff, p["ln2_g"], p["ln2_b"])
        vote = vote + h @ p["w_vote"] + p["b_vote"]
    return jnp.concatenate([vote, h], axis=1)


if __name__ == "__main__":
    key = jax.random.PRNGKey(0)
    kx, kg, kp = jax.random.split(key, 3)
    x = jax.random.normal(kx, (N_NODES, HIDDEN), jnp.float32)
    edge_index, node_indices = build_graph(kg, N_NODES)
    adj, mask = densify(edge_index, node_indices, N_NODES)
    params = init_params(kp)

    out = gps_model_with_voting(x, adj, mask, params)
    out = jax.block_until_ready(out)

    ref = reference_forward(x, adj, mask, params)
    assert out.shape == (N_NODES, VOTE_DIM + HIDDEN), out.shape
    max_err = float(jnp.max(jnp.abs(out - ref)))
    assert jnp.allclose(out, ref, atol=1e-4, rtol=1e-4), max_err
    print("KERNEL_OK")
</pallas_src>

<mosaic_0001>
module attributes {stable_mosaic.version = 11 : i64} {
  func.func @_gps_voting_kernel(%arg0: memref<16x32xf32, #tpu.memory_space<vmem>>, %arg1: memref<16x16xf32, #tpu.memory_space<vmem>>, %arg2: memref<16x16xf32, #tpu.memory_space<vmem>>, %arg3: memref<2x32x32xf32, #tpu.memory_space<vmem>>, %arg4: memref<2x1x32xf32, #tpu.memory_space<vmem>>, %arg5: memref<2x32x32xf32, #tpu.memory_space<vmem>>, %arg6: memref<2x1x32xf32, #tpu.memory_space<vmem>>, %arg7: memref<2x32x32xf32, #tpu.memory_space<vmem>>, %arg8: memref<2x1x32xf32, #tpu.memory_space<vmem>>, %arg9: memref<2x32x32xf32, #tpu.memory_space<vmem>>, %arg10: memref<2x1x32xf32, #tpu.memory_space<vmem>>, %arg11: memref<2x32x32xf32, #tpu.memory_space<vmem>>, %arg12: memref<2x1x32xf32, #tpu.memory_space<vmem>>, %arg13: memref<2x1x32xf32, #tpu.memory_space<vmem>>, %arg14: memref<2x1x32xf32, #tpu.memory_space<vmem>>, %arg15: memref<2x1x32xf32, #tpu.memory_space<vmem>>, %arg16: memref<2x1x32xf32, #tpu.memory_space<vmem>>, %arg17: memref<2x32x64xf32, #tpu.memory_space<vmem>>, %arg18: memref<2x1x64xf32, #tpu.memory_space<vmem>>, %arg19: memref<2x64x32xf32, #tpu.memory_space<vmem>>, %arg20: memref<2x1x32xf32, #tpu.memory_space<vmem>>, %arg21: memref<2x1x32xf32, #tpu.memory_space<vmem>>, %arg22: memref<2x1x32xf32, #tpu.memory_space<vmem>>, %arg23: memref<2x32x4xf32, #tpu.memory_space<vmem>>, %arg24: memref<2x1x4xf32, #tpu.memory_space<vmem>>, %arg25: memref<16x36xf32, #tpu.memory_space<vmem>>) attributes {dimension_semantics = [], scalar_prefetch = 0 : i64, scratch_operands = 0 : i64, tpu.core_type = #tpu.core_type<tc>} {
    %c0 = arith.constant 0 : index
    %c0_0 = arith.constant 0 : index
    %0 = vector.load %arg0[%c0, %c0_0] : memref<16x32xf32, #tpu.memory_space<vmem>>, vector<16x32xf32>
    %c0_1 = arith.constant 0 : index
    %c0_2 = arith.constant 0 : index
    %1 = vector.load %arg1[%c0_1, %c0_2] : memref<16x16xf32, #tpu.memory_space<vmem>>, vector<16x16xf32>
    %c0_3 = arith.constant 0 : index
    %c0_4 = arith.constant 0 : index
    %2 = vector.load %arg2[%c0_3, %c0_4] : memref<16x16xf32, #tpu.memory_space<vmem>>, vector<16x16xf32>
    %cst = arith.constant 0.000000e+00 : f32
    %3 = vector.broadcast %cst : f32 to vector<16x4xf32>
    %c0_5 = arith.constant 0 : index
    %c0_6 = arith.constant 0 : index
    %c0_7 = arith.constant 0 : index
    %4 = vector.load %arg3[%c0_5, %c0_6, %c0_7] : memref<2x32x32xf32, #tpu.memory_space<vmem>>, vector<1x32x32xf32>
    %5 = vector.shape_cast %4 : vector<1x32x32xf32> to vector<32x32xf32>
    %cst_8 = arith.constant dense<0.000000e+00> : vector<16x32xf32>
    %6 = tpu.matmul %0, %5, %cst_8 {dimension_numbers = #tpu.dot_dimension_numbers<[1], [0], [0], [1], [0, 0, 1, 1], [], []>} : vector<16x32xf32>, vector<32x32xf32>, vector<16x32xf32> -> vector<16x32xf32>
    %cst_9 = arith.constant dense<0.000000e+00> : vector<16x32xf32>
    %7 = tpu.matmul %1, %6, %cst_9 {dimension_numbers = #tpu.dot_dimension_numbers<[1], [0], [0], [1], [0, 0, 1, 1], [], []>} : vector<16x16xf32>, vector<16x32xf32>, vector<16x32xf32> -> vector<16x32xf32>
    %c0_10 = arith.constant 0 : index
    %c0_11 = arith.constant 0 : index
    %c0_12 = arith.constant 0 : index
    %8 = vector.load %arg4[%c0_10, %c0_11, %c0_12] : memref<2x1x32xf32, #tpu.memory_space<vmem>>, vector<1x1x32xf32>
    %9 = vector.shape_cast %8 : vector<1x1x32xf32> to vector<1x32xf32>
    %10 = vector.broadcast %9 : vector<1x32xf32> to vector<16x32xf32>
    %11 = arith.addf %7, %10 : vector<16x32xf32>
    %cst_13 = arith.constant 0.000000e+00 : f32
    %12 = vector.broadcast %cst_13 : f32 to vector<16x32xf32>
    %13 = arith.maximumf %11, %12 : vector<16x32xf32>
    %14 = arith.addf %0, %13 : vector<16x32xf32>
    %c0_14 = arith.constant 0 : index
    %c0_15 = arith.constant 0 : index
    %c0_16 = arith.constant 0 : index
    %15 = vector.load %arg13[%c0_14, %c0_15, %c0_16] : memref<2x1x32xf32, #tpu.memory_space<vmem>>, vector<1x1x32xf32>
    %16 = vector.shape_cast %15 : vector<1x1x32xf32> to vector<1x32xf32>
    %c0_17 = arith.constant 0 : index
    %c0_18 = arith.constant 0 : index
    %c0_19 = arith.constant 0 : index
    %17 = vector.load %arg14[%c0_17, %c0_18, %c0_19] : memref<2x1x32xf32, #tpu.memory_space<vmem>>, vector<1x1x32xf32>
    %18 = vector.shape_cast %17 : vector<1x1x32xf32> to vector<1x32xf32>
    %cst_20 = arith.constant dense<0.000000e+00> : vector<16xf32>
    %19 = vector.multi_reduction <add>, %14, %cst_20 [1] : vector<16x32xf32> to vector<16xf32>
    %20 = vector.shape_cast %19 : vector<16xf32> to vector<16x1xf32>
    %cst_21 = arith.constant 3.200000e+01 : f32
    %21 = vector.broadcast %cst_21 : f32 to vector<16x1xf32>
    %22 = arith.divf %20, %21 : vector<16x1xf32>
    %23 = vector.broadcast %22 : vector<16x1xf32> to vector<16x32xf32>
    %24 = arith.subf %14, %23 : vector<16x32xf32>
    %25 = arith.mulf %24, %24 : vector<16x32xf32>
    %cst_22 = arith.constant dense<0.000000e+00> : vector<16xf32>
    %26 = vector.multi_reduction <add>, %25, %cst_22 [1] : vector<16x32xf32> to vector<16xf32>
    %27 = vector.shape_cast %26 : vector<16xf32> to vector<16x1xf32>
    %cst_23 = arith.constant 3.200000e+01 : f32
    %28 = vector.broadcast %cst_23 : f32 to vector<16x1xf32>
    %29 = arith.divf %27, %28 : vector<16x1xf32>
    %30 = vector.broadcast %22 : vector<16x1xf32> to vector<16x32xf32>
    %31 = arith.subf %14, %30 : vector<16x32xf32>
    %cst_24 = arith.constant 9.99999974E-6 : f32
    %32 = vector.broadcast %cst_24 : f32 to vector<16x1xf32>
    %33 = arith.addf %29, %32 : vector<16x1xf32>
    %34 = math.rsqrt %33 : vector<16x1xf32>
    %35 = vector.broadcast %34 : vector<16x1xf32> to vector<16x32xf32>
    %36 = arith.mulf %31, %35 : vector<16x32xf32>
    %37 = vector.broadcast %16 : vector<1x32xf32> to vector<16x32xf32>
    %38 = arith.mulf %36, %37 : vector<16x32xf32>
    %39 = vector.broadcast %18 : vector<1x32xf32> to vector<16x32xf32>
    %40 = arith.addf %38, %39 : vector<16x32xf32>
    %c0_25 = arith.constant 0 : index
    %c0_26 = arith.constant 0 : index
    %c0_27 = arith.constant 0 : index
    %41 = vector.load %arg5[%c0_25, %c0_26, %c0_27] : memref<2x32x32xf32, #tpu.memory_space<vmem>>, vector<1x32x32xf32>
    %42 = vector.shape_cast %41 : vector<1x32x32xf32> to vector<32x32xf32>
    %cst_28 = arith.constant dense<0.000000e+00> : vector<16x32xf32>
    %43 = tpu.matmul %0, %42, %cst_28 {dimension_numbers = #tpu.dot_dimension_numbers<[1], [0], [0], [1], [0, 0, 1, 1], [], []>} : vector<16x32xf32>, vector<32x32xf32>, vector<16x32xf32> -> vector<16x32xf32>
    %c0_29 = arith.constant 0 : index
    %c0_30 = arith.constant 0 : index
    %c0_31 = arith.constant 0 : index
    %44 = vector.load %arg6[%c0_29, %c0_30, %c0_31] : memref<2x1x32xf32, #tpu.memory_space<vmem>>, vector<1x1x32xf32>
    %45 = vector.shape_cast %44 : vector<1x1x32xf32> to vector<1x32xf32>
    %46 = vector.broadcast %45 : vector<1x32xf32> to vector<16x32xf32>
    %47 = arith.addf %43, %46 : vector<16x32xf32>
    %cst_32 = arith.constant 0.353553385 : f32
    %48 = vector.broadcast %cst_32 : f32 to vector<16x32xf32>
    %49 = arith.mulf %47, %48 : vector<16x32xf32>
    %c0_33 = arith.constant 0 : index
    %c0_34 = arith.constant 0 : index
    %c0_35 = arith.constant 0 : index
    %50 = vector.load %arg7[%c0_33, %c0_34, %c0_35] : memref<2x32x32xf32, #tpu.memory_space<vmem>>, vector<1x32x32xf32>
    %51 = vector.shape_cast %50 : vector<1x32x32xf32> to vector<32x32xf32>
    %cst_36 = arith.constant dense<0.000000e+00> : vector<16x32xf32>
    %52 = tpu.matmul %0, %51, %cst_36 {dimension_numbers = #tpu.dot_dimension_numbers<[1], [0], [0], [1], [0, 0, 1, 1], [], []>} : vector<16x32xf32>, vector<32x32xf32>, vector<16x32xf32> -> vector<16x32xf32>
    %c0_37 = arith.constant 0 : index
    %c0_38 = arith.constant 0 : index
    %c0_39 = arith.constant 0 : index
    %53 = vector.load %arg8[%c0_37, %c0_38, %c0_39] : memref<2x1x32xf32, #tpu.memory_space<vmem>>, vector<1x1x32xf32>
    %54 = vector.shape_cast %53 : vector<1x1x32xf32> to vector<1x32xf32>
    %55 = vector.broadcast %54 : vector<1x32xf32> to vector<16x32xf32>
    %56 = arith.addf %52, %55 : vector<16x32xf32>
    %c0_40 = arith.constant 0 : index
    %c0_41 = arith.constant 0 : index
    %c0_42 = arith.constant 0 : index
    %57 = vector.load %arg9[%c0_40, %c0_41, %c0_42] : memref<2x32x32xf32, #tpu.memory_space<vmem>>, vector<1x32x32xf32>
    %58 = vector.shape_cast %57 : vector<1x32x32xf32> to vector<32x32xf32>
    %cst_43 = arith.constant dense<0.000000e+00> : vector<16x32xf32>
    %59 = tpu.matmul %0, %58, %cst_43 {dimension_numbers = #tpu.dot_dimension_numbers<[1], [0], [0], [1], [0, 0, 1, 1], [], []>} : vector<16x32xf32>, vector<32x32xf32>, vector<16x32xf32> -> vector<16x32xf32>
    %c0_44 = arith.constant 0 : index
    %c0_45 = arith.constant 0 : index
    %c0_46 = arith.constant 0 : index
    %60 = vector.load %arg10[%c0_44, %c0_45, %c0_46] : memref<2x1x32xf32, #tpu.memory_space<vmem>>, vector<1x1x32xf32>
    %61 = vector.shape_cast %60 : vector<1x1x32xf32> to vector<1x32xf32>
    %62 = vector.broadcast %61 : vector<1x32xf32> to vector<16x32xf32>
    %63 = arith.addf %59, %62 : vector<16x32xf32>
    %64 = vector.extract_strided_slice %49 {offsets = [0, 0], sizes = [16, 8], strides = [1, 1]} : vector<16x32xf32> to vector<16x8xf32>
    %65 = vector.extract_strided_slice %56 {offsets = [0, 0], sizes = [16, 8], strides = [1, 1]} : vector<16x32xf32> to vector<16x8xf32>
    %cst_47 = arith.constant dense<0.000000e+00> : vector<16x16xf32>
    %66 = tpu.matmul %64, %65, %cst_47 {dimension_numbers = #tpu.dot_dimension_numbers<[1], [1], [0], [0], [0, 0, 1, 0], [], []>} : vector<16x8xf32>, vector<16x8xf32>, vector<16x16xf32> -> vector<16x16xf32>
    %67 = arith.addf %66, %2 : vector<16x16xf32>
    %cst_48 = arith.constant dense<0xFF800000> : vector<16xf32>
    %68 = vector.multi_reduction <maximumf>, %67, %cst_48 [1] : vector<16x16xf32> to vector<16xf32>
    %69 = vector.shape_cast %68 : vector<16xf32> to vector<16x1xf32>
    %70 = vector.broadcast %69 : vector<16x1xf32> to vector<16x16xf32>
    %71 = arith.subf %67, %70 : vector<16x16xf32>
    %72 = math.exp %71 : vector<16x16xf32>
    %cst_49 = arith.constant dense<0.000000e+00> : vector<16xf32>
    %73 = vector.multi_reduction <add>, %72, %cst_49 [1] : vector<16x16xf32> to vector<16xf32>
    %74 = vector.shape_cast %73 : vector<16xf32> to vector<16x1xf32>
    %75 = vector.broadcast %74 : vector<16x1xf32> to vector<16x16xf32>
    %76 = arith.divf %72, %75 : vector<16x16xf32>
    %77 = vector.extract_strided_slice %63 {offsets = [0, 0], sizes = [16, 8], strides = [1, 1]} : vector<16x32xf32> to vector<16x8xf32>
    %cst_50 = arith.constant dense<0.000000e+00> : vector<16x8xf32>
    %78 = tpu.matmul %76, %77, %cst_50 {dimension_numbers = #tpu.dot_dimension_numbers<[1], [0], [0], [1], [0, 0, 1, 1], [], []>} : vector<16x16xf32>, vector<16x8xf32>, vector<16x8xf32> -> vector<16x8xf32>
    %79 = vector.extract_strided_slice %49 {offsets = [0, 8], sizes = [16, 8], strides = [1, 1]} : vector<16x32xf32> to vector<16x8xf32>
    %80 = vector.extract_strided_slice %56 {offsets = [0, 8], sizes = [16, 8], strides = [1, 1]} : vector<16x32xf32> to vector<16x8xf32>
    %cst_51 = arith.constant dense<0.000000e+00> : vector<16x16xf32>
    %81 = tpu.matmul %79, %80, %cst_51 {dimension_numbers = #tpu.dot_dimension_numbers<[1], [1], [0], [0], [0, 0, 1, 0], [], []>} : vector<16x8xf32>, vector<16x8xf32>, vector<16x16xf32> -> vector<16x16xf32>
    %82 = arith.addf %81, %2 : vector<16x16xf32>
    %cst_52 = arith.constant dense<0xFF800000> : vector<16xf32>
    %83 = vector.multi_reduction <maximumf>, %82, %cst_52 [1] : vector<16x16xf32> to vector<16xf32>
    %84 = vector.shape_cast %83 : vector<16xf32> to vector<16x1xf32>
    %85 = vector.broadcast %84 : vector<16x1xf32> to vector<16x16xf32>
    %86 = arith.subf %82, %85 : vector<16x16xf32>
    %87 = math.exp %86 : vector<16x16xf32>
    %cst_53 = arith.constant dense<0.000000e+00> : vector<16xf32>
    %88 = vector.multi_reduction <add>, %87, %cst_53 [1] : vector<16x16xf32> to vector<16xf32>
    %89 = vector.shape_cast %88 : vector<16xf32> to vector<16x1xf32>
    %90 = vector.broadcast %89 : vector<16x1xf32> to vector<16x16xf32>
    %91 = arith.divf %87, %90 : vector<16x16xf32>
    %92 = vector.extract_strided_slice %63 {offsets = [0, 8], sizes = [16, 8], strides = [1, 1]} : vector<16x32xf32> to vector<16x8xf32>
    %cst_54 = arith.constant dense<0.000000e+00> : vector<16x8xf32>
    %93 = tpu.matmul %91, %92, %cst_54 {dimension_numbers = #tpu.dot_dimension_numbers<[1], [0], [0], [1], [0, 0, 1, 1], [], []>} : vector<16x16xf32>, vector<16x8xf32>, vector<16x8xf32> -> vector<16x8xf32>
    %94 = vector.extract_strided_slice %49 {offsets = [0, 16], sizes = [16, 8], strides = [1, 1]} : vector<16x32xf32> to vector<16x8xf32>
    %95 = vector.extract_strided_slice %56 {offsets = [0, 16], sizes = [16, 8], strides = [1, 1]} : vector<16x32xf32> to vector<16x8xf32>
    %cst_55 = arith.constant dense<0.000000e+00> : vector<16x16xf32>
    %96 = tpu.matmul %94, %95, %cst_55 {dimension_numbers = #tpu.dot_dimension_numbers<[1], [1], [0], [0], [0, 0, 1, 0], [], []>} : vector<16x8xf32>, vector<16x8xf32>, vector<16x16xf32> -> vector<16x16xf32>
    %97 = arith.addf %96, %2 : vector<16x16xf32>
    %cst_56 = arith.constant dense<0xFF800000> : vector<16xf32>
    %98 = vector.multi_reduction <maximumf>, %97, %cst_56 [1] : vector<16x16xf32> to vector<16xf32>
    %99 = vector.shape_cast %98 : vector<16xf32> to vector<16x1xf32>
    %100 = vector.broadcast %99 : vector<16x1xf32> to vector<16x16xf32>
    %101 = arith.subf %97, %100 : vector<16x16xf32>
    %102 = math.exp %101 : vector<16x16xf32>
    %cst_57 = arith.constant dense<0.000000e+00> : vector<16xf32>
    %103 = vector.multi_reduction <add>, %102, %cst_57 [1] : vector<16x16xf32> to vector<16xf32>
    %104 = vector.shape_cast %103 : vector<16xf32> to vector<16x1xf32>
    %105 = vector.broadcast %104 : vector<16x1xf32> to vector<16x16xf32>
    %106 = arith.divf %102, %105 : vector<16x16xf32>
    %107 = vector.extract_strided_slice %63 {offsets = [0, 16], sizes = [16, 8], strides = [1, 1]} : vector<16x32xf32> to vector<16x8xf32>
    %cst_58 = arith.constant dense<0.000000e+00> : vector<16x8xf32>
    %108 = tpu.matmul %106, %107, %cst_58 {dimension_numbers = #tpu.dot_dimension_numbers<[1], [0], [0], [1], [0, 0, 1, 1], [], []>} : vector<16x16xf32>, vector<16x8xf32>, vector<16x8xf32> -> vector<16x8xf32>
    %109 = vector.extract_strided_slice %49 {offsets = [0, 24], sizes = [16, 8], strides = [1, 1]} : vector<16x32xf32> to vector<16x8xf32>
    %110 = vector.extract_strided_slice %56 {offsets = [0, 24], sizes = [16, 8], strides = [1, 1]} : vector<16x32xf32> to vector<16x8xf32>
    %cst_59 = arith.constant dense<0.000000e+00> : vector<16x16xf32>
    %111 = tpu.matmul %109, %110, %cst_59 {dimension_numbers = #tpu.dot_dimension_numbers<[1], [1], [0], [0], [0, 0, 1, 0], [], []>} : vector<16x8xf32>, vector<16x8xf32>, vector<16x16xf32> -> vector<16x16xf32>
    %112 = arith.addf %111, %2 : vector<16x16xf32>
    %cst_60 = arith.constant dense<0xFF800000> : vector<16xf32>
    %113 = vector.multi_reduction <maximumf>, %112, %cst_60 [1] : vector<16x16xf32> to vector<16xf32>
    %114 = vector.shape_cast %113 : vector<16xf32> to vector<16x1xf32>
    %115 = vector.broadcast %114 : vector<16x1xf32> to vector<16x16xf32>
    %116 = arith.subf %112, %115 : vector<16x16xf32>
    %117 = math.exp %116 : vector<16x16xf32>
    %cst_61 = arith.constant dense<0.000000e+00> : vector<16xf32>
    %118 = vector.multi_reduction <add>, %117, %cst_61 [1] : vector<16x16xf32> to vector<16xf32>
    %119 = vector.shape_cast %118 : vector<16xf32> to vector<16x1xf32>
    %120 = vector.broadcast %119 : vector<16x1xf32> to vector<16x16xf32>
    %121 = arith.divf %117, %120 : vector<16x16xf32>
    %122 = vector.extract_strided_slice %63 {offsets = [0, 24], sizes = [16, 8], strides = [1, 1]} : vector<16x32xf32> to vector<16x8xf32>
    %cst_62 = arith.constant dense<0.000000e+00> : vector<16x8xf32>
    %123 = tpu.matmul %121, %122, %cst_62 {dimension_numbers = #tpu.dot_dimension_numbers<[1], [0], [0], [1], [0, 0, 1, 1], [], []>} : vector<16x16xf32>, vector<16x8xf32>, vector<16x8xf32> -> vector<16x8xf32>
    %124 = tpu.concatenate %78, %93, %108, %123 in 1 : vector<16x8xf32>, vector<16x8xf32>, vector<16x8xf32>, vector<16x8xf32> -> vector<16x32xf32>
    %c0_63 = arith.constant 0 : index
    %c0_64 = arith.constant 0 : index
    %c0_65 = arith.constant 0 : index
    %125 = vector.load %arg11[%c0_63, %c0_64, %c0_65] : memref<2x32x32xf32, #tpu.memory_space<vmem>>, vector<1x32x32xf32>
    %126 = vector.shape_cast %125 : vector<1x32x32xf32> to vector<32x32xf32>
    %cst_66 = arith.constant dense<0.000000e+00> : vector<16x32xf32>
    %127 = tpu.matmul %124, %126, %cst_66 {dimension_numbers = #tpu.dot_dimension_numbers<[1], [0], [0], [1], [0, 0, 1, 1], [], []>} : vector<16x32xf32>, vector<32x32xf32>, vector<16x32xf32> -> vector<16x32xf32>
    %c0_67 = arith.constant 0 : index
    %c0_68 = arith.constant 0 : index
    %c0_69 = arith.constant 0 : index
    %128 = vector.load %arg12[%c0_67, %c0_68, %c0_69] : memref<2x1x32xf32, #tpu.memory_space<vmem>>, vector<1x1x32xf32>
    %129 = vector.shape_cast %128 : vector<1x1x32xf32> to vector<1x32xf32>
    %130 = vector.broadcast %129 : vector<1x32xf32> to vector<16x32xf32>
    %131 = arith.addf %127, %130 : vector<16x32xf32>
    %132 = arith.addf %0, %131 : vector<16x32xf32>
    %c0_70 = arith.constant 0 : index
    %c0_71 = arith.constant 0 : index
    %c0_72 = arith.constant 0 : index
    %133 = vector.load %arg15[%c0_70, %c0_71, %c0_72] : memref<2x1x32xf32, #tpu.memory_space<vmem>>, vector<1x1x32xf32>
    %134 = vector.shape_cast %133 : vector<1x1x32xf32> to vector<1x32xf32>
    %c0_73 = arith.constant 0 : index
    %c0_74 = arith.constant 0 : index
    %c0_75 = arith.constant 0 : index
    %135 = vector.load %arg16[%c0_73, %c0_74, %c0_75] : memref<2x1x32xf32, #tpu.memory_space<vmem>>, vector<1x1x32xf32>
    %136 = vector.shape_cast %135 : vector<1x1x32xf32> to vector<1x32xf32>
    %cst_76 = arith.constant dense<0.000000e+00> : vector<16xf32>
    %137 = vector.multi_reduction <add>, %132, %cst_76 [1] : vector<16x32xf32> to vector<16xf32>
    %138 = vector.shape_cast %137 : vector<16xf32> to vector<16x1xf32>
    %cst_77 = arith.constant 3.200000e+01 : f32
    %139 = vector.broadcast %cst_77 : f32 to vector<16x1xf32>
    %140 = arith.divf %138, %139 : vector<16x1xf32>
    %141 = vector.broadcast %140 : vector<16x1xf32> to vector<16x32xf32>
    %142 = arith.subf %132, %141 : vector<16x32xf32>
    %143 = arith.mulf %142, %142 : vector<16x32xf32>
    %cst_78 = arith.constant dense<0.000000e+00> : vector<16xf32>
    %144 = vector.multi_reduction <add>, %143, %cst_78 [1] : vector<16x32xf32> to vector<16xf32>
    %145 = vector.shape_cast %144 : vector<16xf32> to vector<16x1xf32>
    %cst_79 = arith.constant 3.200000e+01 : f32
    %146 = vector.broadcast %cst_79 : f32 to vector<16x1xf32>
    %147 = arith.divf %145, %146 : vector<16x1xf32>
    %148 = vector.broadcast %140 : vector<16x1xf32> to vector<16x32xf32>
    %149 = arith.subf %132, %148 : vector<16x32xf32>
    %cst_80 = arith.constant 9.99999974E-6 : f32
    %150 = vector.broadcast %cst_80 : f32 to vector<16x1xf32>
    %151 = arith.addf %147, %150 : vector<16x1xf32>
    %152 = math.rsqrt %151 : vector<16x1xf32>
    %153 = vector.broadcast %152 : vector<16x1xf32> to vector<16x32xf32>
    %154 = arith.mulf %149, %153 : vector<16x32xf32>
    %155 = vector.broadcast %134 : vector<1x32xf32> to vector<16x32xf32>
    %156 = arith.mulf %154, %155 : vector<16x32xf32>
    %157 = vector.broadcast %136 : vector<1x32xf32> to vector<16x32xf32>
    %158 = arith.addf %156, %157 : vector<16x32xf32>
    %159 = arith.addf %40, %158 : vector<16x32xf32>
    %c0_81 = arith.constant 0 : index
    %c0_82 = arith.constant 0 : index
    %c0_83 = arith.constant 0 : index
    %160 = vector.load %arg17[%c0_81, %c0_82, %c0_83] : memref<2x32x64xf32, #tpu.memory_space<vmem>>, vector<1x32x64xf32>
    %161 = vector.shape_cast %160 : vector<1x32x64xf32> to vector<32x64xf32>
    %cst_84 = arith.constant dense<0.000000e+00> : vector<16x64xf32>
    %162 = tpu.matmul %159, %161, %cst_84 {dimension_numbers = #tpu.dot_dimension_numbers<[1], [0], [0], [1], [0, 0, 1, 1], [], []>} : vector<16x32xf32>, vector<32x64xf32>, vector<16x64xf32> -> vector<16x64xf32>
    %c0_85 = arith.constant 0 : index
    %c0_86 = arith.constant 0 : index
    %c0_87 = arith.constant 0 : index
    %163 = vector.load %arg18[%c0_85, %c0_86, %c0_87] : memref<2x1x64xf32, #tpu.memory_space<vmem>>, vector<1x1x64xf32>
    %164 = vector.shape_cast %163 : vector<1x1x64xf32> to vector<1x64xf32>
    %165 = vector.broadcast %164 : vector<1x64xf32> to vector<16x64xf32>
    %166 = arith.addf %162, %165 : vector<16x64xf32>
    %cst_88 = arith.constant 0.000000e+00 : f32
    %167 = vector.broadcast %cst_88 : f32 to vector<16x64xf32>
    %168 = arith.maximumf %166, %167 : vector<16x64xf32>
    %c0_89 = arith.constant 0 : index
    %c0_90 = arith.constant 0 : index
    %c0_91 = arith.constant 0 : index
    %169 = vector.load %arg19[%c0_89, %c0_90, %c0_91] : memref<2x64x32xf32, #tpu.memory_space<vmem>>, vector<1x64x32xf32>
    %170 = vector.shape_cast %169 : vector<1x64x32xf32> to vector<64x32xf32>
    %cst_92 = arith.constant dense<0.000000e+00> : vector<16x32xf32>
    %171 = tpu.matmul %168, %170, %cst_92 {dimension_numbers = #tpu.dot_dimension_numbers<[1], [0], [0], [1], [0, 0, 1, 1], [], []>} : vector<16x64xf32>, vector<64x32xf32>, vector<16x32xf32> -> vector<16x32xf32>
    %c0_93 = arith.constant 0 : index
    %c0_94 = arith.constant 0 : index
    %c0_95 = arith.constant 0 : index
    %172 = vector.load %arg20[%c0_93, %c0_94, %c0_95] : memref<2x1x32xf32, #tpu.memory_space<vmem>>, vector<1x1x32xf32>
    %173 = vector.shape_cast %172 : vector<1x1x32xf32> to vector<1x32xf32>
    %174 = vector.broadcast %173 : vector<1x32xf32> to vector<16x32xf32>
    %175 = arith.addf %171, %174 : vector<16x32xf32>
    %176 = arith.addf %159, %175 : vector<16x32xf32>
    %c0_96 = arith.constant 0 : index
    %c0_97 = arith.constant 0 : index
    %c0_98 = arith.constant 0 : index
    %177 = vector.load %arg21[%c0_96, %c0_97, %c0_98] : memref<2x1x32xf32, #tpu.memory_space<vmem>>, vector<1x1x32xf32>
    %178 = vector.shape_cast %177 : vector<1x1x32xf32> to vector<1x32xf32>
    %c0_99 = arith.constant 0 : index
    %c0_100 = arith.constant 0 : index
    %c0_101 = arith.constant 0 : index
    %179 = vector.load %arg22[%c0_99, %c0_100, %c0_101] : memref<2x1x32xf32, #tpu.memory_space<vmem>>, vector<1x1x32xf32>
    %180 = vector.shape_cast %179 : vector<1x1x32xf32> to vector<1x32xf32>
    %cst_102 = arith.constant dense<0.000000e+00> : vector<16xf32>
    %181 = vector.multi_reduction <add>, %176, %cst_102 [1] : vector<16x32xf32> to vector<16xf32>
    %182 = vector.shape_cast %181 : vector<16xf32> to vector<16x1xf32>
    %cst_103 = arith.constant 3.200000e+01 : f32
    %183 = vector.broadcast %cst_103 : f32 to vector<16x1xf32>
    %184 = arith.divf %182, %183 : vector<16x1xf32>
    %185 = vector.broadcast %184 : vector<16x1xf32> to vector<16x32xf32>
    %186 = arith.subf %176, %185 : vector<16x32xf32>
    %187 = arith.mulf %186, %186 : vector<16x32xf32>
    %cst_104 = arith.constant dense<0.000000e+00> : vector<16xf32>
    %188 = vector.multi_reduction <add>, %187, %cst_104 [1] : vector<16x32xf32> to vector<16xf32>
    %189 = vector.shape_cast %188 : vector<16xf32> to vector<16x1xf32>
    %cst_105 = arith.constant 3.200000e+01 : f32
    %190 = vector.broadcast %cst_105 : f32 to vector<16x1xf32>
    %191 = arith.divf %189, %190 : vector<16x1xf32>
    %192 = vector.broadcast %184 : vector<16x1xf32> to vector<16x32xf32>
    %193 = arith.subf %176, %192 : vector<16x32xf32>
    %cst_106 = arith.constant 9.99999974E-6 : f32
    %194 = vector.broadcast %cst_106 : f32 to vector<16x1xf32>
    %195 = arith.addf %191, %194 : vector<16x1xf32>
    %196 = math.rsqrt %195 : vector<16x1xf32>
    %197 = vector.broadcast %196 : vector<16x1xf32> to vector<16x32xf32>
    %198 = arith.mulf %193, %197 : vector<16x32xf32>
    %199 = vector.broadcast %178 : vector<1x32xf32> to vector<16x32xf32>
    %200 = arith.mulf %198, %199 : vector<16x32xf32>
    %201 = vector.broadcast %180 : vector<1x32xf32> to vector<16x32xf32>
    %202 = arith.addf %200, %201 : vector<16x32xf32>
    %c0_107 = arith.constant 0 : index
    %c0_108 = arith.constant 0 : index
    %c0_109 = arith.constant 0 : index
    %203 = vector.load %arg23[%c0_107, %c0_108, %c0_109] : memref<2x32x4xf32, #tpu.memory_space<vmem>>, vector<1x32x4xf32>
    %204 = vector.shape_cast %203 : vector<1x32x4xf32> to vector<32x4xf32>
    %cst_110 = arith.constant dense<0.000000e+00> : vector<16x4xf32>
    %205 = tpu.matmul %202, %204, %cst_110 {dimension_numbers = #tpu.dot_dimension_numbers<[1], [0], [0], [1], [0, 0, 1, 1], [], []>} : vector<16x32xf32>, vector<32x4xf32>, vector<16x4xf32> -> vector<16x4xf32>
    %206 = arith.addf %3, %205 : vector<16x4xf32>
    %c0_111 = arith.constant 0 : index
    %c0_112 = arith.constant 0 : index
    %c0_113 = arith.constant 0 : index
    %207 = vector.load %arg24[%c0_111, %c0_112, %c0_113] : memref<2x1x4xf32, #tpu.memory_space<vmem>>, vector<1x1x4xf32>
    %208 = vector.shape_cast %207 : vector<1x1x4xf32> to vector<1x4xf32>
    %209 = vector.broadcast %208 : vector<1x4xf32> to vector<16x4xf32>
    %210 = arith.addf %206, %209 : vector<16x4xf32>
    %c1 = arith.constant 1 : index
    %c0_114 = arith.constant 0 : index
    %c0_115 = arith.constant 0 : index
    %211 = vector.load %arg3[%c1, %c0_114, %c0_115] : memref<2x32x32xf32, #tpu.memory_space<vmem>>, vector<1x32x32xf32>
    %212 = vector.shape_cast %211 : vector<1x32x32xf32> to vector<32x32xf32>
    %cst_116 = arith.constant dense<0.000000e+00> : vector<16x32xf32>
    %213 = tpu.matmul %202, %212, %cst_116 {dimension_numbers = #tpu.dot_dimension_numbers<[1], [0], [0], [1], [0, 0, 1, 1], [], []>} : vector<16x32xf32>, vector<32x32xf32>, vector<16x32xf32> -> vector<16x32xf32>
    %cst_117 = arith.constant dense<0.000000e+00> : vector<16x32xf32>
    %214 = tpu.matmul %1, %213, %cst_117 {dimension_numbers = #tpu.dot_dimension_numbers<[1], [0], [0], [1], [0, 0, 1, 1], [], []>} : vector<16x16xf32>, vector<16x32xf32>, vector<16x32xf32> -> vector<16x32xf32>
    %c1_118 = arith.constant 1 : index
    %c0_119 = arith.constant 0 : index
    %c0_120 = arith.constant 0 : index
    %215 = vector.load %arg4[%c1_118, %c0_119, %c0_120] : memref<2x1x32xf32, #tpu.memory_space<vmem>>, vector<1x1x32xf32>
    %216 = vector.shape_cast %215 : vector<1x1x32xf32> to vector<1x32xf32>
    %217 = vector.broadcast %216 : vector<1x32xf32> to vector<16x32xf32>
    %218 = arith.addf %214, %217 : vector<16x32xf32>
    %cst_121 = arith.constant 0.000000e+00 : f32
    %219 = vector.broadcast %cst_121 : f32 to vector<16x32xf32>
    %220 = arith.maximumf %218, %219 : vector<16x32xf32>
    %221 = arith.addf %202, %220 : vector<16x32xf32>
    %c1_122 = arith.constant 1 : index
    %c0_123 = arith.constant 0 : index
    %c0_124 = arith.constant 0 : index
    %222 = vector.load %arg13[%c1_122, %c0_123, %c0_124] : memref<2x1x32xf32, #tpu.memory_space<vmem>>, vector<1x1x32xf32>
    %223 = vector.shape_cast %222 : vector<1x1x32xf32> to vector<1x32xf32>
    %c1_125 = arith.constant 1 : index
    %c0_126 = arith.constant 0 : index
    %c0_127 = arith.constant 0 : index
    %224 = vector.load %arg14[%c1_125, %c0_126, %c0_127] : memref<2x1x32xf32, #tpu.memory_space<vmem>>, vector<1x1x32xf32>
    %225 = vector.shape_cast %224 : vector<1x1x32xf32> to vector<1x32xf32>
    %cst_128 = arith.constant dense<0.000000e+00> : vector<16xf32>
    %226 = vector.multi_reduction <add>, %221, %cst_128 [1] : vector<16x32xf32> to vector<16xf32>
    %227 = vector.shape_cast %226 : vector<16xf32> to vector<16x1xf32>
    %cst_129 = arith.constant 3.200000e+01 : f32
    %228 = vector.broadcast %cst_129 : f32 to vector<16x1xf32>
    %229 = arith.divf %227, %228 : vector<16x1xf32>
    %230 = vector.broadcast %229 : vector<16x1xf32> to vector<16x32xf32>
    %231 = arith.subf %221, %230 : vector<16x32xf32>
    %232 = arith.mulf %231, %231 : vector<16x32xf32>
    %cst_130 = arith.constant dense<0.000000e+00> : vector<16xf32>
    %233 = vector.multi_reduction <add>, %232, %cst_130 [1] : vector<16x32xf32> to vector<16xf32>
    %234 = vector.shape_cast %233 : vector<16xf32> to vector<16x1xf32>
    %cst_131 = arith.constant 3.200000e+01 : f32
    %235 = vector.broadcast %cst_131 : f32 to vector<16x1xf32>
    %236 = arith.divf %234, %235 : vector<16x1xf32>
    %237 = vector.broadcast %229 : vector<16x1xf32> to vector<16x32xf32>
    %238 = arith.subf %221, %237 : vector<16x32xf32>
    %cst_132 = arith.constant 9.99999974E-6 : f32
    %239 = vector.broadcast %cst_132 : f32 to vector<16x1xf32>
    %240 = arith.addf %236, %239 : vector<16x1xf32>
    %241 = math.rsqrt %240 : vector<16x1xf32>
    %242 = vector.broadcast %241 : vector<16x1xf32> to vector<16x32xf32>
    %243 = arith.mulf %238, %242 : vector<16x32xf32>
    %244 = vector.broadcast %223 : vector<1x32xf32> to vector<16x32xf32>
    %245 = arith.mulf %243, %244 : vector<16x32xf32>
    %246 = vector.broadcast %225 : vector<1x32xf32> to vector<16x32xf32>
    %247 = arith.addf %245, %246 : vector<16x32xf32>
    %c1_133 = arith.constant 1 : index
    %c0_134 = arith.constant 0 : index
    %c0_135 = arith.constant 0 : index
    %248 = vector.load %arg5[%c1_133, %c0_134, %c0_135] : memref<2x32x32xf32, #tpu.memory_space<vmem>>, vector<1x32x32xf32>
    %249 = vector.shape_cast %248 : vector<1x32x32xf32> to vector<32x32xf32>
    %cst_136 = arith.constant dense<0.000000e+00> : vector<16x32xf32>
    %250 = tpu.matmul %202, %249, %cst_136 {dimension_numbers = #tpu.dot_dimension_numbers<[1], [0], [0], [1], [0, 0, 1, 1], [], []>} : vector<16x32xf32>, vector<32x32xf32>, vector<16x32xf32> -> vector<16x32xf32>
    %c1_137 = arith.constant 1 : index
    %c0_138 = arith.constant 0 : index
    %c0_139 = arith.constant 0 : index
    %251 = vector.load %arg6[%c1_137, %c0_138, %c0_139] : memref<2x1x32xf32, #tpu.memory_space<vmem>>, vector<1x1x32xf32>
    %252 = vector.shape_cast %251 : vector<1x1x32xf32> to vector<1x32xf32>
    %253 = vector.broadcast %252 : vector<1x32xf32> to vector<16x32xf32>
    %254 = arith.addf %250, %253 : vector<16x32xf32>
    %cst_140 = arith.constant 0.353553385 : f32
    %255 = vector.broadcast %cst_140 : f32 to vector<16x32xf32>
    %256 = arith.mulf %254, %255 : vector<16x32xf32>
    %c1_141 = arith.constant 1 : index
    %c0_142 = arith.constant 0 : index
    %c0_143 = arith.constant 0 : index
    %257 = vector.load %arg7[%c1_141, %c0_142, %c0_143] : memref<2x32x32xf32, #tpu.memory_space<vmem>>, vector<1x32x32xf32>
    %258 = vector.shape_cast %257 : vector<1x32x32xf32> to vector<32x32xf32>
    %cst_144 = arith.constant dense<0.000000e+00> : vector<16x32xf32>
    %259 = tpu.matmul %202, %258, %cst_144 {dimension_numbers = #tpu.dot_dimension_numbers<[1], [0], [0], [1], [0, 0, 1, 1], [], []>} : vector<16x32xf32>, vector<32x32xf32>, vector<16x32xf32> -> vector<16x32xf32>
    %c1_145 = arith.constant 1 : index
    %c0_146 = arith.constant 0 : index
    %c0_147 = arith.constant 0 : index
    %260 = vector.load %arg8[%c1_145, %c0_146, %c0_147] : memref<2x1x32xf32, #tpu.memory_space<vmem>>, vector<1x1x32xf32>
    %261 = vector.shape_cast %260 : vector<1x1x32xf32> to vector<1x32xf32>
    %262 = vector.broadcast %261 : vector<1x32xf32> to vector<16x32xf32>
    %263 = arith.addf %259, %262 : vector<16x32xf32>
    %c1_148 = arith.constant 1 : index
    %c0_149 = arith.constant 0 : index
    %c0_150 = arith.constant 0 : index
    %264 = vector.load %arg9[%c1_148, %c0_149, %c0_150] : memref<2x32x32xf32, #tpu.memory_space<vmem>>, vector<1x32x32xf32>
    %265 = vector.shape_cast %264 : vector<1x32x32xf32> to vector<32x32xf32>
    %cst_151 = arith.constant dense<0.000000e+00> : vector<16x32xf32>
    %266 = tpu.matmul %202, %265, %cst_151 {dimension_numbers = #tpu.dot_dimension_numbers<[1], [0], [0], [1], [0, 0, 1, 1], [], []>} : vector<16x32xf32>, vector<32x32xf32>, vector<16x32xf32> -> vector<16x32xf32>
    %c1_152 = arith.constant 1 : index
    %c0_153 = arith.constant 0 : index
    %c0_154 = arith.constant 0 : index
    %267 = vector.load %arg10[%c1_152, %c0_153, %c0_154] : memref<2x1x32xf32, #tpu.memory_space<vmem>>, vector<1x1x32xf32>
    %268 = vector.shape_cast %267 : vector<1x1x32xf32> to vector<1x32xf32>
    %269 = vector.broadcast %268 : vector<1x32xf32> to vector<16x32xf32>
    %270 = arith.addf %266, %269 : vector<16x32xf32>
    %271 = vector.extract_strided_slice %256 {offsets = [0, 0], sizes = [16, 8], strides = [1, 1]} : vector<16x32xf32> to vector<16x8xf32>
    %272 = vector.extract_strided_slice %263 {offsets = [0, 0], sizes = [16, 8], strides = [1, 1]} : vector<16x32xf32> to vector<16x8xf32>
    %cst_155 = arith.constant dense<0.000000e+00> : vector<16x16xf32>
    %273 = tpu.matmul %271, %272, %cst_155 {dimension_numbers = #tpu.dot_dimension_numbers<[1], [1], [0], [0], [0, 0, 1, 0], [], []>} : vector<16x8xf32>, vector<16x8xf32>, vector<16x16xf32> -> vector<16x16xf32>
    %274 = arith.addf %273, %2 : vector<16x16xf32>
    %cst_156 = arith.constant dense<0xFF800000> : vector<16xf32>
    %275 = vector.multi_reduction <maximumf>, %274, %cst_156 [1] : vector<16x16xf32> to vector<16xf32>
    %276 = vector.shape_cast %275 : vector<16xf32> to vector<16x1xf32>
    %277 = vector.broadcast %276 : vector<16x1xf32> to vector<16x16xf32>
    %278 = arith.subf %274, %277 : vector<16x16xf32>
    %279 = math.exp %278 : vector<16x16xf32>
    %cst_157 = arith.constant dense<0.000000e+00> : vector<16xf32>
    %280 = vector.multi_reduction <add>, %279, %cst_157 [1] : vector<16x16xf32> to vector<16xf32>
    %281 = vector.shape_cast %280 : vector<16xf32> to vector<16x1xf32>
    %282 = vector.broadcast %281 : vector<16x1xf32> to vector<16x16xf32>
    %283 = arith.divf %279, %282 : vector<16x16xf32>
    %284 = vector.extract_strided_slice %270 {offsets = [0, 0], sizes = [16, 8], strides = [1, 1]} : vector<16x32xf32> to vector<16x8xf32>
    %cst_158 = arith.constant dense<0.000000e+00> : vector<16x8xf32>
    %285 = tpu.matmul %283, %284, %cst_158 {dimension_numbers = #tpu.dot_dimension_numbers<[1], [0], [0], [1], [0, 0, 1, 1], [], []>} : vector<16x16xf32>, vector<16x8xf32>, vector<16x8xf32> -> vector<16x8xf32>
    %286 = vector.extract_strided_slice %256 {offsets = [0, 8], sizes = [16, 8], strides = [1, 1]} : vector<16x32xf32> to vector<16x8xf32>
    %287 = vector.extract_strided_slice %263 {offsets = [0, 8], sizes = [16, 8], strides = [1, 1]} : vector<16x32xf32> to vector<16x8xf32>
    %cst_159 = arith.constant dense<0.000000e+00> : vector<16x16xf32>
    %288 = tpu.matmul %286, %287, %cst_159 {dimension_numbers = #tpu.dot_dimension_numbers<[1], [1], [0], [0], [0, 0, 1, 0], [], []>} : vector<16x8xf32>, vector<16x8xf32>, vector<16x16xf32> -> vector<16x16xf32>
    %289 = arith.addf %288, %2 : vector<16x16xf32>
    %cst_160 = arith.constant dense<0xFF800000> : vector<16xf32>
    %290 = vector.multi_reduction <maximumf>, %289, %cst_160 [1] : vector<16x16xf32> to vector<16xf32>
    %291 = vector.shape_cast %290 : vector<16xf32> to vector<16x1xf32>
    %292 = vector.broadcast %291 : vector<16x1xf32> to vector<16x16xf32>
    %293 = arith.subf %289, %292 : vector<16x16xf32>
    %294 = math.exp %293 : vector<16x16xf32>
    %cst_161 = arith.constant dense<0.000000e+00> : vector<16xf32>
    %295 = vector.multi_reduction <add>, %294, %cst_161 [1] : vector<16x16xf32> to vector<16xf32>
    %296 = vector.shape_cast %295 : vector<16xf32> to vector<16x1xf32>
    %297 = vector.broadcast %296 : vector<16x1xf32> to vector<16x16xf32>
    %298 = arith.divf %294, %297 : vector<16x16xf32>
    %299 = vector.extract_strided_slice %270 {offsets = [0, 8], sizes = [16, 8], strides = [1, 1]} : vector<16x32xf32> to vector<16x8xf32>
    %cst_162 = arith.constant dense<0.000000e+00> : vector<16x8xf32>
    %300 = tpu.matmul %298, %299, %cst_162 {dimension_numbers = #tpu.dot_dimension_numbers<[1], [0], [0], [1], [0, 0, 1, 1], [], []>} : vector<16x16xf32>, vector<16x8xf32>, vector<16x8xf32> -> vector<16x8xf32>
    %301 = vector.extract_strided_slice %256 {offsets = [0, 16], sizes = [16, 8], strides = [1, 1]} : vector<16x32xf32> to vector<16x8xf32>
    %302 = vector.extract_strided_slice %263 {offsets = [0, 16], sizes = [16, 8], strides = [1, 1]} : vector<16x32xf32> to vector<16x8xf32>
    %cst_163 = arith.constant dense<0.000000e+00> : vector<16x16xf32>
    %303 = tpu.matmul %301, %302, %cst_163 {dimension_numbers = #tpu.dot_dimension_numbers<[1], [1], [0], [0], [0, 0, 1, 0], [], []>} : vector<16x8xf32>, vector<16x8xf32>, vector<16x16xf32> -> vector<16x16xf32>
    %304 = arith.addf %303, %2 : vector<16x16xf32>
    %cst_164 = arith.constant dense<0xFF800000> : vector<16xf32>
    %305 = vector.multi_reduction <maximumf>, %304, %cst_164 [1] : vector<16x16xf32> to vector<16xf32>
    %306 = vector.shape_cast %305 : vector<16xf32> to vector<16x1xf32>
    %307 = vector.broadcast %306 : vector<16x1xf32> to vector<16x16xf32>
    %308 = arith.subf %304, %307 : vector<16x16xf32>
    %309 = math.exp %308 : vector<16x16xf32>
    %cst_165 = arith.constant dense<0.000000e+00> : vector<16xf32>
    %310 = vector.multi_reduction <add>, %309, %cst_165 [1] : vector<16x16xf32> to vector<16xf32>
    %311 = vector.shape_cast %310 : vector<16xf32> to vector<16x1xf32>
    %312 = vector.broadcast %311 : vector<16x1xf32> to vector<16x16xf32>
    %313 = arith.divf %309, %312 : vector<16x16xf32>
    %314 = vector.extract_strided_slice %270 {offsets = [0, 16], sizes = [16, 8], strides = [1, 1]} : vector<16x32xf32> to vector<16x8xf32>
    %cst_166 = arith.constant dense<0.000000e+00> : vector<16x8xf32>
    %315 = tpu.matmul %313, %314, %cst_166 {dimension_numbers = #tpu.dot_dimension_numbers<[1], [0], [0], [1], [0, 0, 1, 1], [], []>} : vector<16x16xf32>, vector<16x8xf32>, vector<16x8xf32> -> vector<16x8xf32>
    %316 = vector.extract_strided_slice %256 {offsets = [0, 24], sizes = [16, 8], strides = [1, 1]} : vector<16x32xf32> to vector<16x8xf32>
    %317 = vector.extract_strided_slice %263 {offsets = [0, 24], sizes = [16, 8], strides = [1, 1]} : vector<16x32xf32> to vector<16x8xf32>
    %cst_167 = arith.constant dense<0.000000e+00> : vector<16x16xf32>
    %318 = tpu.matmul %316, %317, %cst_167 {dimension_numbers = #tpu.dot_dimension_numbers<[1], [1], [0], [0], [0, 0, 1, 0], [], []>} : vector<16x8xf32>, vector<16x8xf32>, vector<16x16xf32> -> vector<16x16xf32>
    %319 = arith.addf %318, %2 : vector<16x16xf32>
    %cst_168 = arith.constant dense<0xFF800000> : vector<16xf32>
    %320 = vector.multi_reduction <maximumf>, %319, %cst_168 [1] : vector<16x16xf32> to vector<16xf32>
    %321 = vector.shape_cast %320 : vector<16xf32> to vector<16x1xf32>
    %322 = vector.broadcast %321 : vector<16x1xf32> to vector<16x16xf32>
    %323 = arith.subf %319, %322 : vector<16x16xf32>
    %324 = math.exp %323 : vector<16x16xf32>
    %cst_169 = arith.constant dense<0.000000e+00> : vector<16xf32>
    %325 = vector.multi_reduction <add>, %324, %cst_169 [1] : vector<16x16xf32> to vector<16xf32>
    %326 = vector.shape_cast %325 : vector<16xf32> to vector<16x1xf32>
    %327 = vector.broadcast %326 : vector<16x1xf32> to vector<16x16xf32>
    %328 = arith.divf %324, %327 : vector<16x16xf32>
    %329 = vector.extract_strided_slice %270 {offsets = [0, 24], sizes = [16, 8], strides = [1, 1]} : vector<16x32xf32> to vector<16x8xf32>
    %cst_170 = arith.constant dense<0.000000e+00> : vector<16x8xf32>
    %330 = tpu.matmul %328, %329, %cst_170 {dimension_numbers = #tpu.dot_dimension_numbers<[1], [0], [0], [1], [0, 0, 1, 1], [], []>} : vector<16x16xf32>, vector<16x8xf32>, vector<16x8xf32> -> vector<16x8xf32>
    %331 = tpu.concatenate %285, %300, %315, %330 in 1 : vector<16x8xf32>, vector<16x8xf32>, vector<16x8xf32>, vector<16x8xf32> -> vector<16x32xf32>
    %c1_171 = arith.constant 1 : index
    %c0_172 = arith.constant 0 : index
    %c0_173 = arith.constant 0 : index
    %332 = vector.load %arg11[%c1_171, %c0_172, %c0_173] : memref<2x32x32xf32, #tpu.memory_space<vmem>>, vector<1x32x32xf32>
    %333 = vector.shape_cast %332 : vector<1x32x32xf32> to vector<32x32xf32>
    %cst_174 = arith.constant dense<0.000000e+00> : vector<16x32xf32>
    %334 = tpu.matmul %331, %333, %cst_174 {dimension_numbers = #tpu.dot_dimension_numbers<[1], [0], [0], [1], [0, 0, 1, 1], [], []>} : vector<16x32xf32>, vector<32x32xf32>, vector<16x32xf32> -> vector<16x32xf32>
    %c1_175 = arith.constant 1 : index
    %c0_176 = arith.constant 0 : index
    %c0_177 = arith.constant 0 : index
    %335 = vector.load %arg12[%c1_175, %c0_176, %c0_177] : memref<2x1x32xf32, #tpu.memory_space<vmem>>, vector<1x1x32xf32>
    %336 = vector.shape_cast %335 : vector<1x1x32xf32> to vector<1x32xf32>
    %337 = vector.broadcast %336 : vector<1x32xf32> to vector<16x32xf32>
    %338 = arith.addf %334, %337 : vector<16x32xf32>
    %339 = arith.addf %202, %338 : vector<16x32xf32>
    %c1_178 = arith.constant 1 : index
    %c0_179 = arith.constant 0 : index
    %c0_180 = arith.constant 0 : index
    %340 = vector.load %arg15[%c1_178, %c0_179, %c0_180] : memref<2x1x32xf32, #tpu.memory_space<vmem>>, vector<1x1x32xf32>
    %341 = vector.shape_cast %340 : vector<1x1x32xf32> to vector<1x32xf32>
    %c1_181 = arith.constant 1 : index
    %c0_182 = arith.constant 0 : index
    %c0_183 = arith.constant 0 : index
    %342 = vector.load %arg16[%c1_181, %c0_182, %c0_183] : memref<2x1x32xf32, #tpu.memory_space<vmem>>, vector<1x1x32xf32>
    %343 = vector.shape_cast %342 : vector<1x1x32xf32> to vector<1x32xf32>
    %cst_184 = arith.constant dense<0.000000e+00> : vector<16xf32>
    %344 = vector.multi_reduction <add>, %339, %cst_184 [1] : vector<16x32xf32> to vector<16xf32>
    %345 = vector.shape_cast %344 : vector<16xf32> to vector<16x1xf32>
    %cst_185 = arith.constant 3.200000e+01 : f32
    %346 = vector.broadcast %cst_185 : f32 to vector<16x1xf32>
    %347 = arith.divf %345, %346 : vector<16x1xf32>
    %348 = vector.broadcast %347 : vector<16x1xf32> to vector<16x32xf32>
    %349 = arith.subf %339, %348 : vector<16x32xf32>
    %350 = arith.mulf %349, %349 : vector<16x32xf32>
    %cst_186 = arith.constant dense<0.000000e+00> : vector<16xf32>
    %351 = vector.multi_reduction <add>, %350, %cst_186 [1] : vector<16x32xf32> to vector<16xf32>
    %352 = vector.shape_cast %351 : vector<16xf32> to vector<16x1xf32>
    %cst_187 = arith.constant 3.200000e+01 : f32
    %353 = vector.broadcast %cst_187 : f32 to vector<16x1xf32>
    %354 = arith.divf %352, %353 : vector<16x1xf32>
    %355 = vector.broadcast %347 : vector<16x1xf32> to vector<16x32xf32>
    %356 = arith.subf %339, %355 : vector<16x32xf32>
    %cst_188 = arith.constant 9.99999974E-6 : f32
    %357 = vector.broadcast %cst_188 : f32 to vector<16x1xf32>
    %358 = arith.addf %354, %357 : vector<16x1xf32>
    %359 = math.rsqrt %358 : vector<16x1xf32>
    %360 = vector.broadcast %359 : vector<16x1xf32> to vector<16x32xf32>
    %361 = arith.mulf %356, %360 : vector<16x32xf32>
    %362 = vector.broadcast %341 : vector<1x32xf32> to vector<16x32xf32>
    %363 = arith.mulf %361, %362 : vector<16x32xf32>
    %364 = vector.broadcast %343 : vector<1x32xf32> to vector<16x32xf32>
    %365 = arith.addf %363, %364 : vector<16x32xf32>
    %366 = arith.addf %247, %365 : vector<16x32xf32>
    %c1_189 = arith.constant 1 : index
    %c0_190 = arith.constant 0 : index
    %c0_191 = arith.constant 0 : index
    %367 = vector.load %arg17[%c1_189, %c0_190, %c0_191] : memref<2x32x64xf32, #tpu.memory_space<vmem>>, vector<1x32x64xf32>
    %368 = vector.shape_cast %367 : vector<1x32x64xf32> to vector<32x64xf32>
    %cst_192 = arith.constant dense<0.000000e+00> : vector<16x64xf32>
    %369 = tpu.matmul %366, %368, %cst_192 {dimension_numbers = #tpu.dot_dimension_numbers<[1], [0], [0], [1], [0, 0, 1, 1], [], []>} : vector<16x32xf32>, vector<32x64xf32>, vector<16x64xf32> -> vector<16x64xf32>
    %c1_193 = arith.constant 1 : index
    %c0_194 = arith.constant 0 : index
    %c0_195 = arith.constant 0 : index
    %370 = vector.load %arg18[%c1_193, %c0_194, %c0_195] : memref<2x1x64xf32, #tpu.memory_space<vmem>>, vector<1x1x64xf32>
    %371 = vector.shape_cast %370 : vector<1x1x64xf32> to vector<1x64xf32>
    %372 = vector.broadcast %371 : vector<1x64xf32> to vector<16x64xf32>
    %373 = arith.addf %369, %372 : vector<16x64xf32>
    %cst_196 = arith.constant 0.000000e+00 : f32
    %374 = vector.broadcast %cst_196 : f32 to vector<16x64xf32>
    %375 = arith.maximumf %373, %374 : vector<16x64xf32>
    %c1_197 = arith.constant 1 : index
    %c0_198 = arith.constant 0 : index
    %c0_199 = arith.constant 0 : index
    %376 = vector.load %arg19[%c1_197, %c0_198, %c0_199] : memref<2x64x32xf32, #tpu.memory_space<vmem>>, vector<1x64x32xf32>
    %377 = vector.shape_cast %376 : vector<1x64x32xf32> to vector<64x32xf32>
    %cst_200 = arith.constant dense<0.000000e+00> : vector<16x32xf32>
    %378 = tpu.matmul %375, %377, %cst_200 {dimension_numbers = #tpu.dot_dimension_numbers<[1], [0], [0], [1], [0, 0, 1, 1], [], []>} : vector<16x64xf32>, vector<64x32xf32>, vector<16x32xf32> -> vector<16x32xf32>
    %c1_201 = arith.constant 1 : index
    %c0_202 = arith.constant 0 : index
    %c0_203 = arith.constant 0 : index
    %379 = vector.load %arg20[%c1_201, %c0_202, %c0_203] : memref<2x1x32xf32, #tpu.memory_space<vmem>>, vector<1x1x32xf32>
    %380 = vector.shape_cast %379 : vector<1x1x32xf32> to vector<1x32xf32>
    %381 = vector.broadcast %380 : vector<1x32xf32> to vector<16x32xf32>
    %382 = arith.addf %378, %381 : vector<16x32xf32>
    %383 = arith.addf %366, %382 : vector<16x32xf32>
    %c1_204 = arith.constant 1 : index
    %c0_205 = arith.constant 0 : index
    %c0_206 = arith.constant 0 : index
    %384 = vector.load %arg21[%c1_204, %c0_205, %c0_206] : memref<2x1x32xf32, #tpu.memory_space<vmem>>, vector<1x1x32xf32>
    %385 = vector.shape_cast %384 : vector<1x1x32xf32> to vector<1x32xf32>
    %c1_207 = arith.constant 1 : index
    %c0_208 = arith.constant 0 : index
    %c0_209 = arith.constant 0 : index
    %386 = vector.load %arg22[%c1_207, %c0_208, %c0_209] : memref<2x1x32xf32, #tpu.memory_space<vmem>>, vector<1x1x32xf32>
    %387 = vector.shape_cast %386 : vector<1x1x32xf32> to vector<1x32xf32>
    %cst_210 = arith.constant dense<0.000000e+00> : vector<16xf32>
    %388 = vector.multi_reduction <add>, %383, %cst_210 [1] : vector<16x32xf32> to vector<16xf32>
    %389 = vector.shape_cast %388 : vector<16xf32> to vector<16x1xf32>
    %cst_211 = arith.constant 3.200000e+01 : f32
    %390 = vector.broadcast %cst_211 : f32 to vector<16x1xf32>
    %391 = arith.divf %389, %390 : vector<16x1xf32>
    %392 = vector.broadcast %391 : vector<16x1xf32> to vector<16x32xf32>
    %393 = arith.subf %383, %392 : vector<16x32xf32>
    %394 = arith.mulf %393, %393 : vector<16x32xf32>
    %cst_212 = arith.constant dense<0.000000e+00> : vector<16xf32>
    %395 = vector.multi_reduction <add>, %394, %cst_212 [1] : vector<16x32xf32> to vector<16xf32>
    %396 = vector.shape_cast %395 : vector<16xf32> to vector<16x1xf32>
    %cst_213 = arith.constant 3.200000e+01 : f32
    %397 = vector.broadcast %cst_213 : f32 to vector<16x1xf32>
    %398 = arith.divf %396, %397 : vector<16x1xf32>
    %399 = vector.broadcast %391 : vector<16x1xf32> to vector<16x32xf32>
    %400 = arith.subf %383, %399 : vector<16x32xf32>
    %cst_214 = arith.constant 9.99999974E-6 : f32
    %401 = vector.broadcast %cst_214 : f32 to vector<16x1xf32>
    %402 = arith.addf %398, %401 : vector<16x1xf32>
    %403 = math.rsqrt %402 : vector<16x1xf32>
    %404 = vector.broadcast %403 : vector<16x1xf32> to vector<16x32xf32>
    %405 = arith.mulf %400, %404 : vector<16x32xf32>
    %406 = vector.broadcast %385 : vector<1x32xf32> to vector<16x32xf32>
    %407 = arith.mulf %405, %406 : vector<16x32xf32>
    %408 = vector.broadcast %387 : vector<1x32xf32> to vector<16x32xf32>
    %409 = arith.addf %407, %408 : vector<16x32xf32>
    %c1_215 = arith.constant 1 : index
    %c0_216 = arith.constant 0 : index
    %c0_217 = arith.constant 0 : index
    %410 = vector.load %arg23[%c1_215, %c0_216, %c0_217] : memref<2x32x4xf32, #tpu.memory_space<vmem>>, vector<1x32x4xf32>
    %411 = vector.shape_cast %410 : vector<1x32x4xf32> to vector<32x4xf32>
    %cst_218 = arith.constant dense<0.000000e+00> : vector<16x4xf32>
    %412 = tpu.matmul %409, %411, %cst_218 {dimension_numbers = #tpu.dot_dimension_numbers<[1], [0], [0], [1], [0, 0, 1, 1], [], []>} : vector<16x32xf32>, vector<32x4xf32>, vector<16x4xf32> -> vector<16x4xf32>
    %413 = arith.addf %210, %412 : vector<16x4xf32>
    %c1_219 = arith.constant 1 : index
    %c0_220 = arith.constant 0 : index
    %c0_221 = arith.constant 0 : index
    %414 = vector.load %arg24[%c1_219, %c0_220, %c0_221] : memref<2x1x4xf32, #tpu.memory_space<vmem>>, vector<1x1x4xf32>
    %415 = vector.shape_cast %414 : vector<1x1x4xf32> to vector<1x4xf32>
    %416 = vector.broadcast %415 : vector<1x4xf32> to vector<16x4xf32>
    %417 = arith.addf %413, %416 : vector<16x4xf32>
    %418 = tpu.concatenate %417, %409 in 1 : vector<16x4xf32>, vector<16x32xf32> -> vector<16x36xf32>
    %c0_222 = arith.constant 0 : index
    %c0_223 = arith.constant 0 : index
    %419 = vector.load %arg25[%c0_222, %c0_223] : memref<16x36xf32, #tpu.memory_space<vmem>>, vector<16x36xf32>
    tpu.vector_store %arg25[%c0_222, %c0_223], %418 {strides = array<i32>} : memref<16x36xf32, #tpu.memory_space<vmem>>, vector<16x36xf32>,
    return
  }
}

</mosaic_0001>

<bundles_post_ra>
// kernel: gps_model_with_voting.1
= control target key start
LH: loop header
LB: loop body
LE: loop exit
PB: predicated region body
PF: predicated region fallthrough
CT: control target
= control target key end

     0   :  { %s4149_s0 = inlined_call_operand.vmem [shape: f32[16,32], index: 0, kind: input, shape index: {}]   ;;  %s4150_s1 = inlined_call_operand.hbm [shape: f32[16,16], index: 1, kind: input, shape index: {}]   ;;  %s4151_s2 = inlined_call_operand.hbm [shape: f32[16,16], index: 2, kind: input, shape index: {}]   ;;  %s4152_s3 = inlined_call_operand.vmem [shape: f32[2,32,32], index: 3, kind: input, shape index: {}]   ;;  %s4153_s4 = inlined_call_operand.vmem [shape: f32[2,1,32], index: 4, kind: input, shape index: {}]   ;;  %s4154_s5 = inlined_call_operand.vmem [shape: f32[2,32,32], index: 5, kind: input, shape index: {}]   ;;  %s4155_s6 = inlined_call_operand.hbm [shape: f32[2,1,32], index: 6, kind: input, shape index: {}]   ;;  %s4156_s7 = inlined_call_operand.vmem [shape: f32[2,32,32], index: 7, kind: input, shape index: {}]   ;;  %s4157_s8 = inlined_call_operand.hbm [shape: f32[2,1,32], index: 8, kind: input, shape index: {}]   ;;  %s4158_s9 = inlined_call_operand.hbm [shape: f32[2,32,32], index: 9, kind: input, shape index: {}]   ;;  %s4159_s10 = inlined_call_operand.hbm [shape: f32[2,1,32], index: 10, kind: input, shape index: {}]   ;;  %s4160_s11 = inlined_call_operand.hbm [shape: f32[2,32,32], index: 11, kind: input, shape index: {}]   ;;  %s4161_s12 = inlined_call_operand.hbm [shape: f32[2,1,32], index: 12, kind: input, shape index: {}]   ;;  %s4162_s13 = inlined_call_operand.hbm [shape: f32[2,1,32], index: 13, kind: input, shape index: {}]   ;;  %s4163_s14 = inlined_call_operand.hbm [shape: f32[2,1,32], index: 14, kind: input, shape index: {}]   ;;  %s4164_s15 = inlined_call_operand.hbm [shape: f32[2,1,32], index: 15, kind: input, shape index: {}]   ;;  %s4165_s16 = inlined_call_operand.hbm [shape: f32[2,1,32], index: 16, kind: input, shape index: {}]   ;;  %s4166_s17 = inlined_call_operand.hbm [shape: f32[2,32,64], index: 17, kind: input, shape index: {}]   ;;  %s4167_s18 = inlined_call_operand.hbm [shape: f32[2,1,64], index: 18, kind: input, shape index: {}]   ;;  %s4168_s19 = inlined_call_operand.vmem [shape: f32[2,64,32], index: 19, kind: input, shape index: {}]   ;;  %s4169_s20 = inlined_call_operand.hbm [shape: f32[2,1,32], index: 20, kind: input, shape index: {}]   ;;  %s4170_s21 = inlined_call_operand.hbm [shape: f32[2,1,32], index: 21, kind: input, shape index: {}]   ;;  %s4171_s22 = inlined_call_operand.hbm [shape: f32[2,1,32], index: 22, kind: input, shape index: {}]   ;;  %s4172_s23 = inlined_call_operand.vmem [shape: f32[2,32,4], index: 23, kind: input, shape index: {}]   ;;  %s4173_s24 = inlined_call_operand.hbm [shape: f32[2,1,4], index: 24, kind: input, shape index: {}]   ;;  %s4174_s25 = inlined_call_operand.hbm [shape: f32[16,36], index: 25, kind: output, shape index: {}]  }
   0x1   :  { %4182 = sst [smem:[#allocation43_spill]] %s4149_s0 }
   0x2   :  { %4183 = sst [smem:[#allocation44_spill]] %s4150_s1 }
   0x3   :  { %4184 = sst [smem:[#allocation45_spill]] %s4151_s2 }
   0x4   :  { %4185 = sst [smem:[#allocation46_spill]] %s4152_s3 }
   0x5   :  { %4186 = sst [smem:[#allocation47_spill]] %s4153_s4 }
   0x6   :  { %4187 = sst [smem:[#allocation48_spill]] %s4154_s5 }
   0x7   :  { %4188 = sst [smem:[#allocation49_spill]] %s4155_s6 }
   0x8   :  { %4189 = sst [smem:[#allocation50_spill]] %s4156_s7 }
   0x9   :  { %4190 = sst [smem:[#allocation51_spill]] %s4157_s8 }
   0xa   :  { %4191 = sst [smem:[#allocation52_spill]] %s4158_s9 }
   0xb   :  { %30 = vsyncpa [#allocation3], 0 }
   0xc   :  { %31 = vsyncpa [#allocation6], 0 }
   0xd   :  { %32 = vsyncpa [#allocation9], 0 }
   0xe   :  { %33 = vsyncpa [#allocation12], 0 }
   0xf   :  { %34 = vsyncpa [#allocation15], 0 }
  0x10   :  { %35 = vsyncpa [#allocation18], 0 }
  0x11   :  { %36 = vsyncpa [#allocation21], 0 }
  0x12   :  { %37 = vsyncpa [#allocation24], 0 }
  0x13   :  { %38 = vsyncpa [#allocation27], 0 }
  0x14   :  { %39 = vsyncpa [#allocation30], 0 }
  0x15   :  { %40 = vsyncpa [#allocation4], 0  ;;  %s4192_s6 = sld [smem:[#allocation45_spill]]  ;;  %s3213_s7 = smov [#allocation5]  }
  0x16   :  { %s62_s3 = sshll.u32 %s3213_s7, 4  ;;  %s4180_s26 = smov 128   ;;  %s63_s3 = int_to_ptr.vmem [resolvable:$true] %s62_s3 }
  0x17   :  { %s3215_s1 = smov 8   ;;  %s4193_s4 = sld [smem:[#allocation51_spill]] }
  0x18   :  { %s3216_s9 = smov [#allocation8]   ;;  %s120_s2 = sshll.u32 %s4159_s10, 4  ;;  %s121_s2 = int_to_ptr.hbm [resolvable:$true] %s120_s2 }
  0x19   :  { %s96_s5 = sshll.u32 %s3216_s9, 4  ;;  %s3218_s7 = smov 1   ;;  %s97_s5 = int_to_ptr.vmem [resolvable:$true] %s96_s5 }
  0x1a   :  { %s146_s8 = sshll.u32 %s4161_s12, 4  ;;  %s3219_s27 = smov [#allocation11]   ;;  %s147_s8 = int_to_ptr.hbm [resolvable:$true] %s146_s8 }
  0x1b   :  { %s60_s30 = sshll.u32 %s4192_s6, 4  ;;  %s3217_s6 = smov 16   ;;  %s61_s30 = int_to_ptr.hbm [resolvable:$true] %s60_s30 }
  0x1c   :  { %68 = dma.hbm_to_vmem [thread:$0]  %s61_s30, 256, %s63_s3, [#allocation6], %s4180_s26, %s4180_s26, %s3215_s1  }
  0x1d   :  { %s94_s28 = sshll.u32 %s4193_s4, 4  ;;  %s122_s4 = sshll.u32 %s3219_s27, 4  ;;  %s95_s28 = int_to_ptr.hbm [resolvable:$true] %s94_s28  ;;  %s123_s4 = int_to_ptr.vmem [resolvable:$true] %s122_s4 }
  0x1e   :  { %102 = dma.hbm_to_vmem [thread:$0]  %s95_s28, 32, %s97_s5, [#allocation9], %s3217_s6, %s3217_s6, %s3218_s7  }
  0x1f   :  { %128 = dma.hbm_to_vmem [thread:$0]  %s121_s2, 32, %s123_s4, [#allocation12], %s3217_s6, %s3217_s6, %s3218_s7  }
  0x20   :  { %s3220_s10 = smov [#allocation14]   ;;  %s172_s26 = sshll.u32 %s4163_s14, 4  ;;  %s173_s26 = int_to_ptr.hbm [resolvable:$true] %s172_s26 }
  0x21   :  { %s148_s9 = sshll.u32 %s3220_s10, 4  ;;  %s198_s5 = sshll.u32 %s4165_s16, 4  ;;  %s149_s9 = int_to_ptr.vmem [resolvable:$true] %s148_s9  ;;  %s199_s5 = int_to_ptr.hbm [resolvable:$true] %s198_s5 }
  0x22   :  { %154 = dma.hbm_to_vmem [thread:$0]  %s147_s8, 32, %s149_s9, [#allocation15], %s3217_s6, %s3217_s6, %s3218_s7  }
  0x23   :  { %s3221_s30 = smov [#allocation17]   ;;  %s3222_s2 = smov [#allocation20]  }
  0x24   :  { %s174_s3 = sshll.u32 %s3221_s30, 4  ;;  %s200_s14 = sshll.u32 %s3222_s2, 4  ;;  %s175_s3 = int_to_ptr.vmem [resolvable:$true] %s174_s3  ;;  %s201_s14 = int_to_ptr.vmem [resolvable:$true] %s200_s14 }
  0x25   :  { %180 = dma.hbm_to_vmem [thread:$0]  %s173_s26, 32, %s175_s3, [#allocation18], %s3217_s6, %s3217_s6, %s3218_s7  }
  0x26   :  { %s224_s10 = sshll.u32 %s4167_s18, 4  ;;  %s252_s9 = sshll.u32 %s4170_s21, 4  ;;  %s225_s10 = int_to_ptr.hbm [resolvable:$true] %s224_s10  ;;  %s253_s9 = int_to_ptr.hbm [resolvable:$true] %s252_s9 }
  0x27   :  { %206 = dma.hbm_to_vmem [thread:$0]  %s199_s5, 32, %s201_s14, [#allocation21], %s3217_s6, %s3217_s6, %s3218_s7  }
  0x28   :  { %s3223_s0 = smov [#allocation23]   ;;  %s3224_s26 = smov [#allocation26]  }
  0x29   :  { %s226_s29 = sshll.u32 %s3223_s0, 4  ;;  %s254_s18 = sshll.u32 %s3224_s26, 4  ;;  %s227_s29 = int_to_ptr.vmem [resolvable:$true] %s226_s29  ;;  %s255_s18 = int_to_ptr.vmem [resolvable:$true] %s254_s18 }
  0x2a   :  { %232 = dma.hbm_to_vmem [thread:$0]  %s225_s10, 32, %s227_s29, [#allocation24], %s3217_s6, %s3217_s6, %s3218_s7  }
  0x2b   :  { %s4194_s30 = sld [smem:[#allocation44_spill]]  ;;  %s3225_s27 = smov [#allocation2]  }
  0x2c   :  { %260 = dma.hbm_to_vmem [thread:$0]  %s253_s9, 32, %s255_s18, [#allocation27], %s3217_s6, %s3217_s6, %s3218_s7  }
  0x2d   :  { %s4195_s2 = sld [smem:[#allocation49_spill]]  ;;  %s49_s4 = sshll.u32 %s3225_s27, 4  ;;  %s50_s4 = int_to_ptr.vmem [resolvable:$true] %s49_s4 }
  0x2e   :  { %s4196_s10 = smov 128   ;;  %s3226_s16 = smov [#allocation7]  }
  0x2f   :  { %s81_s8 = sshll.u32 %s3226_s16, 4  ;;  %s4197_s26 = sld [smem:[#allocation52_spill]]  ;;  %s82_s8 = int_to_ptr.vmem [resolvable:$true] %s81_s8 }
  0x30   :  { %s133_s28 = sshll.u32 %s4160_s11, 4  ;;  %s185_s16 = sshll.u32 %s4164_s15, 4  ;;  %s134_s28 = int_to_ptr.hbm [resolvable:$true] %s133_s28  ;;  %s186_s16 = int_to_ptr.hbm [resolvable:$true] %s185_s16 }
  0x31   :  { %s47_s3 = sshll.u32 %s4194_s30, 4  ;;  %s3227_s30 = smov [#allocation10]   ;;  %s48_s3 = int_to_ptr.hbm [resolvable:$true] %s47_s3 }
  0x32   :  { %55 = dma.hbm_to_vmem [thread:$0]  %s48_s3, 256, %s50_s4, [#allocation3], %s4196_s10, %s4196_s10, %s3215_s1  }
  0x33   :  { %s79_s14 = sshll.u32 %s4195_s2, 4  ;;  %s109_s21 = sshll.u32 %s3227_s30, 4  ;;  %s80_s14 = int_to_ptr.hbm [resolvable:$true] %s79_s14  ;;  %s110_s21 = int_to_ptr.vmem [resolvable:$true] %s109_s21 }
  0x34   :  { %87 = dma.hbm_to_vmem [thread:$0]  %s80_s14, 32, %s82_s8, [#allocation6], %s3217_s6, %s3217_s6, %s3218_s7  }
  0x35   :  { %s107_s12 = sshll.u32 %s4197_s26, 4  ;;  %s3228_s3 = smov [#allocation13]   ;;  %s108_s12 = int_to_ptr.hbm [resolvable:$true] %s107_s12 }
  0x36   :  { %115 = dma.hbm_to_vmem [thread:$0]  %s108_s12, 1024, %s110_s21, [#allocation9], %s4196_s10, %s4196_s10, %s3215_s1  }
  0x37   :  { %s135_s5 = sshll.u32 %s3228_s3, 4  ;;  %s159_s4 = sshll.u32 %s4162_s13, 4  ;;  %s136_s5 = int_to_ptr.vmem [resolvable:$true] %s135_s5  ;;  %s160_s4 = int_to_ptr.hbm [resolvable:$true] %s159_s4 }
  0x38   :  { %141 = dma.hbm_to_vmem [thread:$0]  %s134_s28, 1024, %s136_s5, [#allocation12], %s4196_s10, %s4196_s10, %s3215_s1  }
  0x39   :  { %s3229_s8 = smov [#allocation16]   ;;  %s3230_s29 = smov [#allocation19]  }
  0x3a   :  { %s161_s0 = sshll.u32 %s3229_s8, 4  ;;  %s187_s13 = sshll.u32 %s3230_s29, 4  ;;  %s162_s0 = int_to_ptr.vmem [resolvable:$true] %s161_s0  ;;  %s188_s13 = int_to_ptr.vmem [resolvable:$true] %s187_s13 }
  0x3b   :  { %167 = dma.hbm_to_vmem [thread:$0]  %s160_s4, 32, %s162_s0, [#allocation15], %s3217_s6, %s3217_s6, %s3218_s7  }
  0x3c   :  { %s211_s9 = sshll.u32 %s4166_s17, 4  ;;  %s239_s28 = sshll.u32 %s4169_s20, 4  ;;  %s212_s9 = int_to_ptr.hbm [resolvable:$true] %s211_s9  ;;  %s240_s28 = int_to_ptr.hbm [resolvable:$true] %s239_s28 }
  0x3d   :  { %193 = dma.hbm_to_vmem [thread:$0]  %s186_s16, 32, %s188_s13, [#allocation18], %s3217_s6, %s3217_s6, %s3218_s7  }
  0x3e   :  { %s3231_s30 = smov [#allocation22]   ;;  %s3232_s3 = smov [#allocation25]  }
  0x3f   :  { %s213_s21 = sshll.u32 %s3231_s30, 4  ;;  %s241_s17 = sshll.u32 %s3232_s3, 4  ;;  %s214_s21 = int_to_ptr.vmem [resolvable:$true] %s213_s21  ;;  %s242_s17 = int_to_ptr.vmem [resolvable:$true] %s241_s17 }
  0x40   :  { %219 = dma.hbm_to_vmem [thread:$0]  %s212_s9, 1024, %s214_s21, [#allocation21], %s4196_s10, %s4196_s10, %s3215_s1  }
  0x41   :  { %s265_s27 = sshll.u32 %s4171_s22, 4  ;;  %s280_s11 = sshll.u32 %s4173_s24, 4  ;;  %s266_s27 = int_to_ptr.hbm [resolvable:$true] %s265_s27  ;;  %s281_s11 = int_to_ptr.hbm [resolvable:$true] %s280_s11 }
  0x42   :  { %247 = dma.hbm_to_vmem [thread:$0]  %s240_s28, 32, %s242_s17, [#allocation24], %s3217_s6, %s3217_s6, %s3218_s7  }
  0x43   :  { %s3233_s14 = smov [#allocation28]   ;;  %s3234_s8 = smov [#allocation29]  }
  0x44   :  { %s267_s16 = sshll.u32 %s3233_s14, 4  ;;  %s282_s22 = sshll.u32 %s3234_s8, 4  ;;  %s268_s16 = int_to_ptr.vmem [resolvable:$true] %s267_s16  ;;  %s283_s22 = int_to_ptr.vmem [resolvable:$true] %s282_s22 }
  0x45   :  { %273 = dma.hbm_to_vmem [thread:$0]  %s266_s27, 32, %s268_s16, [#allocation27], %s3217_s6, %s3217_s6, %s3218_s7  }
  0x46   :  { %288 = dma.hbm_to_vmem [thread:$0]  %s281_s11, 32, %s283_s22, [#allocation30], %s3217_s6, %s3217_s6, %s3218_s7  }
  0x47   :  { %3191 = dma.done.wait [#allocation3], 256  }
  0x48   :  { %3192 = vsyncadd [#allocation3], 4294967040 }
  0x49   :  { %3193 = dma.done.wait [#allocation6], 288  }
  0x4a   :  { %3194 = vsyncadd [#allocation6], 4294967008 }
  0x4b   :  { %3195 = dma.done.wait [#allocation9], 1056  }
  0x4c   :  { %3196 = vsyncadd [#allocation9], 4294966240 }
  0x4d   :  { %3197 = dma.done.wait [#allocation12], 1056  }
  0x4e   :  { %3198 = vsyncadd [#allocation12], 4294966240 }
  0x4f   :  { %3199 = dma.done.wait [#allocation15], 64  }
  0x50   :  { %3200 = vsyncadd [#allocation15], 4294967232 }
  0x51   :  { %3201 = dma.done.wait [#allocation18], 64  }
  0x52   :  { %3202 = vsyncadd [#allocation18], 4294967232 }
  0x53   :  { %3203 = dma.done.wait [#allocation21], 1056  }
  0x54   :  { %3204 = vsyncadd [#allocation21], 4294966240 }
  0x55   :  { %3205 = dma.done.wait [#allocation24], 64  }
  0x56   :  { %3206 = vsyncadd [#allocation24], 4294967232 }
  0x57   :  { %3207 = dma.done.wait [#allocation27], 64  }
  0x58   :  { %3208 = vsyncadd [#allocation27], 4294967232 }
  0x59   :  { %3209 = dma.done.wait [#allocation30], 32  }
  0x5a   :  { %3210 = vsyncadd [#allocation30], 4294967264  ;;  %s4198_s0 = sld [smem:[#allocation46_spill]]  ;;  %vm371_vm0 = vcmask 261120   ;;  %v364_v12 = vld [vmem:[#allocation2 + $0x8] sm:$0xff]  ;;  %vm405_vm1 = vcmask 130048  }
  0x5b   :  { %s4199_s30 = sld [smem:[#allocation43_spill]]  ;;  %v2613_v15 = vld [vmem:[#allocation7] ss:$0 sm:$0xff]  ;;  %s3235_s15 = smov 120   ;;  %v2615_v25 = vld [vmem:[#allocation8] ss:$0 sm:$0xff] }
  0x5c   :  { %s4200_s2 = sld [smem:[#allocation48_spill]]  ;;  %s3236_s18 = smov 104   ;;  %vm597_vm2 = vcmask 64512   ;;  %v365_v38 = vld [vmem:[#allocation5] sm:$0xff]  ;;  %v366_v43 = vld [vmem:[#allocation5 + $0x8] sm:$0xff]  ;;  %v363_v50 = vld [vmem:[#allocation2] sm:$0xff] }
  0x5d   :  { %s4201_s24 = sld [smem:[#allocation50_spill]]  ;;  %s3237_s28 = smov 112   ;;  %v569_v51 = vld [vmem:[#allocation10 + $0x18] sm:$0xff]  ;;  %v568_v52 = vld [vmem:[#allocation10 + $0x10] sm:$0xff]  ;;  %v567_v53 = vld [vmem:[#allocation10 + $0x8] sm:$0xff] }
  0x5e   :  { %v566_v54 = vld [vmem:[#allocation10] sm:$0xff]  ;;  %s4204_s17 = sld [smem:[#allocation47_spill]]  ;;  %s3241_s13 = smov [#allocation31]  }
  0x60   :  { %v370_v0 = vld [vmem:[%s4198_s0 + $0x18] sm:$0xff]  ;;  %v369_v1 = vld [vmem:[%s4198_s0 + $0x10] sm:$0xff]  ;;  %v368_v2 = vld [vmem:[%s4198_s0 + $0x8] sm:$0xff] }
  0x61   :  { %2548 = vmatpush.msra.mxu2 %v370_v0  ;;  %390 = vmatpush.msra.mxu0 %v370_v0  ;;  %v367_v3 = vld [vmem:[%s4198_s0] sm:$0xff]  ;;  %v3495_v4 = vld [vmem:[%s4199_s30 + $0x8] sm:$0xff] }
  0x62   :  { %v3500_v5 = vld [vmem:[%s4199_s30] sm:$0xff]  ;;  %v505_v6 = vld [vmem:[%s4200_s2 + $0x18] sm:$0xff]  ;;  %v504_v7 = vld [vmem:[%s4200_s2 + $0x10] sm:$0xff]  ;;  %s3238_s30 = smov 24  }
  0x63   :  { %2549 = vmatpush.msra.mxu2 %v369_v1  ;;  %391 = vmatpush.msra.mxu0 %v369_v1  ;;  %v503_v8 = vld [vmem:[%s4200_s2 + $0x8] sm:$0xff]  ;;  %v502_v9 = vld [vmem:[%s4200_s2] sm:$0xff]  ;;  %v538_v13 = vld [vmem:[%s4201_s24 + $0x18] sm:$0xff] }
  0x64   :  { %v537_v14 = vld [vmem:[%s4201_s24 + $0x10] sm:$0xff]  ;;  %v536_v16 = vld [vmem:[%s4201_s24 + $0x8] sm:$0xff]  ;;  %v535_v17 = vld [vmem:[%s4201_s24] sm:$0xff] }
  0x65   :  { %2550 = vmatpush.msra.mxu2 %v368_v2  ;;  %392 = vmatpush.msra.mxu0 %v368_v2 }
  0x67   :  { %2551 = vmatpush.msra.mxu2 %v367_v3  ;;  %393 = vmatpush.msra.mxu0 %v367_v3 }
  0x68   :  { %2440 = vmatmul.msk.f32.vlgmr.msra.gmra.mxu2 %vm371_vm0, %v3495_v4  ;;  %2439 = vmatmul.msk.f32.vlgmr.msra.gmra.mxu0 %vm371_vm0, %v3500_v5 }
  0x69   :  { %522 = vmatpush.msrb.mxu2 %v505_v6 }
  0x6b   :  { %523 = vmatpush.msrb.mxu2 %v504_v7 }
  0x6d   :  { %524 = vmatpush.msrb.mxu2 %v503_v8 }
  0x6f   :  { %525 = vmatpush.msrb.mxu2 %v502_v9 }
  0x70   :  { %2443 = vmatmul.msk.f32.vlgmr.msrb.gmra.mxu2 %vm371_vm0, %v3500_v5 }
  0x78   :  { %2444 = vmatmul.msk.f32.gmra.mxu2 %vm371_vm0, %v3495_v4 }
  0xe5   :  { %v395_v11 = vpop.f32.mrf.mxu0 }
  0xeb   :  { %v398_v10 = vpop.f32.mrf.mxu2 }
  0xec   :  { %426 = vmatpush.msra.mxu1 %v398_v10  ;;  %2552 = vmatpush.msra.mxu3 %v398_v10 }
  0xee   :  { %427 = vmatpush.msra.mxu1 %v395_v11  ;;  %2553 = vmatpush.msra.mxu3 %v395_v11 }
  0xef   :  { %2442 = vmatmul.msk.f32.vlgmr.msra.gmra.mxu3 %vm405_vm1, %v364_v12  ;;  %2441 = vmatmul.msk.f32.vlgmr.msra.gmra.mxu1 %vm405_vm1, %v363_v50 }
  0xf0   :  { %555 = vmatpush.msrb.mxu3 %v538_v13  ;;  %586 = vmatpush.msrb.mxu1 %v569_v51 }
  0xf2   :  { %556 = vmatpush.msrb.mxu3 %v537_v14  ;;  %587 = vmatpush.msrb.mxu1 %v568_v52 }
  0xf3   :  { %v527_v18 = vpop.f32.mrf.mxu2 }
  0xf4   :  { %557 = vmatpush.msrb.mxu3 %v536_v16  ;;  %v528_v19 = vadd.f32 %v2613_v15, %v527_v18  ;;  %588 = vmatpush.msrb.mxu1 %v567_v53 }
  0xf6   :  { %558 = vmatpush.msrb.mxu3 %v535_v17  ;;  %v533_v20 = vmul.f32 0.35355338, %v528_v19  ;;  %589 = vmatpush.msrb.mxu1 %v566_v54 }
  0xf7   :  { %2445 = vmatmul.msk.f32.vlgmr.msrb.gmra.mxu3 %vm371_vm0, %v3500_v5  ;;  %2447 = vmatmul.msk.f32.vlgmr.msrb.gmra.mxu1 %vm371_vm0, %v3500_v5 }
  0xf8   :  { %710 = vrot.lane.b32.xlu1 %v533_v20, %s3235_s15 }
  0xfb   :  { %v530_v21 = vpop.f32.mrf.mxu2 }
  0xfc   :  { %v531_v22 = vadd.f32 %v2613_v15, %v530_v21 }
  0xfe   :  { %v534_v23 = vmul.f32 0.35355338, %v531_v22 }
  0xff   :  { %2446 = vmatmul.msk.f32.gmra.mxu3 %vm371_vm0, %v3495_v4  ;;  %2448 = vmatmul.msk.f32.gmra.mxu1 %vm371_vm0, %v3495_v4 }
 0x100   :  { %712 = vrot.lane.b32.xlu1 %v534_v23, %s3235_s15 }
 0x16a   :  { %v711_v31 = vpop.permute.xlu1 %710 }
 0x16c   :  { %v3590_v21 = vpop.f32.mrf.mxu1 }
 0x172   :  { %v3541_v24 = vpop.f32.mrf.mxu3  ;;  %v713_v33 = vpop.permute.xlu1 %712 }
 0x174   :  { %v591_v22 = vpop.f32.mrf.mxu1 }
 0x17a   :  { %v560_v26 = vpop.f32.mrf.mxu3 }
 0x17b   :  { %v561_v27 = vadd.f32 %v2615_v25, %v560_v26 }
 0x17d   :  { %960 = vrot.lane.b32.xlu1 %v561_v27, %s3236_s18 }
 0x182   :  { %v563_v28 = vpop.f32.mrf.mxu3 }
 0x183   :  { %v564_v29 = vadd.f32 %v2615_v25, %v563_v28  ;;  %v594_v25 = vpop.f32.mrf.mxu1 }
 0x185   :  { %840 = vrot.lane.b32.xlu2 %v564_v29, %s3237_s28  ;;  %716 = vrot.lane.b32.xlu0 %v564_v29, %s3235_s15 }
 0x186   :  { %2449 = vmatpush.xpose.msk.msrb.mxu0 %vm597_vm2, %v564_v29  ;;  %836 = vrot.lane.b32.xlu1 %v534_v23, %s3237_s28 }
 0x18a   :  { %2450 = vmatpush.xpose.msk.msrb.mxu0 %vm597_vm2, %v561_v27 }
 0x18d   :  { %2451 = vmatmul.msk.f32.vlgmr.msrb.gmra.mxu0 %vm597_vm2, %v533_v20  ;;  %962 = vrot.lane.b32.xlu2 %v564_v29, %s3236_s18 }
 0x18e   :  { %714 = vrot.lane.b32.xlu0 %v561_v27, %s3235_s15 }
 0x195   :  { %2452 = vmatmul.msk.f32.gmra.mxu0 %vm597_vm2, %v534_v23  ;;  %834 = vrot.lane.b32.xlu2 %v533_v20, %s3237_s28 }
 0x196   :  { %838 = vrot.lane.b32.xlu0 %v561_v27, %s3237_s28 }
 0x19d   :  { %958 = vrot.lane.b32.xlu2 %v534_v23, %s3236_s18  ;;  %v2616_v23 = vld [vmem:[#allocation11] ss:$0 sm:$0xff] }
 0x19e   :  { %956 = vrot.lane.b32.xlu0 %v533_v20, %s3236_s18  ;;  %v3592_v27 = vadd.f32 %v2616_v23, %v591_v22  ;;  %v3594_v28 = vadd.f32 %v2616_v23, %v594_v25 }
 0x1a0   :  { %701 = vmatpush.msra.mxu2 %v3594_v28 }
 0x1a2   :  { %702 = vmatpush.msra.mxu2 %v3592_v27 }
 0x1df   :  { %v841_v30 = vpop.permute.xlu2 %840 }
 0x1e0   :  { %2461 = vmatpush.xpose.msk.msra.mxu0 %vm597_vm2, %v841_v30 }
 0x1e7   :  { %v963_v35 = vpop.permute.xlu2 %962 }
 0x1ef   :  { %v961_v36 = vpop.permute.xlu1 %960  ;;  %v835_v40 = vpop.permute.xlu2 %834 }
 0x1f7   :  { %v717_v32 = vpop.permute.xlu0 %716  ;;  %v959_v49 = vpop.permute.xlu2 %958 }
 0x1f8   :  { %2455 = vmatpush.xpose.msk.msra.mxu3 %vm597_vm2, %v717_v32  ;;  %v837_v45 = vpop.permute.xlu1 %836 }
 0x200   :  { %v715_v34 = vpop.permute.xlu0 %714 }
 0x201   :  { %2456 = vmatpush.xpose.msk.msra.mxu3 %vm597_vm2, %v715_v34 }
 0x204   :  { %2457 = vmatmul.msk.f32.vlgmr.msra.gmra.mxu3 %vm597_vm2, %v711_v31 }
 0x205   :  { %2467 = vmatpush.xpose.msk.msrb.mxu3 %vm597_vm2, %v963_v35 }
 0x208   :  { %v839_v37 = vpop.permute.xlu0 %838 }
 0x209   :  { %2468 = vmatpush.xpose.msk.msrb.mxu3 %vm597_vm2, %v961_v36  ;;  %2462 = vmatpush.xpose.msk.msra.mxu0 %vm597_vm2, %v839_v37 }
 0x20a   :  { %v627_v39 = vpop.f32.mrf.mxu0 }
 0x20b   :  { %v628_v41 = vadd.f32 %v627_v39, %v365_v38 }
 0x20c   :  { %2458 = vmatmul.msk.f32.gmra.mxu3 %vm597_vm2, %v713_v33  ;;  %2463 = vmatmul.msk.f32.vlgmr.msra.gmra.mxu0 %vm597_vm2, %v835_v40 }
 0x20d   :  { %v633_v42 = vsel %vm405_vm1, %v628_v41, -inf }
 0x20e   :  { %634 = vmax.xlane.f32.xlu0 %v633_v42 }
 0x210   :  { %v957_v46 = vpop.permute.xlu0 %956 }
 0x212   :  { %v630_v44 = vpop.f32.mrf.mxu0 }
 0x213   :  { %v631_v47 = vadd.f32 %v630_v44, %v366_v43 }
 0x214   :  { %2464 = vmatmul.msk.f32.gmra.mxu0 %vm597_vm2, %v837_v45  ;;  %2469 = vmatmul.msk.f32.vlgmr.msrb.gmra.mxu3 %vm597_vm2, %v957_v46 }
 0x215   :  { %v636_v48 = vsel %vm405_vm1, %v631_v47, -inf }
 0x216   :  { %637 = vmax.xlane.f32.xlu2 %v636_v48 }
 0x21c   :  { %2470 = vmatmul.msk.f32.gmra.mxu3 %vm597_vm2, %v959_v49 }
 0x281   :  { %v635_v61 = vpop.xlane.xlu0 %634 }
 0x282   :  { %v639_v0 = vsub.f32 %v628_v41, %v635_v61 }
 0x284   :  { %v641_v3 = vmul.f32 1.442695, %v639_v0 }
 0x286   :  { %2641 = vpow2.f32 %v641_v3 }
 0x287   :  { %v743_v55 = vpop.f32.mrf.mxu3 }
 0x288   :  { %v744_v56 = vadd.f32 %v743_v55, %v365_v38 }
 0x289   :  { %v867_v57 = vpop.f32.mrf.mxu0  ;;  %v638_v6 = vpop.xlane.xlu2 %637 }
 0x28a   :  { %v868_v58 = vadd.f32 %v867_v57, %v365_v38  ;;  %v749_v59 = vsel %vm405_vm1, %v744_v56, -inf  ;;  %v640_v10 = vsub.f32 %v631_v47, %v638_v6 }
 0x28b   :  { %750 = vmax.xlane.f32.xlu1 %v749_v59 }
 0x28c   :  { %v873_v60 = vsel %vm405_vm1, %v868_v58, -inf  ;;  %v643_v13 = vmul.f32 1.442695, %v640_v10  ;;  %v3581_v14 = vpop.eup %2641 }
 0x28d   :  { %874 = vmax.xlane.f32.xlu0 %v873_v60  ;;  %v645_v18 = vsel %vm405_vm1, %v3581_v14, 0.0 }
 0x28e   :  { %2643 = vpow2.f32 %v643_v13 }
 0x28f   :  { %v746_v62 = vpop.f32.mrf.mxu3 }
 0x290   :  { %v747_v63 = vadd.f32 %v746_v62, %v366_v43 }
 0x291   :  { %v870_v2 = vpop.f32.mrf.mxu0 }
 0x292   :  { %v752_v1 = vsel %vm405_vm1, %v747_v63, -inf  ;;  %v871_v7 = vadd.f32 %v870_v2, %v366_v43 }
 0x293   :  { %753 = vmax.xlane.f32.xlu2 %v752_v1 }
 0x294   :  { %v876_v12 = vsel %vm405_vm1, %v871_v7, -inf  ;;  %v3586_v19 = vpop.eup %2643 }
 0x295   :  { %v648_v20 = vsel %vm405_vm1, %v3586_v19, 0.0 }
 0x297   :  { %v989_v8 = vpop.f32.mrf.mxu3 }
 0x298   :  { %v990_v9 = vadd.f32 %v989_v8, %v365_v38 }
 0x29a   :  { %v995_v11 = vsel %vm405_vm1, %v990_v9, -inf }
 0x29b   :  { %996 = vmax.xlane.f32.xlu1 %v995_v11  ;;  %877 = vmax.xlane.f32.xlu2 %v876_v12 }
 0x29f   :  { %v992_v15 = vpop.f32.mrf.mxu3 }
 0x2a0   :  { %v993_v16 = vadd.f32 %v992_v15, %v366_v43  ;;  %v2583_v15 = vpack.i.bf16 %v3592_v27, %v3594_v28 }
 0x2a2   :  { %v998_v17 = vsel %vm405_vm1, %v993_v16, -inf }
 0x2a3   :  { %999 = vmax.xlane.f32.xlu0 %v998_v17  ;;  %646 = vadd.xlane.f32.xlu1 %v645_v18 }
 0x2ab   :  { %649 = vadd.xlane.f32.xlu0 %v648_v20 }
 0x2fe   :  { %v751_v26 = vpop.xlane.xlu1 %750 }
 0x2ff   :  { %v755_v31 = vsub.f32 %v744_v56, %v751_v26 }
 0x300   :  { %v875_v29 = vpop.xlane.xlu0 %874 }
 0x301   :  { %v879_v30 = vsub.f32 %v868_v58, %v875_v29  ;;  %v757_v33 = vmul.f32 1.442695, %v755_v31 }
 0x303   :  { %v881_v32 = vmul.f32 1.442695, %v879_v30 }
 0x305   :  { %2645 = vpow2.f32 %v881_v32 }
 0x306   :  { %v754_v34 = vpop.xlane.xlu2 %753  ;;  %2647 = vpow2.f32 %v757_v33 }
 0x307   :  { %v756_v35 = vsub.f32 %v747_v63, %v754_v34 }
 0x309   :  { %v759_v36 = vmul.f32 1.442695, %v756_v35 }
 0x30b   :  { %v3598_v37 = vpop.eup %2645  ;;  %2649 = vpow2.f32 %v759_v36 }
 0x30c   :  { %v885_v38 = vsel %vm405_vm1, %v3598_v37, 0.0  ;;  %v3602_v43 = vpop.eup %2647 }
 0x30d   :  { %886 = vadd.xlane.f32.xlu2 %v885_v38  ;;  %v761_v48 = vsel %vm405_vm1, %v3602_v43, 0.0 }
 0x30e   :  { %v997_v39 = vpop.xlane.xlu1 %996  ;;  %v878_v40 = vpop.xlane.xlu2 %877 }
 0x30f   :  { %v1001_v41 = vsub.f32 %v990_v9, %v997_v39  ;;  %v880_v42 = vsub.f32 %v871_v7, %v878_v40 }
 0x311   :  { %v3604_v44 = vpop.eup %2649  ;;  %v1003_v45 = vmul.f32 1.442695, %v1001_v41  ;;  %v883_v46 = vmul.f32 1.442695, %v880_v42 }
 0x312   :  { %v764_v47 = vsel %vm405_vm1, %v3604_v44, 0.0 }
 0x313   :  { %2651 = vpow2.f32 %v1003_v45  ;;  %765 = vadd.xlane.f32.xlu1 %v764_v47 }
 0x314   :  { %2653 = vpow2.f32 %v883_v46 }
 0x315   :  { %762 = vadd.xlane.f32.xlu2 %v761_v48 }
 0x316   :  { %v647_v49 = vpop.xlane.xlu1 %646  ;;  %v1000_v50 = vpop.xlane.xlu0 %999 }
 0x317   :  { %2655 = vrcp.f32 %v647_v49  ;;  %v1002_v51 = vsub.f32 %v993_v16, %v1000_v50  ;;  %v662_v61 = vand.u32 2147483648, %v647_v49  ;;  %v660_v0 = vand.u32 2147483647, %v647_v49 }
 0x318   :  { %vm656_vm4 = vweird.f32 %v647_v49 }
 0x319   :  { %v3610_v52 = vpop.eup %2651  ;;  %v1005_v54 = vmul.f32 1.442695, %v1002_v51  ;;  %v663_v6 = vor.u32 1.1754944e-38, %v662_v61  ;;  %vm661_vm6 = vcmp.eq.f32.partialorder %v660_v0, 8.507059e+37 }
 0x31a   :  { %v3612_v53 = vpop.eup %2653  ;;  %v1007_v55 = vsel %vm405_vm1, %v3610_v52, 0.0 }
 0x31b   :  { %1008 = vadd.xlane.f32.xlu0 %v1007_v55  ;;  %2657 = vpow2.f32 %v1005_v54  ;;  %v888_v56 = vsel %vm405_vm1, %v3612_v53, 0.0 }
 0x31d   :  { %v2656_v57 = vpop.eup %2655  ;;  %889 = vadd.xlane.f32.xlu2 %v888_v56 }
 0x31e   :  { %v652_v58 = vmul.f32 %v2656_v57, %v647_v49  ;;  %v650_v59 = vpop.xlane.xlu0 %649  ;;  %vm657_vm3 = vweird.f32 %v2656_v57 }
 0x31f   :  { %2659 = vrcp.f32 %v650_v59  ;;  %vm658_vm5 = vmor %vm656_vm4, %vm657_vm3  ;;  %v677_v12 = vand.u32 2147483648, %v650_v59  ;;  %v675_v16 = vand.u32 2147483647, %v650_v59  ;;  %vm671_vm8 = vweird.f32 %v650_v59 }
 0x320   :  { %v653_v60 = vsub.f32 1.0, %v652_v58 }
 0x321   :  { %v3618_v62 = vpop.eup %2657  ;;  %v678_v18 = vor.u32 1.1754944e-38, %v677_v12  ;;  %vm676_vm10 = vcmp.eq.f32.partialorder %v675_v16, 8.507059e+37 }
 0x322   :  { %v654_v63 = vmul.f32 %v2656_v57, %v653_v60  ;;  %v1010_v1 = vsel %vm405_vm1, %v3618_v62, 0.0 }
 0x323   :  { %1011 = vadd.xlane.f32.xlu0 %v1010_v1 }
 0x324   :  { %v655_v2 = vadd.f32 %v2656_v57, %v654_v63 }
 0x325   :  { %v2660_v3 = vpop.eup %2659 }
 0x326   :  { %v659_v7 = vsel %vm658_vm5, %v2656_v57, %v655_v2  ;;  %v667_v8 = vmul.f32 %v2660_v3, %v650_v59  ;;  %vm672_vm7 = vweird.f32 %v2660_v3 }
 0x327   :  { %v664_v9 = vsel %vm661_vm6, %v663_v6, %v659_v7  ;;  %vm673_vm9 = vmor %vm671_vm8, %vm672_vm7 }
 0x328   :  { %v668_v10 = vsub.f32 1.0, %v667_v8  ;;  %v665_v11 = vmul.f32 %v3581_v14, %v664_v9 }
 0x32a   :  { %v669_v13 = vmul.f32 %v2660_v3, %v668_v10  ;;  %2453 = vmatmul.msk.f32.vlgmr.msra.gmra.mxu2 %vm405_vm1, %v665_v11 }
 0x32c   :  { %2584 = vrot.lane.b32.xlu1 %v2583_v15, %s3235_s15  ;;  %v670_v17 = vadd.f32 %v2660_v3, %v669_v13 }
 0x32e   :  { %v674_v20 = vsel %vm673_vm9, %v2660_v3, %v670_v17 }
 0x32f   :  { %v679_v22 = vsel %vm676_vm10, %v678_v18, %v674_v20 }
 0x330   :  { %v680_v14 = vmul.f32 %v3586_v19, %v679_v22 }
 0x332   :  { %2454 = vmatmul.msk.f32.gmra.mxu2 %vm405_vm1, %v680_v14 }
 0x335   :  { %2589 = vrot.lane.b32.xlu2 %v2583_v15, %s3237_s28 }
 0x337   :  { %2594 = vrot.lane.b32.xlu0 %v2583_v15, %s3236_s18 }
 0x380   :  { %v887_v23 = vpop.xlane.xlu2 %886 }
 0x381   :  { %2661 = vrcp.f32 %v887_v23  ;;  %v902_v39 = vand.u32 2147483648, %v887_v23  ;;  %vm896_vm12 = vweird.f32 %v887_v23  ;;  %v900_v41 = vand.u32 2147483647, %v887_v23 }
 0x383   :  { %v903_v48 = vor.u32 1.1754944e-38, %v902_v39  ;;  %vm901_vm15 = vcmp.eq.f32.partialorder %v900_v41, 8.507059e+37 }
 0x386   :  { %v3631_v26 = vpop.xlane.xlu1 %765 }
 0x387   :  { %v2662_v25 = vpop.eup %2661 }
 0x388   :  { %v892_v27 = vmul.f32 %v2662_v25, %v887_v23  ;;  %v763_v28 = vpop.xlane.xlu2 %762  ;;  %vm897_vm11 = vweird.f32 %v2662_v25  ;;  %v791_v23 = vand.u32 2147483647, %v3631_v26 }
 0x389   :  { %2663 = vrcp.f32 %v763_v28  ;;  %vm898_vm13 = vmor %vm896_vm12, %vm897_vm11  ;;  %vm772_vm3 = vweird.f32 %v763_v28  ;;  %v778_v55 = vand.u32 2147483648, %v763_v28  ;;  %v776_v57 = vand.u32 2147483647, %v763_v28 }
 0x38a   :  { %2665 = vrcp.f32 %v3631_v26  ;;  %v893_v29 = vsub.f32 1.0, %v892_v27  ;;  %vm787_vm11 = vweird.f32 %v3631_v26 }
 0x38b   :  { %v779_v6 = vor.u32 1.1754944e-38, %v778_v55  ;;  %vm777_vm6 = vcmp.eq.f32.partialorder %v776_v57, 8.507059e+37 }
 0x38c   :  { %v894_v31 = vmul.f32 %v2662_v25, %v893_v29 }
 0x38e   :  { %v3634_v30 = vpop.xlane.xlu0 %1008  ;;  %v895_v36 = vadd.f32 %v2662_v25, %v894_v31 }
 0x38f   :  { %v2664_v19 = vpop.eup %2663 }
 0x390   :  { %v3636_v32 = vpop.eup %2665  ;;  %v768_v33 = vmul.f32 %v2664_v19, %v763_v28  ;;  %v890_v34 = vpop.xlane.xlu2 %889  ;;  %v899_v45 = vsel %vm898_vm13, %v2662_v25, %v895_v36  ;;  %vm773_vm14 = vweird.f32 %v2664_v19  ;;  %vm792_vm13 = vcmp.eq.f32.partialorder %v791_v23, 8.507059e+37 }
 0x391   :  { %2667 = vrcp.f32 %v890_v34  ;;  %v783_v38 = vmul.f32 %v3636_v32, %v3631_v26  ;;  %v904_v56 = vsel %vm901_vm15, %v903_v48, %v899_v45  ;;  %vm3646_vm4 = vmor %vm772_vm3, %vm773_vm14  ;;  %v917_v0 = vand.u32 2147483648, %v890_v34 }
 0x392   :  { %v769_v35 = vsub.f32 1.0, %v768_v33  ;;  %2669 = vrcp.f32 %v3634_v30  ;;  %v905_v7 = vmul.f32 %v3598_v37, %v904_v56  ;;  %v915_v8 = vand.u32 2147483647, %v890_v34 }
 0x393   :  { %v784_v46 = vsub.f32 1.0, %v783_v38  ;;  %vm911_vm7 = vweird.f32 %v890_v34  ;;  %vm788_vm9 = vweird.f32 %v3636_v32  ;;  %v918_v15 = vor.u32 1.1754944e-38, %v917_v0 }
 0x394   :  { %v770_v40 = vmul.f32 %v2664_v19, %v769_v35  ;;  %v793_v37 = vand.u32 2147483648, %v3631_v26  ;;  %vm916_vm10 = vcmp.eq.f32.partialorder %v915_v8, 8.507059e+37  ;;  %vm789_vm12 = vmor %vm787_vm11, %vm788_vm9  ;;  %v1024_v33 = vand.u32 2147483648, %v3634_v30  ;;  %v1110_v8 = vld [vmem:[#allocation13 + $0x8] sm:$0xff] }
 0x395   :  { %v785_v60 = vmul.f32 %v3636_v32, %v784_v46  ;;  %vm1018_vm15 = vweird.f32 %v3634_v30  ;;  %vm1106_vm9 = vcmask 195584  }
 0x396   :  { %v771_v49 = vadd.f32 %v2664_v19, %v770_v40  ;;  %v3643_v51 = vpop.xlane.xlu0 %1011  ;;  %v794_v29 = vor.u32 1.1754944e-38, %v793_v37  ;;  %v1025_v39 = vor.u32 1.1754944e-38, %v1024_v33 }
 0x397   :  { %v2668_v42 = vpop.eup %2667  ;;  %2671 = vrcp.f32 %v3643_v51  ;;  %v786_v17 = vadd.f32 %v3636_v32, %v785_v60  ;;  %v1037_v45 = vand.u32 2147483647, %v3643_v51 }
 0x398   :  { %v3641_v47 = vpop.eup %2669  ;;  %v907_v50 = vmul.f32 %v2668_v42, %v890_v34  ;;  %v2590_v54 = vpop.permute.xlu2 %2589  ;;  %v775_v1 = vsel %vm3646_vm4, %v2664_v19, %v771_v49  ;;  %vm912_vm5 = vweird.f32 %v2668_v42  ;;  %v1022_v34 = vand.u32 2147483647, %v3634_v30 }
 0x399   :  { %v2591_v59 = vunpack.i.l.bf16 %v2590_v54  ;;  %v1014_v63 = vmul.f32 %v3641_v47, %v3634_v30  ;;  %v2592_v3 = vunpack.i.h.bf16 %v2590_v54  ;;  %v780_v11 = vsel %vm777_vm6, %v779_v6, %v775_v1  ;;  %vm913_vm8 = vmor %vm911_vm7, %vm912_vm5  ;;  %v1112_v6 = vld [vmem:[#allocation13 + $0x18] sm:$0xff] }
 0x39a   :  { %v908_v58 = vsub.f32 1.0, %v907_v50  ;;  %v781_v22 = vmul.f32 %v3602_v43, %v780_v11  ;;  %v790_v28 = vsel %vm789_vm12, %v3636_v32, %v786_v17  ;;  %vm1019_vm14 = vweird.f32 %v3641_v47  ;;  %1135 = vmatpush.msrb.mxu0 %v1112_v6 }
 0x39b   :  { %947 = vmatpush.msrb.mxu2 %v2591_v59  ;;  %v1015_v13 = vsub.f32 1.0, %v1014_v63  ;;  %v795_v43 = vsel %vm792_vm13, %v794_v29, %v790_v28  ;;  %vm1020_vm3 = vmor %vm1018_vm15, %vm1019_vm14  ;;  %vm1023_vm4 = vcmp.eq.f32.partialorder %v1022_v34, 8.507059e+37  ;;  %v1039_v30 = vand.u32 2147483648, %v3643_v51  ;;  %v2617_v29 = vld [vmem:[#allocation14] ss:$0 sm:$0xff] }
 0x39c   :  { %v909_v2 = vmul.f32 %v2668_v42, %v908_v58  ;;  %v796_v32 = vmul.f32 %v3604_v44, %v795_v43  ;;  %vm1033_vm6 = vweird.f32 %v3643_v51  ;;  %v2614_v58 = vld [vmem:[%s4204_s17] ss:$0 sm:$0xff] }
 0x39d   :  { %948 = vmatpush.msrb.mxu2 %v2592_v3  ;;  %v2672_v18 = vpop.eup %2671  ;;  %v1016_v25 = vmul.f32 %v3641_v47, %v1015_v13  ;;  %v430_v59 = vadd.f32 %v2614_v58, %v3590_v21  ;;  %v433_v0 = vadd.f32 %v2614_v58, %v3541_v24  ;;  %v1109_v21 = vld [vmem:[#allocation13] sm:$0xff] }
 0x39e   :  { %v2585_v9 = vpop.permute.xlu1 %2584  ;;  %v910_v10 = vadd.f32 %v2668_v42, %v909_v2  ;;  %2465 = vmatmul.msk.f32.vlgmr.msrb.gmra.mxu2 %vm405_vm1, %v905_v7  ;;  %v1029_v27 = vmul.f32 %v2672_v18, %v3643_v51  ;;  %vm1034_vm5 = vweird.f32 %v2672_v18  ;;  %v1111_v7 = vld [vmem:[#allocation13 + $0x10] sm:$0xff] }
 0x39f   :  { %v2586_v12 = vunpack.i.l.bf16 %v2585_v9  ;;  %v2587_v20 = vunpack.i.h.bf16 %v2585_v9  ;;  %v1017_v26 = vadd.f32 %v3641_v47, %v1016_v25  ;;  %vm1035_vm7 = vmor %vm1033_vm6, %vm1034_vm5  ;;  %v435_v60 = vmax.f32 %v430_v59, 0.0  ;;  %1136 = vmatpush.msrb.mxu0 %v1111_v7 }
 0x3a0   :  { %v914_v16 = vsel %vm913_vm8, %v2668_v42, %v910_v10  ;;  %v1030_v31 = vsub.f32 1.0, %v1029_v27  ;;  %vm1038_vm8 = vcmp.eq.f32.partialorder %v1037_v45, 8.507059e+37  ;;  %v436_v1 = vmax.f32 %v433_v0, 0.0 }
 0x3a1   :  { %825 = vmatpush.msra.mxu1 %v2586_v12  ;;  %v919_v14 = vsel %vm916_vm10, %v918_v15, %v914_v16  ;;  %v1021_v36 = vsel %vm1020_vm3, %v3641_v47, %v1017_v26  ;;  %v1040_v47 = vor.u32 1.1754944e-38, %v1039_v30  ;;  %v437_v61 = vadd.f32 %v435_v60, %v3500_v5  ;;  %1137 = vmatpush.msrb.mxu0 %v1110_v8 }
 0x3a2   :  { %v920_v19 = vmul.f32 %v3612_v53, %v919_v14  ;;  %v1031_v38 = vmul.f32 %v2672_v18, %v1030_v31  ;;  %v1026_v41 = vsel %vm1023_vm4, %v1025_v39, %v1021_v36  ;;  %v438_v2 = vadd.f32 %v436_v1, %v3495_v4  ;;  %v1208_v1 = vld [vmem:[#allocation22 + $0x10] sm:$0xff] }
 0x3a3   :  { %826 = vmatpush.msra.mxu1 %v2587_v20  ;;  %v1027_v44 = vmul.f32 %v3610_v52, %v1026_v41  ;;  %v441_v63 = vsel %vm371_vm0, %v437_v61, 0.0  ;;  %1138 = vmatpush.msrb.mxu0 %v1109_v21 }
 0x3a4   :  { %2459 = vmatmul.msk.f32.vlgmr.msra.gmra.mxu1 %vm405_vm1, %v781_v22  ;;  %v1032_v42 = vadd.f32 %v2672_v18, %v1031_v38  ;;  %v444_v3 = vsel %vm371_vm0, %v438_v2, 0.0  ;;  %v3239_v22 = vmov 32.0  }
 0x3a5   :  { %2673 = vrcp.f32 %v3239_v22  ;;  %v1249_v22 = vld [vmem:[%s4168_s19 + $0x20] sm:$0xff] }
 0x3a6   :  { %2466 = vmatmul.msk.f32.gmra.mxu2 %vm405_vm1, %v920_v19  ;;  %v1036_v46 = vsel %vm1035_vm7, %v2672_v18, %v1032_v42 }
 0x3a7   :  { %v1041_v48 = vsel %vm1038_vm8, %v1040_v47, %v1036_v46 }
 0x3a8   :  { %v1042_v49 = vmul.f32 %v3618_v62, %v1041_v48 }
 0x3a9   :  { %v2595_v35 = vpop.permute.xlu0 %2594 }
 0x3aa   :  { %v2596_v53 = vunpack.i.l.bf16 %v2595_v35  ;;  %v2597_v40 = vunpack.i.h.bf16 %v2595_v35 }
 0x3ab   :  { %v2674_v14 = vpop.eup %2673 }
 0x3ac   :  { %2460 = vmatmul.msk.f32.gmra.mxu1 %vm405_vm1, %v796_v32  ;;  %v448_v23 = vmul.f32 32.0, %v2674_v14  ;;  %vm452_vm10 = vweird.f32 %v2674_v14 }
 0x3ad   :  { %1069 = vmatpush.msrb.mxu1 %v2596_v53  ;;  %v704_v50 = vpop.f32.mrf.mxu2 }
 0x3ae   :  { %v449_v25 = vsub.f32 1.0, %v448_v23 }
 0x3af   :  { %1070 = vmatpush.msrb.mxu1 %v2597_v40 }
 0x3b0   :  { %v450_v27 = vmul.f32 %v2674_v14, %v449_v25 }
 0x3b2   :  { %v451_v28 = vadd.f32 %v2674_v14, %v450_v27  ;;  %v1248_v27 = vld [vmem:[%s4168_s19 + $0x18] sm:$0xff] }
 0x3b4   :  { %2471 = vmatmul.msk.f32.vlgmr.msrb.gmra.mxu1 %vm405_vm1, %v1027_v44  ;;  %v3709_v19 = vsel %vm452_vm10, %v2674_v14, %v451_v28 }
 0x3b5   :  { %v707_v54 = vpop.f32.mrf.mxu2 }
 0x3bc   :  { %2472 = vmatmul.msk.f32.gmra.mxu1 %vm405_vm1, %v1042_v49 }
 0x421   :  { %v828_v55 = vpop.f32.mrf.mxu1  ;;  %v950_v56 = vpop.f32.mrf.mxu2 }
 0x422   :  { %1080 = vrot.lane.b32.xlu1 %v828_v55, %s3215_s1 }
 0x429   :  { %v831_v52 = vpop.f32.mrf.mxu1  ;;  %v953_v51 = vpop.f32.mrf.mxu2 }
 0x42a   :  { %1082 = vrot.lane.b32.xlu2 %v831_v52, %s3215_s1  ;;  %1088 = vrot.lane.b32.xlu1 %v950_v56, %s3217_s6 }
 0x431   :  { %v1072_v57 = vpop.f32.mrf.mxu1 }
 0x432   :  { %1096 = vrot.lane.b32.xlu0 %v1072_v57, %s3238_s30  ;;  %1090 = vrot.lane.b32.xlu1 %v953_v51, %s3217_s6 }
 0x439   :  { %v1075_v62 = vpop.f32.mrf.mxu1 }
 0x43a   :  { %1098 = vrot.lane.b32.xlu0 %v1075_v62, %s3238_s30 }
 0x453   :  { %442 = vadd.xlane.f32.xlu2 %v441_v63  ;;  %v1209_v63 = vld [vmem:[#allocation22 + $0x18] sm:$0xff] }
 0x454   :  { %1232 = vmatpush.msra.mxu2 %v1209_v63  ;;  %v2622_v63 = vld [vmem:[#allocation23] ss:$0 sm:$0xff] }
 0x456   :  { %1233 = vmatpush.msra.mxu2 %v1208_v1 }
 0x464   :  { %445 = vadd.xlane.f32.xlu0 %v444_v3  ;;  %v1206_v3 = vld [vmem:[#allocation22] sm:$0xff] }
 0x484   :  { %v1083_v15 = vpop.permute.xlu2 %1082 }
 0x485   :  { %v1103_v17 = vsel %vm597_vm2, %v707_v54, %v1083_v15 }
 0x494   :  { %v1081_v9 = vpop.permute.xlu1 %1080 }
 0x495   :  { %v1102_v11 = vsel %vm597_vm2, %v704_v50, %v1081_v9 }
 0x49c   :  { %v1089_v10 = vpop.permute.xlu1 %1088 }
 0x49d   :  { %v1104_v24 = vsel %vm405_vm1, %v1102_v11, %v1089_v10 }
 0x4a4   :  { %v1097_v12 = vpop.permute.xlu0 %1096  ;;  %v1091_v16 = vpop.permute.xlu1 %1090 }
 0x4a5   :  { %v1107_v13 = vsel %vm1106_vm9, %v1104_v24, %v1097_v12  ;;  %v1105_v18 = vsel %vm405_vm1, %v1103_v17, %v1091_v16  ;;  %v1252_v24 = vld [vmem:[%s4168_s19 + $0x38] sm:$0xff]  ;;  %v1251_v12 = vld [vmem:[%s4168_s19 + $0x30] sm:$0xff] }
 0x4a6   :  { %2473 = vmatmul.msk.f32.vlgmr.msrb.gmra.mxu0 %vm371_vm0, %v1107_v13  ;;  %1272 = vmatpush.msra.mxu3 %v1252_v24 }
 0x4a8   :  { %1273 = vmatpush.msra.mxu3 %v1251_v12 }
 0x4ac   :  { %v1099_v37 = vpop.permute.xlu0 %1098 }
 0x4ad   :  { %v1108_v20 = vsel %vm1106_vm9, %v1105_v18, %v1099_v37  ;;  %v1250_v18 = vld [vmem:[%s4168_s19 + $0x28] sm:$0xff] }
 0x4ae   :  { %2474 = vmatmul.msk.f32.gmra.mxu0 %vm371_vm0, %v1108_v20  ;;  %1274 = vmatpush.msra.mxu3 %v1250_v18 }
 0x4b0   :  { %1275 = vmatpush.msra.mxu3 %v1249_v22 }
 0x4b2   :  { %1276 = vmatpush.msra.mxu3 %v1248_v27 }
 0x4c6   :  { %v443_v43 = vpop.xlane.xlu2 %442 }
 0x4c7   :  { %v454_v31 = vmul.f32 %v3709_v19, %v443_v43 }
 0x4c9   :  { %v3713_v35 = vsub.f32 %v437_v61, %v454_v31 }
 0x4cb   :  { %v458_v40 = vmul.f32 %v3713_v35, %v3713_v35 }
 0x4d7   :  { %v446_v53 = vpop.xlane.xlu0 %445 }
 0x4d8   :  { %v455_v38 = vmul.f32 %v3709_v19, %v446_v53 }
 0x4da   :  { %v3720_v42 = vsub.f32 %v438_v2, %v455_v38  ;;  %v1207_v2 = vld [vmem:[#allocation22 + $0x8] sm:$0xff] }
 0x4db   :  { %1234 = vmatpush.msra.mxu2 %v1207_v2 }
 0x4dc   :  { %v459_v44 = vmul.f32 %v3720_v42, %v3720_v42 }
 0x4dd   :  { %1235 = vmatpush.msra.mxu2 %v1206_v3 }
 0x4de   :  { %v463_v45 = vsel %vm371_vm0, %v459_v44, 0.0  ;;  %v2621_v44 = vld [vmem:[#allocation20] ss:$0 sm:$0xff] }
 0x523   :  { %v1140_v26 = vpop.f32.mrf.mxu0 }
 0x524   :  { %v1141_v33 = vadd.f32 %v2617_v29, %v1140_v26 }
 0x526   :  { %v1146_v34 = vadd.f32 %v1141_v33, %v3500_v5  ;;  %v460_v5 = vsel %vm371_vm0, %v458_v40, 0.0 }
 0x528   :  { %v1150_v32 = vsel %vm371_vm0, %v1146_v34, 0.0 }
 0x529   :  { %1151 = vadd.xlane.f32.xlu1 %v1150_v32 }
 0x52b   :  { %v1143_v36 = vpop.f32.mrf.mxu0 }
 0x52c   :  { %v1144_v39 = vadd.f32 %v2617_v29, %v1143_v36 }
 0x52e   :  { %v1147_v41 = vadd.f32 %v1144_v39, %v3495_v4  ;;  %v2620_v39 = vld [vmem:[#allocation19] ss:$0 sm:$0xff] }
 0x530   :  { %v1153_v30 = vsel %vm371_vm0, %v1147_v41, 0.0 }
 0x531   :  { %1154 = vadd.xlane.f32.xlu2 %v1153_v30  ;;  %461 = vadd.xlane.f32.xlu1 %v460_v5  ;;  %v2619_v30 = vld [vmem:[#allocation17] ss:$0 sm:$0xff] }
 0x539   :  { %464 = vadd.xlane.f32.xlu2 %v463_v45 }
 0x59c   :  { %v1152_v46 = vpop.xlane.xlu1 %1151 }
 0x59d   :  { %v1156_v47 = vmul.f32 %v1152_v46, %v3709_v19 }
 0x59f   :  { %v3728_v48 = vsub.f32 %v1146_v34, %v1156_v47  ;;  %v2618_v34 = vld [vmem:[#allocation16] ss:$0 sm:$0xff] }
 0x5a1   :  { %v1160_v4 = vmul.f32 %v3728_v48, %v3728_v48 }
 0x5a3   :  { %v1162_v49 = vsel %vm371_vm0, %v1160_v4, 0.0 }
 0x5a4   :  { %1163 = vadd.xlane.f32.xlu0 %v1162_v49  ;;  %v1155_v50 = vpop.xlane.xlu2 %1154  ;;  %v462_v51 = vpop.xlane.xlu1 %461 }
 0x5a5   :  { %v1157_v54 = vmul.f32 %v1155_v50, %v3709_v19  ;;  %v466_v57 = vmul.f32 %v462_v51, %v3709_v19 }
 0x5a7   :  { %v3734_v55 = vsub.f32 %v1147_v41, %v1157_v54  ;;  %v468_v62 = vadd.f32 1e-05, %v466_v57 }
 0x5a9   :  { %v1161_v56 = vmul.f32 %v3734_v55, %v3734_v55  ;;  %2675 = vrsqrt.f32 %v468_v62  ;;  %vm476_vm12 = vweird.f32 %v468_v62 }
 0x5ab   :  { %v1165_v52 = vsel %vm371_vm0, %v1161_v56, 0.0 }
 0x5ac   :  { %1166 = vadd.xlane.f32.xlu1 %v1165_v52  ;;  %v465_v58 = vpop.xlane.xlu2 %464 }
 0x5ad   :  { %v467_v59 = vmul.f32 %v465_v58, %v3709_v19 }
 0x5af   :  { %v3741_v60 = vadd.f32 1e-05, %v467_v59  ;;  %v2676_v61 = vpop.eup %2675 }
 0x5b0   :  { %v471_v0 = vmul.f32 %v2676_v61, %v468_v62  ;;  %vm477_vm11 = vweird.f32 %v2676_v61 }
 0x5b1   :  { %2677 = vrsqrt.f32 %v3741_v60  ;;  %vm478_vm13 = vmor %vm476_vm12, %vm477_vm11  ;;  %vm486_vm5 = vweird.f32 %v3741_v60  ;;  %vm1257_vm11 = vcmask 523264  }
 0x5b2   :  { %v472_v6 = vmul.f32 %v2676_v61, %v471_v0 }
 0x5b4   :  { %v473_v10 = vmul.f32 0.5, %v472_v6 }
 0x5b6   :  { %v474_v13 = vsub.f32 1.5, %v473_v10 }
 0x5b7   :  { %v2678_v8 = vpop.eup %2677 }
 0x5b8   :  { %v481_v11 = vmul.f32 %v2678_v8, %v3741_v60  ;;  %v475_v14 = vmul.f32 %v2676_v61, %v474_v13  ;;  %vm487_vm15 = vweird.f32 %v2678_v8 }
 0x5b9   :  { %vm488_vm6 = vmor %vm486_vm5, %vm487_vm15 }
 0x5ba   :  { %v482_v15 = vmul.f32 %v2678_v8, %v481_v11  ;;  %v479_v29 = vsel %vm478_vm13, %v2676_v61, %v475_v14  ;;  %v1246_v61 = vld [vmem:[%s4168_s19 + $0x8] sm:$0xff] }
 0x5bb   :  { %v490_v32 = vmul.f32 %v479_v29, %v3713_v35  ;;  %v2484_v29 = vld [vmem:[%s4198_s0 + $0x38] sm:$0xff] }
 0x5bc   :  { %v483_v23 = vmul.f32 0.5, %v482_v15  ;;  %1399 = vmatpush.msra.mxu0 %v2484_v29 }
 0x5bd   :  { %v495_v5 = vmul.f32 %v2618_v34, %v490_v32  ;;  %v2482_v32 = vld [vmem:[%s4198_s0 + $0x28] sm:$0xff] }
 0x5be   :  { %v484_v43 = vsub.f32 1.5, %v483_v23 }
 0x5bf   :  { %v500_v49 = vadd.f32 %v2619_v30, %v495_v5  ;;  %v2499_v5 = vld [vmem:[%s4201_s24 + $0x38] sm:$0xff] }
 0x5c0   :  { %v485_v53 = vmul.f32 %v2678_v8, %v484_v43  ;;  %v2493_v43 = vld [vmem:[%s4200_s2 + $0x38] sm:$0xff] }
 0x5c2   :  { %v489_v46 = vsel %vm488_vm6, %v2678_v8, %v485_v53  ;;  %v2623_v8 = vld [vmem:[#allocation25] ss:$0 sm:$0xff]  ;;  %v2491_v53 = vld [vmem:[%s4200_s2 + $0x28] sm:$0xff] }
 0x5c3   :  { %v491_v50 = vmul.f32 %v489_v46, %v3720_v42  ;;  %v1247_v42 = vld [vmem:[%s4168_s19 + $0x10] sm:$0xff] }
 0x5c4   :  { %1277 = vmatpush.msra.mxu3 %v1247_v42  ;;  %v1571_v46 = vld [vmem:[#allocation10 + $0x30] sm:$0xff] }
 0x5c5   :  { %v496_v62 = vmul.f32 %v2618_v34, %v491_v50  ;;  %v1346_v34 = vld [vmem:[%s4172_s23 + $0x8] sm:$0xff]  ;;  %v2496_v50 = vld [vmem:[%s4201_s24 + $0x20] sm:$0xff]  ;;  %v2624_v42 = vld [vmem:[#allocation26] ss:$0 sm:$0xff] }
 0x5c6   :  { %1278 = vmatpush.msra.mxu3 %v1246_v61 }
 0x5c7   :  { %v501_v58 = vadd.f32 %v2619_v30, %v496_v62 }
 0x617   :  { %v1164_v7 = vpop.xlane.xlu0 %1163 }
 0x618   :  { %v1168_v21 = vmul.f32 %v1164_v7, %v3709_v19 }
 0x61a   :  { %v1170_v9 = vadd.f32 1e-05, %v1168_v21 }
 0x61c   :  { %2679 = vrsqrt.f32 %v1170_v9  ;;  %vm1178_vm3 = vweird.f32 %v1170_v9 }
 0x61f   :  { %v1167_v16 = vpop.xlane.xlu1 %1166 }
 0x620   :  { %v1169_v17 = vmul.f32 %v1167_v16, %v3709_v19 }
 0x622   :  { %v2680_v37 = vpop.eup %2679  ;;  %v1171_v20 = vadd.f32 1e-05, %v1169_v17 }
 0x623   :  { %v1173_v25 = vmul.f32 %v2680_v37, %v1170_v9  ;;  %vm1179_vm14 = vweird.f32 %v2680_v37 }
 0x624   :  { %2681 = vrsqrt.f32 %v1171_v20  ;;  %vm1180_vm4 = vmor %vm1178_vm3, %vm1179_vm14  ;;  %vm1188_vm8 = vweird.f32 %v1171_v20 }
 0x625   :  { %v1174_v28 = vmul.f32 %v2680_v37, %v1173_v25 }
 0x627   :  { %v1175_v26 = vmul.f32 0.5, %v1174_v28  ;;  %v1348_v28 = vld [vmem:[%s4172_s23 + $0x18] sm:$0xff] }
 0x628   :  { %1371 = vmatpush.msra.mxu1 %v1348_v28 }
 0x629   :  { %v1176_v31 = vsub.f32 1.5, %v1175_v26  ;;  %v1347_v26 = vld [vmem:[%s4172_s23 + $0x10] sm:$0xff] }
 0x62a   :  { %v2682_v33 = vpop.eup %2681  ;;  %1372 = vmatpush.msra.mxu1 %v1347_v26 }
 0x62b   :  { %v1177_v36 = vmul.f32 %v2680_v37, %v1176_v31  ;;  %v1183_v38 = vmul.f32 %v2682_v33, %v1171_v20  ;;  %vm1189_vm7 = vweird.f32 %v2682_v33  ;;  %v2483_v31 = vld [vmem:[%s4198_s0 + $0x30] sm:$0xff] }
 0x62c   :  { %vm1190_vm10 = vmor %vm1188_vm8, %vm1189_vm7  ;;  %1400 = vmatpush.msra.mxu0 %v2483_v31  ;;  %1373 = vmatpush.msra.mxu1 %v1346_v34 }
 0x62d   :  { %v1181_v40 = vsel %vm1180_vm4, %v2680_v37, %v1177_v36  ;;  %v1184_v41 = vmul.f32 %v2682_v33, %v1183_v38  ;;  %v1345_v36 = vld [vmem:[%s4172_s23] sm:$0xff] }
 0x62e   :  { %v1192_v45 = vmul.f32 %v1181_v40, %v3728_v48  ;;  %1401 = vmatpush.msra.mxu0 %v2482_v32  ;;  %v2481_v38 = vld [vmem:[%s4198_s0 + $0x20] sm:$0xff]  ;;  %1374 = vmatpush.msra.mxu1 %v1345_v36 }
 0x62f   :  { %v1185_v47 = vmul.f32 0.5, %v1184_v41 }
 0x630   :  { %v1197_v35 = vmul.f32 %v2620_v39, %v1192_v45  ;;  %1402 = vmatpush.msra.mxu0 %v2481_v38  ;;  %v2498_v45 = vld [vmem:[%s4201_s24 + $0x30] sm:$0xff]  ;;  %1557 = vmatpush.msrb.mxu1 %v2499_v5 }
 0x631   :  { %v1186_v4 = vsub.f32 1.5, %v1185_v47 }
 0x632   :  { %v1202_v54 = vadd.f32 %v2621_v44, %v1197_v35  ;;  %v2497_v35 = vld [vmem:[%s4201_s24 + $0x28] sm:$0xff]  ;;  %1558 = vmatpush.msrb.mxu1 %v2498_v45  ;;  %s2415_s24 = sshll.u32 %s3241_s13, 4  ;;  %s2416_s24 = int_to_ptr.vmem [resolvable:$true] %s2415_s24 }
 0x633   :  { %v1187_v56 = vmul.f32 %v2682_v33, %v1186_v4  ;;  %v1570_v4 = vld [vmem:[#allocation10 + $0x28] sm:$0xff] }
 0x634   :  { %v1204_v52 = vadd.f32 %v1202_v54, %v500_v49  ;;  %v1569_v54 = vld [vmem:[#allocation10 + $0x20] sm:$0xff]  ;;  %1559 = vmatpush.msrb.mxu1 %v2497_v35 }
 0x635   :  { %v1191_v51 = vsel %vm1190_vm10, %v2682_v33, %v1187_v56  ;;  %v2492_v33 = vld [vmem:[%s4200_s2 + $0x30] sm:$0xff] }
 0x636   :  { %v1193_v57 = vmul.f32 %v1191_v51, %v3734_v55  ;;  %2475 = vmatmul.msk.f32.vlgmr.msra.gmra.mxu2 %vm371_vm0, %v1204_v52  ;;  %v1245_v55 = vld [vmem:[%s4168_s19] sm:$0xff]  ;;  %1560 = vmatpush.msrb.mxu1 %v2496_v50 }
 0x637   :  { %1279 = vmatpush.msra.mxu3 %v1245_v55 }
 0x638   :  { %v1198_v48 = vmul.f32 %v2620_v39, %v1193_v57  ;;  %v2490_v39 = vld [vmem:[%s4200_s2 + $0x20] sm:$0xff] }
 0x639   :  { %1522 = vmatpush.msrb.mxu3 %v2493_v43 }
 0x63a   :  { %v1203_v59 = vadd.f32 %v2621_v44, %v1198_v48  ;;  %v1572_v44 = vld [vmem:[#allocation10 + $0x38] sm:$0xff] }
 0x63b   :  { %1523 = vmatpush.msrb.mxu3 %v2492_v33  ;;  %1590 = vmatpush.msrb.mxu0 %v1572_v44 }
 0x63c   :  { %v1205_v60 = vadd.f32 %v1203_v59, %v501_v58 }
 0x63d   :  { %1524 = vmatpush.msrb.mxu3 %v2491_v53  ;;  %1591 = vmatpush.msrb.mxu0 %v1571_v46 }
 0x63e   :  { %2476 = vmatmul.msk.f32.gmra.mxu2 %vm371_vm0, %v1205_v60 }
 0x63f   :  { %1525 = vmatpush.msrb.mxu3 %v2490_v39  ;;  %1592 = vmatpush.msrb.mxu0 %v1570_v4 }
 0x641   :  { %1593 = vmatpush.msrb.mxu0 %v1569_v54  ;;  %v2733_v54 = vld [vmem:[#allocation5] sm:$0xff] }
 0x6b9   :  { %v1237_v0 = vpop.f32.mrf.mxu2 }
 0x6ba   :  { %v1238_v1 = vadd.f32 %v2622_v63, %v1237_v0 }
 0x6bc   :  { %v1243_v2 = vmax.f32 %v1238_v1, 0.0 }
 0x6be   :  { %2477 = vmatmul.msk.f32.vlgmr.msra.gmra.mxu3 %vm1257_vm11, %v1243_v2 }
 0x6c1   :  { %v1240_v3 = vpop.f32.mrf.mxu2 }
 0x6c2   :  { %v1241_v6 = vadd.f32 %v2622_v63, %v1240_v3  ;;  %v2625_v63 = vld [vmem:[#allocation28] ss:$0 sm:$0xff] }
 0x6c4   :  { %v1244_v7 = vmax.f32 %v1241_v6, 0.0 }
 0x6c6   :  { %2478 = vmatmul.msk.f32.gmra.mxu3 %vm1257_vm11, %v1244_v7 }
 0x741   :  { %v1281_v21 = vpop.f32.mrf.mxu3 }
 0x742   :  { %v1282_v9 = vadd.f32 %v2623_v8, %v1281_v21 }
 0x744   :  { %v1287_v10 = vadd.f32 %v1282_v9, %v1204_v52 }
 0x746   :  { %v1291_v11 = vsel %vm371_vm0, %v1287_v10, 0.0 }
 0x747   :  { %1292 = vadd.xlane.f32.xlu0 %v1291_v11 }
 0x749   :  { %v1284_v24 = vpop.f32.mrf.mxu3 }
 0x74a   :  { %v1285_v12 = vadd.f32 %v2623_v8, %v1284_v24 }
 0x74c   :  { %v1288_v13 = vadd.f32 %v1285_v12, %v1205_v60 }
 0x74e   :  { %v1294_v15 = vsel %vm371_vm0, %v1288_v13, 0.0 }
 0x74f   :  { %1295 = vadd.xlane.f32.xlu2 %v1294_v15  ;;  %v2731_v15 = vld [vmem:[#allocation2] sm:$0xff] }
 0x7ba   :  { %v1293_v16 = vpop.xlane.xlu0 %1292 }
 0x7bb   :  { %v1297_v17 = vmul.f32 %v1293_v16, %v3709_v19  ;;  %v2628_v16 = vld [vmem:[#allocation8 + $0x1] ss:$0 sm:$0xff] }
 0x7bd   :  { %v3783_v18 = vsub.f32 %v1287_v10, %v1297_v17 }
 0x7bf   :  { %v1301_v37 = vmul.f32 %v3783_v18, %v3783_v18 }
 0x7c1   :  { %v1303_v20 = vsel %vm371_vm0, %v1301_v37, 0.0 }
 0x7c2   :  { %1304 = vadd.xlane.f32.xlu1 %v1303_v20  ;;  %v1296_v22 = vpop.xlane.xlu2 %1295  ;;  %v2732_v20 = vld [vmem:[#allocation2 + $0x8] sm:$0xff] }
 0x7c3   :  { %v1298_v14 = vmul.f32 %v1296_v22, %v3709_v19  ;;  %v2629_v22 = vld [vmem:[#allocation11 + $0x1] ss:$0 sm:$0xff] }
 0x7c5   :  { %v3789_v23 = vsub.f32 %v1288_v13, %v1298_v14 }
 0x7c7   :  { %v1302_v25 = vmul.f32 %v3789_v23, %v3789_v23 }
 0x7c9   :  { %v1306_v27 = vsel %vm371_vm0, %v1302_v25, 0.0 }
 0x7ca   :  { %1307 = vadd.xlane.f32.xlu0 %v1306_v27  ;;  %v2627_v27 = vld [vmem:[#allocation7 + $0x1] ss:$0 sm:$0xff] }
 0x835   :  { %v1305_v40 = vpop.xlane.xlu1 %1304 }
 0x836   :  { %v1309_v41 = vmul.f32 %v1305_v40, %v3709_v19 }
 0x838   :  { %v1311_v30 = vadd.f32 1e-05, %v1309_v41 }
 0x83a   :  { %2683 = vrsqrt.f32 %v1311_v30  ;;  %vm1319_vm13 = vweird.f32 %v1311_v30 }
 0x83d   :  { %v1308_v47 = vpop.xlane.xlu0 %1307 }
 0x83e   :  { %v1310_v49 = vmul.f32 %v1308_v47, %v3709_v19 }
 0x840   :  { %v2684_v56 = vpop.eup %2683  ;;  %v1312_v52 = vadd.f32 1e-05, %v1310_v49 }
 0x841   :  { %v1314_v51 = vmul.f32 %v2684_v56, %v1311_v30  ;;  %vm1320_vm12 = vweird.f32 %v2684_v56 }
 0x842   :  { %2685 = vrsqrt.f32 %v1312_v52  ;;  %vm1321_vm14 = vmor %vm1319_vm13, %vm1320_vm12  ;;  %vm1329_vm3 = vweird.f32 %v1312_v52 }
 0x843   :  { %v1315_v57 = vmul.f32 %v2684_v56, %v1314_v51 }
 0x845   :  { %v1316_v62 = vmul.f32 0.5, %v1315_v57  ;;  %v2734_v57 = vld [vmem:[#allocation5 + $0x8] sm:$0xff] }
 0x847   :  { %v1317_v48 = vsub.f32 1.5, %v1316_v62 }
 0x848   :  { %v2686_v58 = vpop.eup %2685 }
 0x849   :  { %v1318_v59 = vmul.f32 %v2684_v56, %v1317_v48  ;;  %v1324_v60 = vmul.f32 %v2686_v58, %v1312_v52  ;;  %vm1330_vm15 = vweird.f32 %v2686_v58 }
 0x84a   :  { %vm1331_vm4 = vmor %vm1329_vm3, %vm1330_vm15 }
 0x84b   :  { %v1322_v61 = vsel %vm1321_vm14, %v2684_v56, %v1318_v59  ;;  %v1325_v55 = vmul.f32 %v2686_v58, %v1324_v60 }
 0x84c   :  { %v1333_v0 = vmul.f32 %v1322_v61, %v3783_v18 }
 0x84d   :  { %v1326_v1 = vmul.f32 0.5, %v1325_v55 }
 0x84e   :  { %v1338_v2 = vmul.f32 %v2624_v42, %v1333_v0 }
 0x84f   :  { %v1327_v3 = vsub.f32 1.5, %v1326_v1 }
 0x850   :  { %v3845_v6 = vadd.f32 %v2625_v63, %v1338_v2 }
 0x851   :  { %v1328_v7 = vmul.f32 %v2686_v58, %v1327_v3 }
 0x852   :  { %2479 = vmatmul.msk.f32.vlgmr.msra.gmra.mxu1 %vm371_vm0, %v3845_v6  ;;  %2485 = vmatmul.msk.f32.vlgmr.msra.gmra.mxu0 %vm371_vm0, %v3845_v6 }
 0x853   :  { %v1332_v8 = vsel %vm1331_vm4, %v2686_v58, %v1328_v7  ;;  %2494 = vmatmul.msk.f32.vlgmr.msrb.gmra.mxu3 %vm371_vm0, %v3845_v6 }
 0x854   :  { %v1334_v21 = vmul.f32 %v1332_v8, %v3789_v23 }
 0x856   :  { %v1339_v9 = vmul.f32 %v2624_v42, %v1334_v21 }
 0x858   :  { %v3854_v10 = vadd.f32 %v2625_v63, %v1339_v9 }
 0x85a   :  { %2480 = vmatmul.msk.f32.gmra.mxu1 %vm371_vm0, %v3854_v10  ;;  %2486 = vmatmul.msk.f32.gmra.mxu0 %vm371_vm0, %v3854_v10 }
 0x85b   :  { %2495 = vmatmul.msk.f32.gmra.mxu3 %vm371_vm0, %v3854_v10 }
 0x862   :  { %2500 = vmatmul.msk.f32.vlgmr.msrb.gmra.mxu1 %vm371_vm0, %v3845_v6  ;;  %2502 = vmatmul.msk.f32.vlgmr.msrb.gmra.mxu0 %vm371_vm0, %v3845_v6 }
 0x86a   :  { %2501 = vmatmul.msk.f32.gmra.mxu1 %vm371_vm0, %v3854_v10  ;;  %2503 = vmatmul.msk.f32.gmra.mxu0 %vm371_vm0, %v3854_v10 }
 0x8cf   :  { %v3870_v11 = vpop.f32.mrf.mxu1  ;;  %v1404_v24 = vpop.f32.mrf.mxu0 }
 0x8d6   :  { %v1527_v14 = vpop.f32.mrf.mxu3 }
 0x8d7   :  { %v3872_v12 = vpop.f32.mrf.mxu1  ;;  %v1407_v13 = vpop.f32.mrf.mxu0  ;;  %v1528_v31 = vadd.f32 %v2627_v27, %v1527_v14 }
 0x8d8   :  { %1429 = vmatpush.msrb.mxu2 %v1407_v13 }
 0x8d9   :  { %v1533_v33 = vmul.f32 0.35355338, %v1528_v31 }
 0x8da   :  { %1430 = vmatpush.msrb.mxu2 %v1404_v24 }
 0x8db   :  { %2488 = vmatmul.msk.f32.vlgmr.msrb.gmra.mxu2 %vm405_vm1, %v2731_v15 }
 0x8de   :  { %v1530_v34 = vpop.f32.mrf.mxu3 }
 0x8df   :  { %v1562_v17 = vpop.f32.mrf.mxu1  ;;  %v1595_v18 = vpop.f32.mrf.mxu0  ;;  %v1531_v32 = vadd.f32 %v2627_v27, %v1530_v34 }
 0x8e0   :  { %v1563_v37 = vadd.f32 %v2628_v16, %v1562_v17  ;;  %v1596_v28 = vadd.f32 %v2629_v22, %v1595_v18 }
 0x8e1   :  { %v1534_v53 = vmul.f32 0.35355338, %v1531_v32 }
 0x8e2   :  { %1717 = vrot.lane.b32.xlu0 %v1563_v37, %s3235_s15 }
 0x8e3   :  { %2489 = vmatmul.msk.f32.gmra.mxu2 %vm405_vm1, %v2732_v20 }
 0x8e7   :  { %v1565_v23 = vpop.f32.mrf.mxu1  ;;  %v1598_v25 = vpop.f32.mrf.mxu0 }
 0x8e8   :  { %v1566_v29 = vadd.f32 %v2628_v16, %v1565_v23  ;;  %v1599_v43 = vadd.f32 %v2629_v22, %v1598_v25 }
 0x8ea   :  { %1704 = vmatpush.msra.mxu3 %v1599_v43  ;;  %1843 = vrot.lane.b32.xlu1 %v1566_v29, %s3237_s28  ;;  %v3878_v26 = vpack.i.bf16 %v1596_v28, %v1599_v43 }
 0x8eb   :  { %1719 = vrot.lane.b32.xlu2 %v1566_v29, %s3235_s15  ;;  %2504 = vmatpush.xpose.msk.msra.mxu2 %vm597_vm2, %v1566_v29 }
 0x8ec   :  { %1841 = vrot.lane.b32.xlu0 %v1563_v37, %s3237_s28  ;;  %1705 = vmatpush.msra.mxu3 %v1596_v28 }
 0x8ef   :  { %2505 = vmatpush.xpose.msk.msra.mxu2 %vm597_vm2, %v1563_v37 }
 0x8f2   :  { %2506 = vmatmul.msk.f32.vlgmr.msra.gmra.mxu2 %vm597_vm2, %v1533_v33  ;;  %1837 = vrot.lane.b32.xlu1 %v1533_v33, %s3237_s28 }
 0x8f3   :  { %1713 = vrot.lane.b32.xlu2 %v1533_v33, %s3235_s15 }
 0x8f4   :  { %1965 = vrot.lane.b32.xlu0 %v1566_v29, %s3236_s18 }
 0x8fa   :  { %2507 = vmatmul.msk.f32.gmra.mxu2 %vm597_vm2, %v1534_v53  ;;  %1839 = vrot.lane.b32.xlu1 %v1534_v53, %s3237_s28 }
 0x8fb   :  { %1715 = vrot.lane.b32.xlu2 %v1534_v53, %s3235_s15 }
 0x8fc   :  { %1959 = vrot.lane.b32.xlu0 %v1533_v33, %s3236_s18 }
 0x902   :  { %1961 = vrot.lane.b32.xlu1 %v1534_v53, %s3236_s18 }
 0x903   :  { %1963 = vrot.lane.b32.xlu2 %v1563_v37, %s3236_s18 }
 0x945   :  { %v1720_v36 = vpop.permute.xlu2 %1719 }
 0x946   :  { %2510 = vmatpush.xpose.msk.msra.mxu1 %vm597_vm2, %v1720_v36 }
 0x94d   :  { %v1714_v39 = vpop.permute.xlu2 %1713 }
 0x954   :  { %v1718_v38 = vpop.permute.xlu0 %1717 }
 0x955   :  { %2511 = vmatpush.xpose.msk.msra.mxu1 %vm597_vm2, %v1718_v38  ;;  %v1716_v30 = vpop.permute.xlu2 %1715 }
 0x958   :  { %2512 = vmatmul.msk.f32.vlgmr.msra.gmra.mxu1 %vm597_vm2, %v1714_v39 }
 0x95c   :  { %v1844_v40 = vpop.permute.xlu1 %1843 }
 0x95d   :  { %2516 = vmatpush.xpose.msk.msrb.mxu2 %vm597_vm2, %v1844_v40  ;;  %v1964_v46 = vpop.permute.xlu2 %1963 }
 0x95e   :  { %v1842_v41 = vpop.permute.xlu0 %1841  ;;  %v3900_v5 = vpop.f32.mrf.mxu2 }
 0x960   :  { %2513 = vmatmul.msk.f32.gmra.mxu1 %vm597_vm2, %v1716_v30 }
 0x961   :  { %2517 = vmatpush.xpose.msk.msrb.mxu2 %vm597_vm2, %v1842_v41 }
 0x964   :  { %v1838_v44 = vpop.permute.xlu1 %1837 }
 0x965   :  { %2518 = vmatmul.msk.f32.vlgmr.msrb.gmra.mxu2 %vm597_vm2, %v1838_v44 }
 0x966   :  { %v1966_v45 = vpop.permute.xlu0 %1965  ;;  %v3905_v35 = vpop.f32.mrf.mxu2 }
 0x967   :  { %2522 = vmatpush.xpose.msk.msrb.mxu1 %vm597_vm2, %v1966_v45 }
 0x96b   :  { %2523 = vmatpush.xpose.msk.msrb.mxu1 %vm597_vm2, %v1964_v46 }
 0x96c   :  { %v1840_v47 = vpop.permute.xlu1 %1839 }
 0x96d   :  { %2519 = vmatmul.msk.f32.gmra.mxu2 %vm597_vm2, %v1840_v47 }
 0x96e   :  { %v1960_v4 = vpop.permute.xlu0 %1959 }
 0x96f   :  { %2524 = vmatmul.msk.f32.vlgmr.msrb.gmra.mxu1 %vm597_vm2, %v1960_v4 }
 0x974   :  { %v1962_v49 = vpop.permute.xlu1 %1961 }
 0x975   :  { %v1630_v50 = vpop.f32.mrf.mxu2 }
 0x976   :  { %v1631_v56 = vadd.f32 %v2733_v54, %v1630_v50 }
 0x977   :  { %2525 = vmatmul.msk.f32.gmra.mxu1 %vm597_vm2, %v1962_v49 }
 0x978   :  { %v1636_v52 = vsel %vm405_vm1, %v1631_v56, -inf }
 0x979   :  { %1637 = vmax.xlane.f32.xlu2 %v1636_v52 }
 0x97d   :  { %v1633_v51 = vpop.f32.mrf.mxu2 }
 0x97e   :  { %v1634_v62 = vadd.f32 %v2734_v57, %v1633_v51 }
 0x980   :  { %v1639_v48 = vsel %vm405_vm1, %v1634_v62, -inf }
 0x981   :  { %1640 = vmax.xlane.f32.xlu1 %v1639_v48 }
 0x9d5   :  { %v1746_v58 = vpop.f32.mrf.mxu1 }
 0x9d6   :  { %v1747_v59 = vadd.f32 %v2733_v54, %v1746_v58 }
 0x9d8   :  { %v1752_v60 = vsel %vm405_vm1, %v1747_v59, -inf }
 0x9d9   :  { %1753 = vmax.xlane.f32.xlu0 %v1752_v60 }
 0x9dd   :  { %v1749_v42 = vpop.f32.mrf.mxu1 }
 0x9de   :  { %v1750_v61 = vadd.f32 %v2734_v57, %v1749_v42 }
 0x9e0   :  { %v1755_v55 = vsel %vm405_vm1, %v1750_v61, -inf }
 0x9e1   :  { %1756 = vmax.xlane.f32.xlu2 %v1755_v55 }
 0x9e8   :  { %v1870_v63 = vpop.f32.mrf.mxu2 }
 0x9e9   :  { %v1871_v0 = vadd.f32 %v2733_v54, %v1870_v63 }
 0x9eb   :  { %v1876_v1 = vsel %vm405_vm1, %v1871_v0, -inf }
 0x9ec   :  { %v1992_v2 = vpop.f32.mrf.mxu1  ;;  %v1638_v3 = vpop.xlane.xlu2 %1637  ;;  %1877 = vmax.xlane.f32.xlu0 %v1876_v1 }
 0x9ed   :  { %v1993_v7 = vadd.f32 %v2733_v54, %v1992_v2  ;;  %v1642_v8 = vsub.f32 %v1631_v56, %v1638_v3 }
 0x9ef   :  { %v1644_v21 = vmul.f32 1.442695, %v1642_v8  ;;  %v1998_v9 = vsel %vm405_vm1, %v1993_v7, -inf }
 0x9f0   :  { %1999 = vmax.xlane.f32.xlu1 %v1998_v9  ;;  %v1873_v24 = vpop.f32.mrf.mxu2 }
 0x9f1   :  { %2687 = vpow2.f32 %v1644_v21  ;;  %v1874_v13 = vadd.f32 %v2734_v57, %v1873_v24 }
 0x9f3   :  { %v1879_v15 = vsel %vm405_vm1, %v1874_v13, -inf }
 0x9f4   :  { %v1995_v16 = vpop.f32.mrf.mxu1  ;;  %v1641_v17 = vpop.xlane.xlu1 %1640  ;;  %1880 = vmax.xlane.f32.xlu2 %v1879_v15 }
 0x9f5   :  { %v1996_v18 = vadd.f32 %v2734_v57, %v1995_v16  ;;  %v1643_v37 = vsub.f32 %v1634_v62, %v1641_v17 }
 0x9f7   :  { %v3917_v20 = vpop.eup %2687  ;;  %v1646_v22 = vmul.f32 1.442695, %v1643_v37  ;;  %v2001_v14 = vsel %vm405_vm1, %v1996_v18, -inf }
 0x9f8   :  { %2002 = vmax.xlane.f32.xlu0 %v2001_v14  ;;  %v1648_v23 = vsel %vm405_vm1, %v3917_v20, 0.0 }
 0x9f9   :  { %2689 = vpow2.f32 %v1646_v22  ;;  %1649 = vadd.xlane.f32.xlu1 %v1648_v23 }
 0x9ff   :  { %v3922_v25 = vpop.eup %2689 }
 0xa00   :  { %v1651_v27 = vsel %vm405_vm1, %v3922_v25, 0.0 }
 0xa01   :  { %1652 = vadd.xlane.f32.xlu0 %v1651_v27 }
 0xa4c   :  { %v1754_v28 = vpop.xlane.xlu0 %1753 }
 0xa4d   :  { %v1758_v29 = vsub.f32 %v1747_v59, %v1754_v28 }
 0xa4f   :  { %v1760_v43 = vmul.f32 1.442695, %v1758_v29 }
 0xa51   :  { %2691 = vpow2.f32 %v1760_v43 }
 0xa54   :  { %v1757_v31 = vpop.xlane.xlu2 %1756 }
 0xa55   :  { %v1759_v33 = vsub.f32 %v1750_v61, %v1757_v31 }
 0xa57   :  { %v3926_v34 = vpop.eup %2691  ;;  %v1762_v32 = vmul.f32 1.442695, %v1759_v33 }
 0xa58   :  { %v1764_v53 = vsel %vm405_vm1, %v3926_v34, 0.0 }
 0xa59   :  { %2693 = vpow2.f32 %v1762_v32  ;;  %1765 = vadd.xlane.f32.xlu2 %v1764_v53 }
 0xa5f   :  { %v3930_v36 = vpop.eup %2693  ;;  %v1878_v38 = vpop.xlane.xlu0 %1877 }
 0xa60   :  { %v1882_v39 = vsub.f32 %v1871_v0, %v1878_v38  ;;  %v1767_v40 = vsel %vm405_vm1, %v3930_v36, 0.0 }
 0xa61   :  { %1768 = vadd.xlane.f32.xlu1 %v1767_v40 }
 0xa62   :  { %v1884_v41 = vmul.f32 1.442695, %v1882_v39 }
 0xa63   :  { %v2000_v30 = vpop.xlane.xlu1 %1999 }
 0xa64   :  { %2695 = vpow2.f32 %v1884_v41  ;;  %v2004_v44 = vsub.f32 %v1993_v7, %v2000_v30 }
 0xa66   :  { %v2006_v45 = vmul.f32 1.442695, %v2004_v44 }
 0xa67   :  { %v1881_v46 = vpop.xlane.xlu2 %1880 }
 0xa68   :  { %2697 = vpow2.f32 %v2006_v45  ;;  %v1883_v47 = vsub.f32 %v1874_v13, %v1881_v46 }
 0xa6a   :  { %v3934_v4 = vpop.eup %2695  ;;  %v1886_v49 = vmul.f32 1.442695, %v1883_v47 }
 0xa6b   :  { %v2003_v50 = vpop.xlane.xlu0 %2002  ;;  %v1888_v54 = vsel %vm405_vm1, %v3934_v4, 0.0 }
 0xa6c   :  { %2699 = vpow2.f32 %v1886_v49  ;;  %v2005_v56 = vsub.f32 %v1996_v18, %v2003_v50  ;;  %v1650_v52 = vpop.xlane.xlu1 %1649  ;;  %1889 = vadd.xlane.f32.xlu2 %v1888_v54 }
 0xa6d   :  { %2701 = vrcp.f32 %v1650_v52  ;;  %v1665_v63 = vand.u32 2147483648, %v1650_v52  ;;  %v1663_v2 = vand.u32 2147483647, %v1650_v52  ;;  %vm1659_vm6 = vweird.f32 %v1650_v52 }
 0xa6e   :  { %v3938_v51 = vpop.eup %2697  ;;  %v2008_v57 = vmul.f32 1.442695, %v2005_v56 }
 0xa6f   :  { %v2010_v62 = vsel %vm405_vm1, %v3938_v51, 0.0  ;;  %v1666_v8 = vor.u32 1.1754944e-38, %v1665_v63  ;;  %vm1664_vm8 = vcmp.eq.f32.partialorder %v1663_v2, 8.507059e+37 }
 0xa70   :  { %2703 = vpow2.f32 %v2008_v57  ;;  %2011 = vadd.xlane.f32.xlu0 %v2010_v62 }
 0xa72   :  { %v3942_v48 = vpop.eup %2699 }
 0xa73   :  { %v2702_v58 = vpop.eup %2701  ;;  %v1891_v59 = vsel %vm405_vm1, %v3942_v48, 0.0 }
 0xa74   :  { %v1655_v60 = vmul.f32 %v2702_v58, %v1650_v52  ;;  %v1653_v42 = vpop.xlane.xlu0 %1652  ;;  %1892 = vadd.xlane.f32.xlu2 %v1891_v59  ;;  %vm1660_vm5 = vweird.f32 %v2702_v58 }
 0xa75   :  { %2705 = vrcp.f32 %v1653_v42  ;;  %vm1661_vm7 = vmor %vm1659_vm6, %vm1660_vm5  ;;  %v1680_v16 = vand.u32 2147483648, %v1653_v42  ;;  %v1678_v18 = vand.u32 2147483647, %v1653_v42  ;;  %vm1674_vm12 = vweird.f32 %v1653_v42 }
 0xa76   :  { %v3946_v61 = vpop.eup %2703  ;;  %v1656_v55 = vsub.f32 1.0, %v1655_v60 }
 0xa77   :  { %v2013_v0 = vsel %vm405_vm1, %v3946_v61, 0.0  ;;  %v1681_v22 = vor.u32 1.1754944e-38, %v1680_v16  ;;  %vm1679_vm14 = vcmp.eq.f32.partialorder %v1678_v18, 8.507059e+37 }
 0xa78   :  { %v1657_v1 = vmul.f32 %v2702_v58, %v1656_v55  ;;  %2014 = vadd.xlane.f32.xlu0 %v2013_v0 }
 0xa7a   :  { %v1658_v3 = vadd.f32 %v2702_v58, %v1657_v1  ;;  %2599 = vrot.lane.b32.xlu1 %v3878_v26, %s3235_s15 }
 0xa7b   :  { %v2706_v7 = vpop.eup %2705 }
 0xa7c   :  { %v1662_v21 = vsel %vm1661_vm7, %v2702_v58, %v1658_v3  ;;  %v1670_v9 = vmul.f32 %v2706_v7, %v1653_v42  ;;  %vm1675_vm10 = vweird.f32 %v2706_v7 }
 0xa7d   :  { %v1667_v24 = vsel %vm1664_vm8, %v1666_v8, %v1662_v21  ;;  %vm1676_vm13 = vmor %vm1674_vm12, %vm1675_vm10 }
 0xa7e   :  { %v1671_v13 = vsub.f32 1.0, %v1670_v9  ;;  %v1668_v15 = vmul.f32 %v3917_v20, %v1667_v24 }
 0xa80   :  { %v1672_v17 = vmul.f32 %v2706_v7, %v1671_v13  ;;  %2508 = vmatmul.msk.f32.vlgmr.msra.gmra.mxu3 %vm405_vm1, %v1668_v15 }
 0xa82   :  { %v1673_v37 = vadd.f32 %v2706_v7, %v1672_v17  ;;  %v2113_v17 = vld [vmem:[#allocation13 + $0x28] sm:$0xff] }
 0xa84   :  { %v1677_v14 = vsel %vm1676_vm13, %v2706_v7, %v1673_v37 }
 0xa85   :  { %v1682_v23 = vsel %vm1679_vm14, %v1681_v22, %v1677_v14 }
 0xa86   :  { %v1683_v27 = vmul.f32 %v3922_v25, %v1682_v23 }
 0xa88   :  { %2509 = vmatmul.msk.f32.gmra.mxu3 %vm405_vm1, %v1683_v27 }
 0xa8c   :  { %2609 = vrot.lane.b32.xlu0 %v3878_v26, %s3236_s18  ;;  %2604 = vrot.lane.b32.xlu2 %v3878_v26, %s3237_s28  ;;  %s2417_s18 = sshll.u32 %s4174_s25, 4  ;;  %s2418_s18 = int_to_ptr.hbm [resolvable:$true] %s2417_s18 }
 0xacc   :  { %v1766_v20 = vpop.xlane.xlu2 %1765 }
 0xacd   :  { %2707 = vrcp.f32 %v1766_v20  ;;  %v1781_v41 = vand.u32 2147483648, %v1766_v20  ;;  %vm1775_vm3 = vweird.f32 %v1766_v20  ;;  %v1779_v30 = vand.u32 2147483647, %v1766_v20 }
 0xacf   :  { %v1782_v54 = vor.u32 1.1754944e-38, %v1781_v41  ;;  %vm1780_vm5 = vcmp.eq.f32.partialorder %v1779_v30, 8.507059e+37 }
 0xad3   :  { %v2708_v29 = vpop.eup %2707 }
 0xad4   :  { %v3960_v28 = vpop.xlane.xlu1 %1768  ;;  %v1771_v43 = vmul.f32 %v2708_v29, %v1766_v20  ;;  %vm1776_vm15 = vweird.f32 %v2708_v29 }
 0xad5   :  { %2709 = vrcp.f32 %v3960_v28  ;;  %vm1777_vm4 = vmor %vm1775_vm3, %vm1776_vm15  ;;  %vm1790_vm10 = vweird.f32 %v3960_v28  ;;  %v1796_v1 = vand.u32 2147483648, %v3960_v28  ;;  %v1794_v3 = vand.u32 2147483647, %v3960_v28 }
 0xad6   :  { %v1772_v31 = vsub.f32 1.0, %v1771_v43 }
 0xad7   :  { %v1797_v14 = vor.u32 1.1754944e-38, %v1796_v1  ;;  %vm1795_vm15 = vcmp.eq.f32.partialorder %v1794_v3, 8.507059e+37  ;;  %v2630_v1 = vld [vmem:[%s4204_s17 + $0x1] ss:$0 sm:$0xff] }
 0xad8   :  { %v1773_v32 = vmul.f32 %v2708_v29, %v1772_v31 }
 0xada   :  { %v1774_v26 = vadd.f32 %v2708_v29, %v1773_v32 }
 0xadb   :  { %v3963_v33 = vpop.eup %2709 }
 0xadc   :  { %v1786_v53 = vmul.f32 %v3963_v33, %v3960_v28  ;;  %v1778_v46 = vsel %vm1777_vm4, %v2708_v29, %v1774_v26  ;;  %vm1791_vm7 = vweird.f32 %v3963_v33 }
 0xadd   :  { %v1783_v58 = vsel %vm1780_vm5, %v1782_v54, %v1778_v46  ;;  %vm3993_vm14 = vmor %vm1790_vm10, %vm1791_vm7 }
 0xade   :  { %v1787_v39 = vsub.f32 1.0, %v1786_v53  ;;  %v1784_v16 = vmul.f32 %v3926_v34, %v1783_v58 }
 0xadf   :  { %v1890_v25 = vpop.xlane.xlu2 %1889 }
 0xae0   :  { %2711 = vrcp.f32 %v1890_v25  ;;  %v1788_v47 = vmul.f32 %v3963_v33, %v1787_v39  ;;  %v1905_v56 = vand.u32 2147483648, %v1890_v25  ;;  %v1903_v57 = vand.u32 2147483647, %v1890_v25 }
 0xae1   :  { %vm1899_vm8 = vweird.f32 %v1890_v25 }
 0xae2   :  { %v1789_v63 = vadd.f32 %v3963_v33, %v1788_v47  ;;  %v1906_v2 = vor.u32 1.1754944e-38, %v1905_v56  ;;  %vm1904_vm13 = vcmp.eq.f32.partialorder %v1903_v57, 8.507059e+37 }
 0xae3   :  { %v3967_v38 = vpop.xlane.xlu0 %2011 }
 0xae4   :  { %2713 = vrcp.f32 %v3967_v38  ;;  %v1793_v37 = vsel %vm3993_vm14, %v3963_v33, %v1789_v63  ;;  %v2025_v41 = vand.u32 2147483647, %v3967_v38 }
 0xae5   :  { %v1798_v31 = vsel %vm1795_vm15, %v1797_v14, %v1793_v37 }
 0xae6   :  { %v2712_v40 = vpop.eup %2711  ;;  %v1799_v32 = vmul.f32 %v3930_v36, %v1798_v31  ;;  %v2631_v31 = vld [vmem:[#allocation14 + $0x1] ss:$0 sm:$0xff] }
 0xae7   :  { %v1895_v44 = vmul.f32 %v2712_v40, %v1890_v25  ;;  %v3970_v45 = vpop.xlane.xlu2 %1892  ;;  %vm1900_vm6 = vweird.f32 %v2712_v40 }
 0xae8   :  { %2715 = vrcp.f32 %v3970_v45  ;;  %vm1901_vm12 = vmor %vm1899_vm8, %vm1900_vm6  ;;  %v1920_v23 = vand.u32 2147483648, %v3970_v45  ;;  %v1918_v28 = vand.u32 2147483647, %v3970_v45  ;;  %vm1914_vm4 = vweird.f32 %v3970_v45 }
 0xae9   :  { %v1896_v49 = vsub.f32 1.0, %v1895_v44  ;;  %vm2021_vm8 = vweird.f32 %v3967_v38 }
 0xaea   :  { %v3974_v50 = vpop.eup %2713  ;;  %v1921_v25 = vor.u32 1.1754944e-38, %v1920_v23  ;;  %vm1919_vm6 = vcmp.eq.f32.partialorder %v1918_v28, 8.507059e+37 }
 0xaeb   :  { %v1897_v52 = vmul.f32 %v2712_v40, %v1896_v49  ;;  %v3976_v62 = vpop.xlane.xlu0 %2014  ;;  %v2017_v59 = vmul.f32 %v3974_v50, %v3967_v38  ;;  %vm2022_vm7 = vweird.f32 %v3974_v50 }
 0xaec   :  { %2717 = vrcp.f32 %v3976_v62  ;;  %v2600_v60 = vpop.permute.xlu1 %2599  ;;  %vm2023_vm10 = vmor %vm2021_vm8, %vm2022_vm7  ;;  %v2042_v56 = vand.u32 2147483648, %v3976_v62  ;;  %vm2036_vm14 = vweird.f32 %v3976_v62 }
 0xaed   :  { %v1898_v42 = vadd.f32 %v2712_v40, %v1897_v52  ;;  %v2601_v55 = vunpack.i.l.bf16 %v2600_v60  ;;  %v2602_v21 = vunpack.i.h.bf16 %v2600_v60  ;;  %v2018_v13 = vsub.f32 1.0, %v2017_v59 }
 0xaee   :  { %v2716_v0 = vpop.eup %2715  ;;  %v2043_v57 = vor.u32 1.1754944e-38, %v2042_v56 }
 0xaef   :  { %v1902_v7 = vsel %vm1901_vm12, %v2712_v40, %v1898_v42  ;;  %v1910_v8 = vmul.f32 %v2716_v0, %v3970_v45  ;;  %1828 = vmatpush.msra.mxu0 %v2601_v55  ;;  %v2605_v9 = vpop.permute.xlu2 %2604  ;;  %vm1915_vm3 = vweird.f32 %v2716_v0  ;;  %v2019_v29 = vmul.f32 %v3974_v50, %v2018_v13 }
 0xaf0   :  { %v1907_v24 = vsel %vm1904_vm13, %v1906_v2, %v1902_v7  ;;  %v2606_v15 = vunpack.i.l.bf16 %v2605_v9  ;;  %v2607_v27 = vunpack.i.h.bf16 %v2605_v9  ;;  %vm1916_vm5 = vmor %vm1914_vm4, %vm1915_vm3  ;;  %v2027_v40 = vand.u32 2147483648, %v3967_v38 }
 0xaf1   :  { %v1911_v18 = vsub.f32 1.0, %v1910_v8  ;;  %1829 = vmatpush.msra.mxu0 %v2602_v21  ;;  %v1908_v20 = vmul.f32 %v3934_v4, %v1907_v24  ;;  %v2020_v4 = vadd.f32 %v3974_v50, %v2019_v29  ;;  %vm2026_vm12 = vcmp.eq.f32.partialorder %v2025_v41, 8.507059e+37 }
 0xaf2   :  { %v2718_v22 = vpop.eup %2717  ;;  %2514 = vmatmul.msk.f32.vlgmr.msra.gmra.mxu0 %vm405_vm1, %v1784_v16  ;;  %1950 = vmatpush.msrb.mxu3 %v2606_v15  ;;  %v2028_v45 = vor.u32 1.1754944e-38, %v2027_v40  ;;  %v1433_v2 = vadd.f32 %v2630_v1, %v3900_v5  ;;  %v1436_v21 = vadd.f32 %v2630_v1, %v3905_v35  ;;  %v2115_v15 = vld [vmem:[#allocation13 + $0x38] sm:$0xff]  ;;  %v2114_v16 = vld [vmem:[#allocation13 + $0x30] sm:$0xff]  ;;  %v2112_v5 = vld [vmem:[#allocation13 + $0x20] sm:$0xff] }
 0xaf3   :  { %v1912_v34 = vmul.f32 %v2716_v0, %v1911_v18  ;;  %v2032_v43 = vmul.f32 %v2718_v22, %v3976_v62  ;;  %v2024_v36 = vsel %vm2023_vm10, %v3974_v50, %v2020_v4  ;;  %vm2037_vm13 = vweird.f32 %v2718_v22  ;;  %2139 = vmatpush.msra.mxu2 %v2115_v15  ;;  %v2216_v1 = vld [vmem:[#allocation22 + $0x38] sm:$0xff] }
 0xaf4   :  { %1951 = vmatpush.msrb.mxu3 %v2607_v27  ;;  %v2029_v47 = vsel %vm2026_vm12, %v2028_v45, %v2024_v36  ;;  %v2040_v50 = vand.u32 2147483647, %v3976_v62  ;;  %vm2038_vm15 = vmor %vm2036_vm14, %vm2037_vm13  ;;  %v1438_v3 = vmax.f32 %v1433_v2, 0.0  ;;  %v1439_v9 = vmax.f32 %v1436_v21, 0.0  ;;  %v2215_v2 = vld [vmem:[#allocation22 + $0x30] sm:$0xff] }
 0xaf5   :  { %2520 = vmatmul.msk.f32.vlgmr.msrb.gmra.mxu3 %vm405_vm1, %v1908_v20  ;;  %v1913_v33 = vadd.f32 %v2716_v0, %v1912_v34  ;;  %v2033_v26 = vsub.f32 1.0, %v2032_v43  ;;  %2140 = vmatpush.msra.mxu2 %v2114_v16 }
 0xaf6   :  { %vm2041_vm3 = vcmp.eq.f32.partialorder %v2040_v50, 8.507059e+37  ;;  %v1440_v7 = vadd.f32 %v1438_v3, %v3845_v6  ;;  %v1441_v24 = vadd.f32 %v1439_v9, %v3854_v10  ;;  %2240 = vmatpush.msra.mxu3 %v2216_v1 }
 0xaf7   :  { %v1917_v53 = vsel %vm1916_vm5, %v2716_v0, %v1913_v33  ;;  %v2034_v44 = vmul.f32 %v2718_v22, %v2033_v26  ;;  %2141 = vmatpush.msra.mxu2 %v2113_v17 }
 0xaf8   :  { %v1922_v39 = vsel %vm1919_vm6, %v1921_v25, %v1917_v53  ;;  %v1446_v8 = vsel %vm371_vm0, %v1440_v7, 0.0  ;;  %v1449_v13 = vsel %vm371_vm0, %v1441_v24, 0.0  ;;  %2241 = vmatpush.msra.mxu3 %v2215_v2  ;;  %v2533_v2 = vld [vmem:[%s4168_s19 + $0x48] sm:$0xff] }
 0xaf9   :  { %v1923_v30 = vmul.f32 %v3942_v48, %v1922_v39  ;;  %v2035_v54 = vadd.f32 %v2718_v22, %v2034_v44  ;;  %v2030_v48 = vmul.f32 %v3938_v51, %v2029_v47  ;;  %2142 = vmatpush.msra.mxu2 %v2112_v5  ;;  %v2539_v5 = vld [vmem:[%s4168_s19 + $0x78] sm:$0xff] }
 0xafa   :  { %2515 = vmatmul.msk.f32.gmra.mxu0 %vm405_vm1, %v1799_v32  ;;  %2281 = vmatpush.msra.mxu1 %v2539_v5 }
 0xafb   :  { %v2039_v52 = vsel %vm2038_vm15, %v2718_v22, %v2035_v54 }
 0xafc   :  { %v2044_v58 = vsel %vm2041_vm3, %v2043_v57, %v2039_v52 }
 0xafd   :  { %2521 = vmatmul.msk.f32.gmra.mxu3 %vm405_vm1, %v1923_v30  ;;  %v2045_v59 = vmul.f32 %v3946_v61, %v2044_v58 }
 0xafe   :  { %v2610_v46 = vpop.permute.xlu0 %2609 }
 0xaff   :  { %v2611_v49 = vunpack.i.l.bf16 %v2610_v46  ;;  %v2612_v38 = vunpack.i.h.bf16 %v2610_v46 }
 0xb01   :  { %2072 = vmatpush.msrb.mxu0 %v2611_v49 }
 0xb03   :  { %2073 = vmatpush.msrb.mxu0 %v2612_v38  ;;  %v1707_v60 = vpop.f32.mrf.mxu3 }
 0xb04   :  { %2526 = vmatmul.msk.f32.vlgmr.msrb.gmra.mxu0 %vm405_vm1, %v2030_v48 }
 0xb0b   :  { %v1710_v55 = vpop.f32.mrf.mxu3 }
 0xb0c   :  { %2527 = vmatmul.msk.f32.gmra.mxu0 %vm405_vm1, %v2045_v59 }
 0xb6f   :  { %v1831_v42 = vpop.f32.mrf.mxu0 }
 0xb70   :  { %2083 = vrot.lane.b32.xlu1 %v1831_v42, %s3215_s1 }
 0xb77   :  { %v1834_v51 = vpop.f32.mrf.mxu0 }
 0xb78   :  { %2085 = vrot.lane.b32.xlu2 %v1834_v51, %s3215_s1  ;;  %v1953_v62 = vpop.f32.mrf.mxu3 }
 0xb79   :  { %2091 = vrot.lane.b32.xlu1 %v1953_v62, %s3217_s6 }
 0xb80   :  { %v1956_v63 = vpop.f32.mrf.mxu3 }
 0xb81   :  { %v2075_v0 = vpop.f32.mrf.mxu0  ;;  %2093 = vrot.lane.b32.xlu1 %v1956_v63, %s3217_s6 }
 0xb82   :  { %2099 = vrot.lane.b32.xlu0 %v2075_v0, %s3238_s30 }
 0xb89   :  { %v2078_v61 = vpop.f32.mrf.mxu0 }
 0xb8a   :  { %2101 = vrot.lane.b32.xlu0 %v2078_v61, %s3238_s30 }
 0xba1   :  { %1447 = vadd.xlane.f32.xlu2 %v1446_v8  ;;  %v2213_v8 = vld [vmem:[#allocation22 + $0x20] sm:$0xff] }
 0xbb4   :  { %1450 = vadd.xlane.f32.xlu0 %v1449_v13 }
 0xbd2   :  { %v2086_v27 = vpop.permute.xlu2 %2085 }
 0xbd3   :  { %v2106_v20 = vsel %vm597_vm2, %v1710_v55, %v2086_v27 }
 0xbe2   :  { %v2084_v18 = vpop.permute.xlu1 %2083 }
 0xbe3   :  { %v2105_v22 = vsel %vm597_vm2, %v1707_v60, %v2084_v18  ;;  %v2538_v18 = vld [vmem:[%s4168_s19 + $0x70] sm:$0xff] }
 0xbe4   :  { %2282 = vmatpush.msra.mxu1 %v2538_v18 }
 0xbeb   :  { %v2092_v37 = vpop.permute.xlu1 %2091 }
 0xbec   :  { %v2107_v35 = vsel %vm405_vm1, %v2105_v22, %v2092_v37 }
 0xbf3   :  { %v2094_v34 = vpop.permute.xlu1 %2093 }
 0xbf4   :  { %v2100_v14 = vpop.permute.xlu0 %2099  ;;  %v2108_v28 = vsel %vm405_vm1, %v2106_v20, %v2094_v34  ;;  %v2536_v20 = vld [vmem:[%s4168_s19 + $0x60] sm:$0xff] }
 0xbf5   :  { %v2109_v23 = vsel %vm1106_vm9, %v2107_v35, %v2100_v14 }
 0xbf6   :  { %2528 = vmatmul.msk.f32.vlgmr.msra.gmra.mxu2 %vm371_vm0, %v2109_v23  ;;  %v2537_v23 = vld [vmem:[%s4168_s19 + $0x68] sm:$0xff] }
 0xbf7   :  { %2283 = vmatpush.msra.mxu1 %v2537_v23 }
 0xbf9   :  { %2284 = vmatpush.msra.mxu1 %v2536_v20 }
 0xbfc   :  { %v2102_v29 = vpop.permute.xlu0 %2101 }
 0xbfd   :  { %v2110_v43 = vsel %vm1106_vm9, %v2108_v28, %v2102_v29 }
 0xbfe   :  { %2529 = vmatmul.msk.f32.gmra.mxu2 %vm371_vm0, %v2110_v43 }
 0xc14   :  { %v1448_v33 = vpop.xlane.xlu2 %1447 }
 0xc15   :  { %v1452_v32 = vmul.f32 %v1448_v33, %v3709_v19 }
 0xc17   :  { %v4050_v26 = vsub.f32 %v1440_v7, %v1452_v32  ;;  %v2214_v7 = vld [vmem:[#allocation22 + $0x28] sm:$0xff] }
 0xc18   :  { %2242 = vmatpush.msra.mxu3 %v2214_v7 }
 0xc19   :  { %v1456_v44 = vmul.f32 %v4050_v26, %v4050_v26 }
 0xc1a   :  { %2243 = vmatpush.msra.mxu3 %v2213_v8 }
 0xc1b   :  { %v1458_v47 = vsel %vm371_vm0, %v1456_v44, 0.0 }
 0xc27   :  { %v1451_v40 = vpop.xlane.xlu0 %1450 }
 0xc28   :  { %v1453_v30 = vmul.f32 %v1451_v40, %v3709_v19  ;;  %v2632_v40 = vld [vmem:[#allocation16 + $0x1] ss:$0 sm:$0xff] }
 0xc2a   :  { %v4057_v46 = vsub.f32 %v1441_v24, %v1453_v30 }
 0xc2c   :  { %v1457_v49 = vmul.f32 %v4057_v46, %v4057_v46 }
 0xc2e   :  { %v1461_v54 = vsel %vm371_vm0, %v1457_v49, 0.0  ;;  %v2633_v49 = vld [vmem:[#allocation17 + $0x1] ss:$0 sm:$0xff] }
 0xc79   :  { %v2144_v25 = vpop.f32.mrf.mxu2 }
 0xc7a   :  { %v2145_v53 = vadd.f32 %v2631_v31, %v2144_v25 }
 0xc7c   :  { %v2150_v4 = vadd.f32 %v2145_v53, %v3845_v6 }
 0xc7e   :  { %v2156_v39 = vsel %vm371_vm0, %v2150_v4, 0.0 }
 0xc7f   :  { %2157 = vadd.xlane.f32.xlu1 %v2156_v39 }
 0xc81   :  { %v2147_v41 = vpop.f32.mrf.mxu2 }
 0xc82   :  { %v2148_v36 = vadd.f32 %v2631_v31, %v2147_v41  ;;  %v2535_v31 = vld [vmem:[%s4168_s19 + $0x58] sm:$0xff] }
 0xc83   :  { %2285 = vmatpush.msra.mxu1 %v2535_v31 }
 0xc84   :  { %v2151_v45 = vadd.f32 %v2148_v36, %v3854_v10 }
 0xc86   :  { %v2159_v6 = vsel %vm371_vm0, %v2151_v45, 0.0 }
 0xc87   :  { %1459 = vadd.xlane.f32.xlu1 %v1458_v47  ;;  %2160 = vadd.xlane.f32.xlu2 %v2159_v6 }
 0xc8f   :  { %1462 = vadd.xlane.f32.xlu2 %v1461_v54 }
 0xcf2   :  { %v2158_v56 = vpop.xlane.xlu1 %2157 }
 0xcf3   :  { %v2162_v38 = vmul.f32 %v2158_v56, %v3709_v19  ;;  %v2635_v56 = vld [vmem:[#allocation20 + $0x1] ss:$0 sm:$0xff] }
 0xcf5   :  { %v4065_v48 = vsub.f32 %v2150_v4, %v2162_v38 }
 0xcf7   :  { %v2166_v10 = vmul.f32 %v4065_v48, %v4065_v48 }
 0xcf9   :  { %v2168_v50 = vsel %vm371_vm0, %v2166_v10, 0.0 }
 0xcfa   :  { %v2161_v52 = vpop.xlane.xlu2 %2160  ;;  %2169 = vadd.xlane.f32.xlu0 %v2168_v50  ;;  %v1460_v42 = vpop.xlane.xlu1 %1459 }
 0xcfb   :  { %v2163_v57 = vmul.f32 %v2161_v52, %v3709_v19  ;;  %v1464_v55 = vmul.f32 %v1460_v42, %v3709_v19 }
 0xcfd   :  { %v4071_v58 = vsub.f32 %v2151_v45, %v2163_v57  ;;  %v1466_v51 = vadd.f32 1e-05, %v1464_v55  ;;  %v2634_v45 = vld [vmem:[#allocation19 + $0x1] ss:$0 sm:$0xff] }
 0xcff   :  { %v2167_v59 = vmul.f32 %v4071_v58, %v4071_v58  ;;  %2719 = vrsqrt.f32 %v1466_v51  ;;  %vm1474_vm2 = vweird.f32 %v1466_v51 }
 0xd01   :  { %v2171_v60 = vsel %vm371_vm0, %v2167_v59, 0.0 }
 0xd02   :  { %2172 = vadd.xlane.f32.xlu1 %v2171_v60  ;;  %v1463_v62 = vpop.xlane.xlu2 %1462 }
 0xd03   :  { %v1465_v63 = vmul.f32 %v1463_v62, %v3709_v19 }
 0xd05   :  { %v4078_v0 = vadd.f32 1e-05, %v1465_v63  ;;  %v2720_v61 = vpop.eup %2719 }
 0xd06   :  { %v1469_v3 = vmul.f32 %v2720_v61, %v1466_v51  ;;  %vm1475_vm1 = vweird.f32 %v2720_v61 }
 0xd07   :  { %2721 = vrsqrt.f32 %v4078_v0  ;;  %vm1476_vm9 = vmor %vm1474_vm2, %vm1475_vm1  ;;  %vm1484_vm8 = vweird.f32 %v4078_v0 }
 0xd08   :  { %v1470_v21 = vmul.f32 %v2720_v61, %v1469_v3  ;;  %v2636_v3 = vld [vmem:[#allocation23 + $0x1] ss:$0 sm:$0xff] }
 0xd0a   :  { %v1471_v16 = vmul.f32 0.5, %v1470_v21 }
 0xd0c   :  { %v1472_v37 = vsub.f32 1.5, %v1471_v16 }
 0xd0d   :  { %v2722_v24 = vpop.eup %2721 }
 0xd0e   :  { %v1479_v17 = vmul.f32 %v2722_v24, %v4078_v0  ;;  %v1473_v28 = vmul.f32 %v2720_v61, %v1472_v37  ;;  %vm1485_vm5 = vweird.f32 %v2722_v24 }
 0xd0f   :  { %vm1486_vm10 = vmor %vm1484_vm8, %vm1485_vm5  ;;  %vm2408_vm5 = vcmask 293888  }
 0xd10   :  { %v1480_v22 = vmul.f32 %v2722_v24, %v1479_v17  ;;  %v1477_v25 = vsel %vm1476_vm9, %v2720_v61, %v1473_v28 }
 0xd11   :  { %v1488_v41 = vmul.f32 %v1477_v25, %v4050_v26 }
 0xd12   :  { %v1481_v29 = vmul.f32 0.5, %v1480_v22 }
 0xd13   :  { %v1493_v54 = vmul.f32 %v2632_v40, %v1488_v41 }
 0xd14   :  { %v1482_v32 = vsub.f32 1.5, %v1481_v29 }
 0xd15   :  { %v1498_v57 = vadd.f32 %v2633_v49, %v1493_v54 }
 0xd16   :  { %v1483_v30 = vmul.f32 %v2722_v24, %v1482_v32  ;;  %v2545_v32 = vld [vmem:[%s4172_s23 + $0x38] sm:$0xff] }
 0xd17   :  { %2379 = vmatpush.msra.mxu0 %v2545_v32 }
 0xd18   :  { %v1487_v10 = vsel %vm1486_vm10, %v2722_v24, %v1483_v30 }
 0xd19   :  { %v1489_v59 = vmul.f32 %v1487_v10, %v4057_v46  ;;  %v2534_v46 = vld [vmem:[%s4168_s19 + $0x50] sm:$0xff] }
 0xd1a   :  { %2286 = vmatpush.msra.mxu1 %v2534_v46 }
 0xd1b   :  { %v1494_v63 = vmul.f32 %v2632_v40, %v1489_v59 }
 0xd1c   :  { %2287 = vmatpush.msra.mxu1 %v2533_v2  ;;  %v2640_v2 = vld [vmem:[#allocation29 + $0x1] ss:$0 sm:$0xff] }
 0xd1d   :  { %v1499_v0 = vadd.f32 %v2633_v49, %v1494_v63 }
 0xd6d   :  { %v2170_v9 = vpop.xlane.xlu0 %2169 }
 0xd6e   :  { %v2174_v13 = vmul.f32 %v2170_v9, %v3709_v19 }
 0xd70   :  { %v2176_v15 = vadd.f32 1e-05, %v2174_v13 }
 0xd72   :  { %2723 = vrsqrt.f32 %v2176_v15  ;;  %vm2184_vm6 = vweird.f32 %v2176_v15 }
 0xd75   :  { %v2173_v35 = vpop.xlane.xlu1 %2172 }
 0xd76   :  { %v2175_v14 = vmul.f32 %v2173_v35, %v3709_v19 }
 0xd78   :  { %v2724_v27 = vpop.eup %2723  ;;  %v2177_v34 = vadd.f32 1e-05, %v2175_v14 }
 0xd79   :  { %v2179_v43 = vmul.f32 %v2724_v27, %v2176_v15  ;;  %vm2185_vm4 = vweird.f32 %v2724_v27  ;;  %v2637_v15 = vld [vmem:[#allocation25 + $0x1] ss:$0 sm:$0xff] }
 0xd7a   :  { %2725 = vrsqrt.f32 %v2177_v34  ;;  %vm2186_vm7 = vmor %vm2184_vm6, %vm2185_vm4  ;;  %vm2194_vm13 = vweird.f32 %v2177_v34  ;;  %vm2405_vm4 = vcmask 31744  }
 0xd7b   :  { %v2180_v33 = vmul.f32 %v2724_v27, %v2179_v43 }
 0xd7d   :  { %v2181_v53 = vmul.f32 0.5, %v2180_v33 }
 0xd7f   :  { %v2182_v4 = vsub.f32 1.5, %v2181_v53  ;;  %v2544_v53 = vld [vmem:[%s4172_s23 + $0x30] sm:$0xff] }
 0xd80   :  { %v2726_v39 = vpop.eup %2725  ;;  %2380 = vmatpush.msra.mxu0 %v2544_v53 }
 0xd81   :  { %v2183_v36 = vmul.f32 %v2724_v27, %v2182_v4  ;;  %v2189_v44 = vmul.f32 %v2726_v39, %v2177_v34  ;;  %vm2195_vm12 = vweird.f32 %v2726_v39  ;;  %v2543_v4 = vld [vmem:[%s4172_s23 + $0x28] sm:$0xff] }
 0xd82   :  { %vm2196_vm14 = vmor %vm2194_vm13, %vm2195_vm12  ;;  %2381 = vmatpush.msra.mxu0 %v2543_v4 }
 0xd83   :  { %v2187_v47 = vsel %vm2186_vm7, %v2724_v27, %v2183_v36  ;;  %v2190_v6 = vmul.f32 %v2726_v39, %v2189_v44 }
 0xd84   :  { %v2198_v38 = vmul.f32 %v2187_v47, %v4065_v48 }
 0xd85   :  { %v2191_v50 = vmul.f32 0.5, %v2190_v6 }
 0xd86   :  { %v2203_v26 = vmul.f32 %v2634_v45, %v2198_v38 }
 0xd87   :  { %v2192_v52 = vsub.f32 1.5, %v2191_v50 }
 0xd88   :  { %v2208_v60 = vadd.f32 %v2635_v56, %v2203_v26  ;;  %v2638_v26 = vld [vmem:[#allocation26 + $0x1] ss:$0 sm:$0xff] }
 0xd89   :  { %v2193_v42 = vmul.f32 %v2726_v39, %v2192_v52 }
 0xd8a   :  { %v2210_v55 = vadd.f32 %v2208_v60, %v1498_v57  ;;  %v2639_v60 = vld [vmem:[#allocation28 + $0x1] ss:$0 sm:$0xff] }
 0xd8b   :  { %v2197_v51 = vsel %vm2196_vm14, %v2726_v39, %v2193_v42  ;;  %v2542_v39 = vld [vmem:[%s4172_s23 + $0x20] sm:$0xff]  ;;  %s3240_s23 = smov 4  }
 0xd8c   :  { %v2199_v62 = vmul.f32 %v2197_v51, %v4071_v58  ;;  %2530 = vmatmul.msk.f32.vlgmr.msra.gmra.mxu3 %vm371_vm0, %v2210_v55  ;;  %v2532_v58 = vld [vmem:[%s4168_s19 + $0x40] sm:$0xff]  ;;  %2382 = vmatpush.msra.mxu0 %v2542_v39 }
 0xd8d   :  { %2288 = vmatpush.msra.mxu1 %v2532_v58 }
 0xd8e   :  { %v2204_v48 = vmul.f32 %v2634_v45, %v2199_v62 }
 0xd90   :  { %v2209_v61 = vadd.f32 %v2635_v56, %v2204_v48 }
 0xd92   :  { %v2211_v1 = vadd.f32 %v2209_v61, %v1499_v0 }
 0xd94   :  { %2531 = vmatmul.msk.f32.gmra.mxu3 %vm371_vm0, %v2211_v1 }
 0xe0f   :  { %v2245_v7 = vpop.f32.mrf.mxu3 }
 0xe10   :  { %v2246_v8 = vadd.f32 %v2636_v3, %v2245_v7 }
 0xe12   :  { %v2251_v21 = vmax.f32 %v2246_v8, 0.0 }
 0xe14   :  { %2540 = vmatmul.msk.f32.vlgmr.msra.gmra.mxu1 %vm1257_vm11, %v2251_v21 }
 0xe17   :  { %v2248_v9 = vpop.f32.mrf.mxu3 }
 0xe18   :  { %v2249_v24 = vadd.f32 %v2636_v3, %v2248_v9 }
 0xe1a   :  { %v2252_v13 = vmax.f32 %v2249_v24, 0.0 }
 0xe1c   :  { %2541 = vmatmul.msk.f32.gmra.mxu1 %vm1257_vm11, %v2252_v13 }
 0xe91   :  { %v2290_v16 = vpop.f32.mrf.mxu1 }
 0xe92   :  { %v2291_v17 = vadd.f32 %v2637_v15, %v2290_v16 }
 0xe94   :  { %v2296_v5 = vadd.f32 %v2291_v17, %v2210_v55 }
 0xe96   :  { %v2302_v18 = vsel %vm371_vm0, %v2296_v5, 0.0 }
 0xe97   :  { %2303 = vadd.xlane.f32.xlu0 %v2302_v18 }
 0xe99   :  { %v2293_v37 = vpop.f32.mrf.mxu1 }
 0xe9a   :  { %v2294_v22 = vadd.f32 %v2637_v15, %v2293_v37 }
 0xe9c   :  { %v2297_v35 = vadd.f32 %v2294_v22, %v2211_v1  ;;  %v2626_v1 = vld [vmem:[#allocation29] ss:$0 sm:$0xff] }
 0xe9d   :  { %v1377_v46 = vadd.f32 %v2626_v1, %v3870_v11  ;;  %v1380_v9 = vadd.f32 %v2626_v1, %v3872_v12 }
 0xe9e   :  { %v2305_v14 = vsel %vm371_vm0, %v2297_v35, 0.0 }
 0xe9f   :  { %2306 = vadd.xlane.f32.xlu2 %v2305_v14 }
 0xf0a   :  { %v2304_v23 = vpop.xlane.xlu0 %2303 }
 0xf0b   :  { %v2308_v27 = vmul.f32 %v2304_v23, %v3709_v19 }
 0xf0d   :  { %v2310_v34 = vsub.f32 %v2296_v5, %v2308_v27 }
 0xf0f   :  { %v2312_v20 = vmul.f32 %v2310_v34, %v2310_v34 }
 0xf11   :  { %v2314_v28 = vsel %vm371_vm0, %v2312_v20, 0.0 }
 0xf12   :  { %2315 = vadd.xlane.f32.xlu1 %v2314_v28  ;;  %v2307_v29 = vpop.xlane.xlu2 %2306 }
 0xf13   :  { %v2309_v43 = vmul.f32 %v2307_v29, %v3709_v19 }
 0xf15   :  { %v2311_v31 = vsub.f32 %v2297_v35, %v2309_v43 }
 0xf17   :  { %v2313_v33 = vmul.f32 %v2311_v31, %v2311_v31 }
 0xf19   :  { %v2317_v25 = vsel %vm371_vm0, %v2313_v33, 0.0 }
 0xf1a   :  { %2318 = vadd.xlane.f32.xlu0 %v2317_v25 }
 0xf85   :  { %v2316_v40 = vpop.xlane.xlu1 %2315 }
 0xf86   :  { %v2320_v41 = vmul.f32 %v2316_v40, %v3709_v19 }
 0xf88   :  { %v2322_v30 = vadd.f32 1e-05, %v2320_v41 }
 0xf8a   :  { %2727 = vrsqrt.f32 %v2322_v30  ;;  %vm2330_vm15 = vweird.f32 %v2322_v30 }
 0xf8d   :  { %v2319_v36 = vpop.xlane.xlu0 %2318 }
 0xf8e   :  { %v2321_v44 = vmul.f32 %v2319_v36, %v3709_v19 }
 0xf90   :  { %v2728_v45 = vpop.eup %2727  ;;  %v2323_v47 = vadd.f32 1e-05, %v2321_v44 }
 0xf91   :  { %v2325_v6 = vmul.f32 %v2728_v45, %v2322_v30  ;;  %vm2331_vm11 = vweird.f32 %v2728_v45 }
 0xf92   :  { %2729 = vrsqrt.f32 %v2323_v47  ;;  %vm2332_vm3 = vmor %vm2330_vm15, %vm2331_vm11  ;;  %vm2340_vm2 = vweird.f32 %v2323_v47 }
 0xf93   :  { %v2326_v49 = vmul.f32 %v2728_v45, %v2325_v6 }
 0xf95   :  { %v2327_v54 = vmul.f32 0.5, %v2326_v49 }
 0xf97   :  { %v2328_v56 = vsub.f32 1.5, %v2327_v54 }
 0xf98   :  { %v2730_v38 = vpop.eup %2729 }
 0xf99   :  { %v2329_v10 = vmul.f32 %v2728_v45, %v2328_v56  ;;  %v2335_v50 = vmul.f32 %v2730_v38, %v2323_v47  ;;  %vm2341_vm1 = vweird.f32 %v2730_v38 }
 0xf9a   :  { %vm2342_vm9 = vmor %vm2340_vm2, %vm2341_vm1 }
 0xf9b   :  { %v2333_v52 = vsel %vm2332_vm3, %v2728_v45, %v2329_v10  ;;  %v2336_v57 = vmul.f32 %v2730_v38, %v2335_v50 }
 0xf9c   :  { %v2344_v59 = vmul.f32 %v2333_v52, %v2310_v34 }
 0xf9d   :  { %v2337_v42 = vmul.f32 0.5, %v2336_v57 }
 0xf9e   :  { %v2349_v19 = vmul.f32 %v2638_v26, %v2344_v59 }
 0xf9f   :  { %v2338_v55 = vsub.f32 1.5, %v2337_v42 }
 0xfa0   :  { %v2354_v51 = vadd.f32 %v2639_v60, %v2349_v19 }
 0xfa1   :  { %v2339_v62 = vmul.f32 %v2730_v38, %v2338_v55 }
 0xfa2   :  { %2399 = vrot.lane.b32.xlu2 %v2354_v51, %s3240_s23  ;;  %2546 = vmatmul.msk.f32.vlgmr.msra.gmra.mxu0 %vm371_vm0, %v2354_v51 }
 0xfa3   :  { %v2343_v63 = vsel %vm2342_vm9, %v2730_v38, %v2339_v62 }
 0xfa4   :  { %v2345_v48 = vmul.f32 %v2343_v63, %v2311_v31 }
 0xfa6   :  { %v2350_v0 = vmul.f32 %v2638_v26, %v2345_v48 }
 0xfa8   :  { %v2355_v61 = vadd.f32 %v2639_v60, %v2350_v0 }
 0xfaa   :  { %2401 = vrot.lane.b32.xlu1 %v2355_v61, %s3240_s23  ;;  %2547 = vmatmul.msk.f32.gmra.mxu0 %vm371_vm0, %v2355_v61 }
 0xffc   :  { %v2400_v8 = vpop.permute.xlu2 %2399 }
0x101c   :  { %v2402_v15 = vpop.permute.xlu1 %2401 }
0x101f   :  { %v2384_v58 = vpop.f32.mrf.mxu0 }
0x1020   :  { %v2390_v3 = vadd.f32 %v2384_v58, %v1377_v46 }
0x1022   :  { %v2397_v7 = vadd.f32 %v2640_v2, %v2390_v3 }
0x1024   :  { %v2406_v21 = vsel %vm2405_vm4, %v2397_v7, %v2400_v8 }
0x1025   :  { %2409 = vst.msk [vmem:[#allocation31] sm:$0xff] %vm2408_vm5, %v2406_v21 }
0x1027   :  { %v2387_v24 = vpop.f32.mrf.mxu0 }
0x1028   :  { %v2391_v13 = vadd.f32 %v2387_v24, %v1380_v9 }
0x102a   :  { %v2398_v11 = vadd.f32 %v2640_v2, %v2391_v13 }
0x102c   :  { %v2407_v16 = vsel %vm2405_vm4, %v2398_v11, %v2402_v15 }
0x102d   :  { %2410 = vst.msk [vmem:[#allocation31 + $0x8] sm:$0xff] %vm2408_vm5, %v2407_v16 }
0x102e   :  { %2423 = dma.vmem_to_hbm [thread:$0]  %s2416_s24, 256, %s2418_s18, [#allocation4], %s4196_s10, %s4196_s10, %s3215_s1  }
0x102f   :  { %3211 = dma.done.wait [#allocation4], 256  }
0x1030   :  { %3212 = vsyncadd [#allocation4], 4294967040 }
0x1031   :  { %2428 = vsyncpa [#allocation3], 1 }
0x1032   :  { %2429 = vsyncpa [#allocation6], 1 }
0x1033   :  { %2430 = vsyncpa [#allocation9], 1 }
0x1034   :  { %2431 = vsyncpa [#allocation12], 1 }
0x1035   :  { %2432 = vsyncpa [#allocation15], 1 }
0x1036   :  { %2433 = vsyncpa [#allocation18], 1 }
0x1037   :  { %2434 = vsyncpa [#allocation21], 1 }
0x1038   :  { %2435 = vsyncpa [#allocation24], 1 }
0x1039   :  { %2436 = vsyncpa [#allocation27], 1 }
0x103a   :  { %2437 = vsyncpa [#allocation30], 1 }
0x103b   :  { %2438 = vsyncpa [#allocation4], 1 }

</bundles_post_ra>
